<compile_context>
chip_gen: v6e
topology: v6e:2x2x1
jax: 0.10.0
libtpu: 0.0.40
codegen_flags: <defaults>
</compile_context>

<pallas_src>
import jax
import jax.numpy as jnp
from jax.experimental import pallas as pl
from jax.experimental.pallas import tpu as pltpu


def _pick_row_tile(h):
    for d in (8, 4, 2, 1):
        if h % d == 0:
            return d
    return 1


def _upsample_only(x_nhwc):
    B, H, W, C = x_nhwc.shape
    TIH = _pick_row_tile(H)

    def up_kernel(x_ref, o_ref):
        xv = x_ref[0]                                             # (TIH, W, C)
        o_ref[...] = jnp.broadcast_to(
            xv[:, None, :, None, :], (TIH, 2, W, 2, C))[None]     # (1,TIH,2,W,2,C)

    up = pl.pallas_call(
        up_kernel,
        out_shape=jax.ShapeDtypeStruct((B, H, 2, W, 2, C), x_nhwc.dtype),
        grid=(B, H // TIH),
        in_specs=[pl.BlockSpec((1, TIH, W, C), lambda b, t: (b, t, 0, 0))],
        out_specs=pl.BlockSpec((1, TIH, 2, W, 2, C),
                               lambda b, t: (b, t, 0, 0, 0, 0)),
        compiler_params=pltpu.CompilerParams(
            dimension_semantics=("parallel", "parallel")),
    )(x_nhwc)
    return up.reshape(B, 2 * H, 2 * W, C)


def _fused_upsample_conv(x_nhwc, w_oihw, bias):
    B, H, W, C = x_nhwc.shape
    Cout = w_oihw.shape[0]
    TIH = _pick_row_tile(H)
    NT = H // TIH

    # ---- precompute phase weights in the wrapper (O(weights), one-time) ----
    w_hwio = jnp.transpose(w_oihw, (2, 3, 1, 0))                  # (3,3,Cin,Cout)
    # S[p, d, k] = 1 iff original 3-tap index k contributes to phase p, 2-tap d.
    S = jnp.array([[[1.0, 0.0, 0.0], [0.0, 1.0, 1.0]],
                   [[1.0, 1.0, 0.0], [0.0, 0.0, 1.0]]], dtype=w_hwio.dtype)
    w_phase = jnp.einsum('pak,qbl,klio->pqabio', S, S, w_hwio)    # (2,2,2,2,Cin,Cout)
    w_packed = w_phase.reshape(2, 2, 4 * C, Cout)                 # taps (0,0),(0,1),(1,0),(1,1)
    b2 = bias.reshape(1, Cout).astype(jnp.float32)

    def conv_kernel(x_ref, w_ref, b_ref, o_ref):
        t = pl.program_id(1)
        nt = pl.num_programs(1)
        r0 = t * TIH

        # Gather TIH rows + 1-row halo from the resident original image; zero
        # the halo rows that fall outside the image (the conv's row padding).
        mid = x_ref[0, pl.ds(r0, TIH), :, :]                      # (TIH, W, C)
        top = x_ref[0, pl.ds(jnp.maximum(r0 - 1, 0), 1), :, :]    # (1, W, C)
        bot = x_ref[0, pl.ds(jnp.minimum(r0 + TIH, H - 1), 1), :, :]
        top = jnp.where(t > 0, top, jnp.zeros_like(top))
        bot = jnp.where(t < nt - 1, bot, jnp.zeros_like(bot))
        rows = jnp.concatenate([top, mid, bot], axis=0)           # (TIH+2, W, C)
        zcol = jnp.zeros((TIH + 2, 1, C), rows.dtype)
        xpad = jnp.concatenate([zcol, rows, zcol], axis=1)        # (TIH+2, W+2, C)

        bias_v = b_ref[...]                                       # (1, Cout) f32
        phase_rows = []
        for pr in range(2):
            per_pc = []
            for pc in range(2):
                parts = [xpad[pr + dy:pr + dy + TIH, pc + dx:pc + dx + W, :]
                         for dy in range(2) for dx in range(2)]
                lhs = jnp.concatenate(parts, axis=-1).reshape(TIH * W, 4 * C)
                acc = jnp.dot(lhs, w_ref[pr, pc, :, :],
                              preferred_element_type=jnp.float32) + bias_v
                per_pc.append(acc.reshape(TIH, W, Cout).astype(o_ref.dtype))
            phase_rows.append(jnp.stack(per_pc, axis=2))          # (TIH, W, 2, Cout)
        y6 = jnp.stack(phase_rows, axis=1)                        # (TIH, 2, W, 2, Cout)
        o_ref[...] = y6[None]                                     # full-block dense store

    itemsize = x_nhwc.dtype.itemsize
    est = (2 * H * W * C * itemsize                   # resident input (double-buffered)
           + 2 * TIH * 2 * W * 2 * Cout * itemsize    # output tile (double-buffered)
           + 2 * 2 * 4 * C * Cout * itemsize + 4 * Cout
           + 8 * (TIH + 2) * (W + 2) * C * 4          # in-kernel temporaries
           + 8 * TIH * W * 4 * C * 4)                 # im2col LHS per phase
    vmem_limit = int(min(64 * 1024 * 1024, max(32 * 1024 * 1024, 2 * est)))

    y_blk = pl.pallas_call(
        conv_kernel,
        out_shape=jax.ShapeDtypeStruct((B, H, 2, W, 2, Cout), x_nhwc.dtype),
        grid=(B, NT),
        in_specs=[
            pl.BlockSpec((1, H, W, C), lambda b, t: (b, 0, 0, 0)),   # resident per batch
            pl.BlockSpec((2, 2, 4 * C, Cout), lambda b, t: (0, 0, 0, 0)),
            pl.BlockSpec((1, Cout), lambda b, t: (0, 0)),
        ],
        out_specs=pl.BlockSpec((1, TIH, 2, W, 2, Cout),
                               lambda b, t: (b, t, 0, 0, 0, 0)),
        compiler_params=pltpu.CompilerParams(
            dimension_semantics=("parallel", "parallel"),
            vmem_limit_bytes=vmem_limit),
    )(x_nhwc, w_packed, b2)
    return y_blk.reshape(B, 2 * H, 2 * W, Cout)


def upsample2d_forward(x_nchw, w_oihw=None, bias=None, with_conv=True):
    x = jnp.transpose(x_nchw, (0, 2, 3, 1))           # NCHW -> NHWC
    if with_conv:
        y = _fused_upsample_conv(x, w_oihw, bias)
    else:
        y = _upsample_only(x)
    return jnp.transpose(y, (0, 3, 1, 2))             # NHWC -> NCHW


if __name__ == "__main__":
    key = jax.random.PRNGKey(0)
    k1, k2, k3 = jax.random.split(key, 3)

    B, C, H, W = 2, 4, 16, 16
    x = jax.random.normal(k1, (B, C, H, W), dtype=jnp.float32)
    # Conv2d(in_channels, in_channels, kernel_size=3): weight (C, C, 3, 3), bias (C,)
    w = jax.random.normal(k2, (C, C, 3, 3), dtype=jnp.float32) * 0.1
    b = jax.random.normal(k3, (C,), dtype=jnp.float32) * 0.1

    y = upsample2d_forward(x, w, b, with_conv=True)
    y = jax.block_until_ready(y)

    # pure-JAX reference (same semantics as the PyTorch module)
    x_up_ref = jnp.repeat(jnp.repeat(x, 2, axis=2), 2, axis=3)
    y_ref = jax.lax.conv_general_dilated(
        x_up_ref, w, window_strides=(1, 1), padding=((1, 1), (1, 1)),
        dimension_numbers=("NCHW", "OIHW", "NCHW")) + b[None, :, None, None]

    assert y.shape == (B, C, 2 * H, 2 * W), y.shape
    assert jnp.allclose(y, y_ref, atol=1e-4, rtol=1e-4), float(
        jnp.max(jnp.abs(y - y_ref)))

    # also exercise the with_conv=False path
    y2 = jax.block_until_ready(upsample2d_forward(x, with_conv=False))
    assert jnp.allclose(y2, x_up_ref), "upsample-only path mismatch"

    print("KERNEL_OK")
</pallas_src>

<mosaic_0001>
module attributes {stable_mosaic.version = 11 : i64} {
  func.func @conv_kernel(%arg0: i32, %arg1: i32, %arg2: memref<1x16x16x4xf32, #tpu.memory_space<vmem>>, %arg3: memref<2x2x16x4xf32, #tpu.memory_space<vmem>>, %arg4: memref<1x4xf32, #tpu.memory_space<vmem>>, %arg5: memref<1x8x2x16x2x4xf32, #tpu.memory_space<vmem>>) attributes {dimension_semantics = [#tpu.dimension_semantics<parallel>, #tpu.dimension_semantics<parallel>], iteration_bounds = array<i64: 2, 2>, scalar_prefetch = 0 : i64, scratch_operands = 0 : i64, tpu.core_type = #tpu.core_type<tc>, window_params = [{transform_indices = @transform_0, window_bounds = array<i64: 1, 16, 16, 4>}, {pipeline_mode = #tpu.pipeline_mode<synchronous>, transform_indices = @transform_1, window_bounds = array<i64: 2, 2, 16, 4>}, {pipeline_mode = #tpu.pipeline_mode<synchronous>, transform_indices = @transform_2, window_bounds = array<i64: 1, 4>}, {transform_indices = @transform_3, window_bounds = array<i64: 1, 8, 2, 16, 2, 4>}]} {
    %c8_i32 = arith.constant 8 : i32
    %0 = arith.muli %arg1, %c8_i32 : i32
    %c0 = arith.constant 0 : index
    %1 = arith.index_cast %0 : i32 to index
    %c0_0 = arith.constant 0 : index
    %c0_1 = arith.constant 0 : index
    %2 = vector.load %arg2[%c0, %1, %c0_0, %c0_1] : memref<1x16x16x4xf32, #tpu.memory_space<vmem>>, vector<1x8x16x4xf32>
    %3 = vector.shape_cast %2 : vector<1x8x16x4xf32> to vector<8x16x4xf32>
    %c1_i32 = arith.constant 1 : i32
    %4 = arith.subi %0, %c1_i32 : i32
    %c0_i32 = arith.constant 0 : i32
    %5 = arith.maxsi %4, %c0_i32 : i32
    %c0_2 = arith.constant 0 : index
    %6 = arith.index_cast %5 : i32 to index
    %c0_3 = arith.constant 0 : index
    %c0_4 = arith.constant 0 : index
    %7 = vector.load %arg2[%c0_2, %6, %c0_3, %c0_4] : memref<1x16x16x4xf32, #tpu.memory_space<vmem>>, vector<1x1x16x4xf32>
    %8 = vector.shape_cast %7 : vector<1x1x16x4xf32> to vector<1x16x4xf32>
    %c8_i32_5 = arith.constant 8 : i32
    %9 = arith.addi %0, %c8_i32_5 : i32
    %c15_i32 = arith.constant 15 : i32
    %10 = arith.minsi %9, %c15_i32 : i32
    %c0_6 = arith.constant 0 : index
    %11 = arith.index_cast %10 : i32 to index
    %c0_7 = arith.constant 0 : index
    %c0_8 = arith.constant 0 : index
    %12 = vector.load %arg2[%c0_6, %11, %c0_7, %c0_8] : memref<1x16x16x4xf32, #tpu.memory_space<vmem>>, vector<1x1x16x4xf32>
    %13 = vector.shape_cast %12 : vector<1x1x16x4xf32> to vector<1x16x4xf32>
    %c0_i32_9 = arith.constant 0 : i32
    %14 = arith.cmpi sgt, %arg1, %c0_i32_9 : i32
    %cst = arith.constant 0.000000e+00 : f32
    %15 = vector.broadcast %cst : f32 to vector<1x16x4xf32>
    %16 = arith.select %14, %8, %15 : vector<1x16x4xf32>
    %c1_i32_10 = arith.constant 1 : i32
    %17 = arith.cmpi slt, %arg1, %c1_i32_10 : i32
    %cst_11 = arith.constant 0.000000e+00 : f32
    %18 = vector.broadcast %cst_11 : f32 to vector<1x16x4xf32>
    %19 = arith.select %17, %13, %18 : vector<1x16x4xf32>
    %20 = tpu.concatenate %16, %3, %19 in 0 : vector<1x16x4xf32>, vector<8x16x4xf32>, vector<1x16x4xf32> -> vector<10x16x4xf32>
    %cst_12 = arith.constant 0.000000e+00 : f32
    %21 = vector.broadcast %cst_12 : f32 to vector<10x1x4xf32>
    %22 = tpu.concatenate %21, %20, %21 in 1 : vector<10x1x4xf32>, vector<10x16x4xf32>, vector<10x1x4xf32> -> vector<10x18x4xf32>
    %c0_13 = arith.constant 0 : index
    %c0_14 = arith.constant 0 : index
    %23 = vector.load %arg4[%c0_13, %c0_14] : memref<1x4xf32, #tpu.memory_space<vmem>>, vector<1x4xf32>
    %24 = vector.extract_strided_slice %22 {offsets = [0, 0, 0], sizes = [8, 16, 4], strides = [1, 1, 1]} : vector<10x18x4xf32> to vector<8x16x4xf32>
    %25 = vector.extract_strided_slice %22 {offsets = [0, 1, 0], sizes = [8, 16, 4], strides = [1, 1, 1]} : vector<10x18x4xf32> to vector<8x16x4xf32>
    %26 = vector.extract_strided_slice %22 {offsets = [1, 0, 0], sizes = [8, 16, 4], strides = [1, 1, 1]} : vector<10x18x4xf32> to vector<8x16x4xf32>
    %27 = vector.extract_strided_slice %22 {offsets = [1, 1, 0], sizes = [8, 16, 4], strides = [1, 1, 1]} : vector<10x18x4xf32> to vector<8x16x4xf32>
    %28 = tpu.concatenate %24, %25, %26, %27 in 2 : vector<8x16x4xf32>, vector<8x16x4xf32>, vector<8x16x4xf32>, vector<8x16x4xf32> -> vector<8x16x16xf32>
    %29 = vector.shape_cast %28 : vector<8x16x16xf32> to vector<128x16xf32>
    %c0_15 = arith.constant 0 : index
    %c0_16 = arith.constant 0 : index
    %c0_17 = arith.constant 0 : index
    %c0_18 = arith.constant 0 : index
    %30 = vector.load %arg3[%c0_15, %c0_16, %c0_17, %c0_18] : memref<2x2x16x4xf32, #tpu.memory_space<vmem>>, vector<1x1x16x4xf32>
    %31 = vector.shape_cast %30 : vector<1x1x16x4xf32> to vector<16x4xf32>
    %cst_19 = arith.constant dense<0.000000e+00> : vector<128x4xf32>
    %32 = tpu.matmul %29, %31, %cst_19 {dimension_numbers = #tpu.dot_dimension_numbers<[1], [0], [0], [1], [0, 0, 1, 1], [], []>} : vector<128x16xf32>, vector<16x4xf32>, vector<128x4xf32> -> vector<128x4xf32>
    %33 = vector.broadcast %23 : vector<1x4xf32> to vector<128x4xf32>
    %34 = arith.addf %32, %33 : vector<128x4xf32>
    %35 = vector.shape_cast %34 : vector<128x4xf32> to vector<8x16x4xf32>
    %36 = vector.extract_strided_slice %22 {offsets = [0, 1, 0], sizes = [8, 16, 4], strides = [1, 1, 1]} : vector<10x18x4xf32> to vector<8x16x4xf32>
    %37 = vector.extract_strided_slice %22 {offsets = [0, 2, 0], sizes = [8, 16, 4], strides = [1, 1, 1]} : vector<10x18x4xf32> to vector<8x16x4xf32>
    %38 = vector.extract_strided_slice %22 {offsets = [1, 1, 0], sizes = [8, 16, 4], strides = [1, 1, 1]} : vector<10x18x4xf32> to vector<8x16x4xf32>
    %39 = vector.extract_strided_slice %22 {offsets = [1, 2, 0], sizes = [8, 16, 4], strides = [1, 1, 1]} : vector<10x18x4xf32> to vector<8x16x4xf32>
    %40 = tpu.concatenate %36, %37, %38, %39 in 2 : vector<8x16x4xf32>, vector<8x16x4xf32>, vector<8x16x4xf32>, vector<8x16x4xf32> -> vector<8x16x16xf32>
    %41 = vector.shape_cast %40 : vector<8x16x16xf32> to vector<128x16xf32>
    %c0_20 = arith.constant 0 : index
    %c1 = arith.constant 1 : index
    %c0_21 = arith.constant 0 : index
    %c0_22 = arith.constant 0 : index
    %42 = vector.load %arg3[%c0_20, %c1, %c0_21, %c0_22] : memref<2x2x16x4xf32, #tpu.memory_space<vmem>>, vector<1x1x16x4xf32>
    %43 = vector.shape_cast %42 : vector<1x1x16x4xf32> to vector<16x4xf32>
    %cst_23 = arith.constant dense<0.000000e+00> : vector<128x4xf32>
    %44 = tpu.matmul %41, %43, %cst_23 {dimension_numbers = #tpu.dot_dimension_numbers<[1], [0], [0], [1], [0, 0, 1, 1], [], []>} : vector<128x16xf32>, vector<16x4xf32>, vector<128x4xf32> -> vector<128x4xf32>
    %45 = vector.broadcast %23 : vector<1x4xf32> to vector<128x4xf32>
    %46 = arith.addf %44, %45 : vector<128x4xf32>
    %47 = vector.shape_cast %46 : vector<128x4xf32> to vector<8x16x4xf32>
    %48 = vector.shape_cast %35 : vector<8x16x4xf32> to vector<8x16x1x4xf32>
    %49 = vector.shape_cast %47 : vector<8x16x4xf32> to vector<8x16x1x4xf32>
    %50 = tpu.concatenate %48, %49 in 2 : vector<8x16x1x4xf32>, vector<8x16x1x4xf32> -> vector<8x16x2x4xf32>
    %51 = vector.extract_strided_slice %22 {offsets = [1, 0, 0], sizes = [8, 16, 4], strides = [1, 1, 1]} : vector<10x18x4xf32> to vector<8x16x4xf32>
    %52 = vector.extract_strided_slice %22 {offsets = [1, 1, 0], sizes = [8, 16, 4], strides = [1, 1, 1]} : vector<10x18x4xf32> to vector<8x16x4xf32>
    %53 = vector.extract_strided_slice %22 {offsets = [2, 0, 0], sizes = [8, 16, 4], strides = [1, 1, 1]} : vector<10x18x4xf32> to vector<8x16x4xf32>
    %54 = vector.extract_strided_slice %22 {offsets = [2, 1, 0], sizes = [8, 16, 4], strides = [1, 1, 1]} : vector<10x18x4xf32> to vector<8x16x4xf32>
    %55 = tpu.concatenate %51, %52, %53, %54 in 2 : vector<8x16x4xf32>, vector<8x16x4xf32>, vector<8x16x4xf32>, vector<8x16x4xf32> -> vector<8x16x16xf32>
    %56 = vector.shape_cast %55 : vector<8x16x16xf32> to vector<128x16xf32>
    %c1_24 = arith.constant 1 : index
    %c0_25 = arith.constant 0 : index
    %c0_26 = arith.constant 0 : index
    %c0_27 = arith.constant 0 : index
    %57 = vector.load %arg3[%c1_24, %c0_25, %c0_26, %c0_27] : memref<2x2x16x4xf32, #tpu.memory_space<vmem>>, vector<1x1x16x4xf32>
    %58 = vector.shape_cast %57 : vector<1x1x16x4xf32> to vector<16x4xf32>
    %cst_28 = arith.constant dense<0.000000e+00> : vector<128x4xf32>
    %59 = tpu.matmul %56, %58, %cst_28 {dimension_numbers = #tpu.dot_dimension_numbers<[1], [0], [0], [1], [0, 0, 1, 1], [], []>} : vector<128x16xf32>, vector<16x4xf32>, vector<128x4xf32> -> vector<128x4xf32>
    %60 = vector.broadcast %23 : vector<1x4xf32> to vector<128x4xf32>
    %61 = arith.addf %59, %60 : vector<128x4xf32>
    %62 = vector.shape_cast %61 : vector<128x4xf32> to vector<8x16x4xf32>
    %63 = vector.extract_strided_slice %22 {offsets = [1, 1, 0], sizes = [8, 16, 4], strides = [1, 1, 1]} : vector<10x18x4xf32> to vector<8x16x4xf32>
    %64 = vector.extract_strided_slice %22 {offsets = [1, 2, 0], sizes = [8, 16, 4], strides = [1, 1, 1]} : vector<10x18x4xf32> to vector<8x16x4xf32>
    %65 = vector.extract_strided_slice %22 {offsets = [2, 1, 0], sizes = [8, 16, 4], strides = [1, 1, 1]} : vector<10x18x4xf32> to vector<8x16x4xf32>
    %66 = vector.extract_strided_slice %22 {offsets = [2, 2, 0], sizes = [8, 16, 4], strides = [1, 1, 1]} : vector<10x18x4xf32> to vector<8x16x4xf32>
    %67 = tpu.concatenate %63, %64, %65, %66 in 2 : vector<8x16x4xf32>, vector<8x16x4xf32>, vector<8x16x4xf32>, vector<8x16x4xf32> -> vector<8x16x16xf32>
    %68 = vector.shape_cast %67 : vector<8x16x16xf32> to vector<128x16xf32>
    %c1_29 = arith.constant 1 : index
    %c1_30 = arith.constant 1 : index
    %c0_31 = arith.constant 0 : index
    %c0_32 = arith.constant 0 : index
    %69 = vector.load %arg3[%c1_29, %c1_30, %c0_31, %c0_32] : memref<2x2x16x4xf32, #tpu.memory_space<vmem>>, vector<1x1x16x4xf32>
    %70 = vector.shape_cast %69 : vector<1x1x16x4xf32> to vector<16x4xf32>
    %cst_33 = arith.constant dense<0.000000e+00> : vector<128x4xf32>
    %71 = tpu.matmul %68, %70, %cst_33 {dimension_numbers = #tpu.dot_dimension_numbers<[1], [0], [0], [1], [0, 0, 1, 1], [], []>} : vector<128x16xf32>, vector<16x4xf32>, vector<128x4xf32> -> vector<128x4xf32>
    %72 = vector.broadcast %23 : vector<1x4xf32> to vector<128x4xf32>
    %73 = arith.addf %71, %72 : vector<128x4xf32>
    %74 = vector.shape_cast %73 : vector<128x4xf32> to vector<8x16x4xf32>
    %75 = vector.shape_cast %62 : vector<8x16x4xf32> to vector<8x16x1x4xf32>
    %76 = vector.shape_cast %74 : vector<8x16x4xf32> to vector<8x16x1x4xf32>
    %77 = tpu.concatenate %75, %76 in 2 : vector<8x16x1x4xf32>, vector<8x16x1x4xf32> -> vector<8x16x2x4xf32>
    %78 = vector.shape_cast %50 : vector<8x16x2x4xf32> to vector<8x1x16x2x4xf32>
    %79 = vector.shape_cast %77 : vector<8x16x2x4xf32> to vector<8x1x16x2x4xf32>
    %80 = tpu.concatenate %78, %79 in 1 : vector<8x1x16x2x4xf32>, vector<8x1x16x2x4xf32> -> vector<8x2x16x2x4xf32>
    %81 = vector.shape_cast %80 : vector<8x2x16x2x4xf32> to vector<1x8x2x16x2x4xf32>
    %c0_34 = arith.constant 0 : index
    %c0_35 = arith.constant 0 : index
    %c0_36 = arith.constant 0 : index
    %c0_37 = arith.constant 0 : index
    %c0_38 = arith.constant 0 : index
    %c0_39 = arith.constant 0 : index
    %82 = vector.load %arg5[%c0_34, %c0_35, %c0_36, %c0_37, %c0_38, %c0_39] : memref<1x8x2x16x2x4xf32, #tpu.memory_space<vmem>>, vector<1x8x2x16x2x4xf32>
    tpu.vector_store %arg5[%c0_34, %c0_35, %c0_36, %c0_37, %c0_38, %c0_39], %81 {strides = array<i32>} : memref<1x8x2x16x2x4xf32, #tpu.memory_space<vmem>>, vector<1x8x2x16x2x4xf32>,
    return
  }
  func.func @transform_0(%arg0: i32, %arg1: i32) -> (i32, i32, i32, i32) {
    %c0_i32 = arith.constant 0 : i32
    %c0_i32_0 = arith.constant 0 : i32
    %c0_i32_1 = arith.constant 0 : i32
    %c0_i32_2 = arith.constant 0 : i32
    return %arg0, %c0_i32, %c0_i32_0, %c0_i32_1 : i32, i32, i32, i32
  }
  func.func @transform_1(%arg0: i32, %arg1: i32) -> (i32, i32, i32, i32) {
    %c0_i32 = arith.constant 0 : i32
    %c0_i32_0 = arith.constant 0 : i32
    %c0_i32_1 = arith.constant 0 : i32
    %c0_i32_2 = arith.constant 0 : i32
    %c0_i32_3 = arith.constant 0 : i32
    return %c0_i32, %c0_i32_0, %c0_i32_1, %c0_i32_2 : i32, i32, i32, i32
  }
  func.func @transform_2(%arg0: i32, %arg1: i32) -> (i32, i32) {
    %c0_i32 = arith.constant 0 : i32
    %c0_i32_0 = arith.constant 0 : i32
    %c0_i32_1 = arith.constant 0 : i32
    return %c0_i32, %c0_i32_0 : i32, i32
  }
  func.func @transform_3(%arg0: i32, %arg1: i32) -> (i32, i32, i32, i32, i32, i32) {
    %c0_i32 = arith.constant 0 : i32
    %c0_i32_0 = arith.constant 0 : i32
    %c0_i32_1 = arith.constant 0 : i32
    %c0_i32_2 = arith.constant 0 : i32
    %c0_i32_3 = arith.constant 0 : i32
    return %arg0, %arg1, %c0_i32, %c0_i32_0, %c0_i32_1, %c0_i32_2 : i32, i32, i32, i32, i32, i32
  }
}

</mosaic_0001>

<bundles_post_ra>
// kernel: tpu_custom_call.1
= control target key start
LH: loop header
LB: loop body
LE: loop exit
PB: predicated region body
PF: predicated region fallthrough
CT: control target
= control target key end

     0   :  { %s7225_s12 = smov 0   ;;  %s7227_s13 = smov 0   ;;  %s10284_s0 = inlined_call_operand.vmem [shape: f32[2,16,16,4], index: 0, kind: input, shape index: {}]   ;;  %s10285_s1 = inlined_call_operand.vmem [shape: f32[2,2,16,4], index: 1, kind: input, shape index: {}]   ;;  %s10286_s2 = inlined_call_operand.vmem [shape: f32[1,4], index: 2, kind: input, shape index: {}]   ;;  %s10287_s3 = inlined_call_operand.vmem [shape: f32[2,16,2,16,2,4], index: 3, kind: output, shape index: {}]  }
   0x1   :  { %s7229_s14 = smov 0   ;;  %s7231_s15 = smov 0  }
   0x2   :  { %s7233_s16 = smov 0  }
   0x3 LB: > { %s22_s17 = sadd.s32 1, %s7191_s14  ;;  %s25_s18 = sadd.s32 1, %s7195_s15  ;;  %s7199_s16 = sphi %s7233_s16, %s13_s16   ;;  %s7195_s15 = sphi %s7231_s15, %s10291_s15   ;;  %s7191_s14 = sphi %s7229_s14, %s10290_s14   ;;  %s7187_s13 = sphi %s7227_s13, %s10289_s13   ;;  %s7183_s12 = sphi %s7225_s12, %s10288_s12  }
   0x4   : > { %p23_p0 = scmp.ge.s32.totalorder %s22_s17, 2  ;;  %p6831_p1 = scmp.ge.s32.totalorder %s7199_s16, 1 }
   0x5   : > { %p151_p2 = scmp.lt.s32.totalorder %s7199_s16, 5 }
   0x6   : > { %s10293_s17 = smov (%p23_p0, %s22_s17), 0  ;;  %s10295_s18 = smov (!%p23_p0, %s25_s18), %s7195_s15 }
   0x7   : > { %p152_p3 = pnand %p6831_p1, %p151_p2  ;;  %p27_p4 = scmp.ge.s32.totalorder %s10295_s18, 2 }
   0x8   : > { %p180_p5 = scmp.lt.s32.totalorder (!%p152_p3), %s7187_s13, 1  ;;  %s6917_s19 = sshll.u32 (!%p152_p3), %s7183_s12, 7 }
   0x9   : > { %s10297_s18 = smov (%p27_p4, %s10295_s18), 0  ;;  %155 = sbr.rel (%p152_p3) target bundleno = 732 (0x2dc), region = 32 }
   0xa   : > { %s7259_s20 = sshll.u32 (!%p152_p3), %s7183_s12, 3  ;;  %p229_p8 = scmp.gt.s32.totalorder (!%p152_p3), %s7183_s12, 0 }
   0xb   : > { %p188_p6 = scmp.lt.s32.totalorder (!%p152_p3), %s7259_s20, 15  ;;  %s6840_s27 = sadd.s32 (!%p152_p3), 4294967295, %s7259_s20 }
   0xc   : > { %p216_p7 = scmp.gt.s32.totalorder (!%p152_p3), %s6840_s27, 0  ;;  %s7201_s4 = smov (!%p152_p3), 8  }
   0xd   : > { %s7202_s5 = smov (!%p152_p3), 12   ;;  %p235_p9 = scmp.lt.s32.totalorder (!%p152_p3), %s7183_s12, 1 }
   0xe   : > { %s10299_s13 = smov (!%p180_p5, %s7187_s13), 1  ;;  %vm261_vm0 = vcmask 1040384   ;;  %vm358_vm1 = vcmask 1046528   ;;  %s10301_s27 = smov (!%p216_p7, %s6840_s27), 0  ;;  %v602_v13 = vld [vmem:[%s10285_s1 + $0x8] sm:$0xff]  ;;  %v601_v19 = vld [vmem:[%s10285_s1] sm:$0xff] }
   0xf   : > { %s6916_s21 = sshll.u32 %s10299_s13, 8  ;;  %s6836_s25 = sshll.u32 %s10299_s13, 9  ;;  %6990 = vmatprep.subr.mxu0 %v602_v13  ;;  %v6861_v21 = vld [vmem:[%s10285_s1 + $0x18] sm:$0xff]  ;;  %v6860_v29 = vld [vmem:[%s10285_s1 + $0x10] sm:$0xff]  ;;  %vm550_vm2 = vcmask 31744   ;;  %vm567_vm3 = vcmask 64512  }
  0x10   : > { %s7265_s24 = scalar_lea.vmem %s10284_s0, %s6916_s21  ;;  %s6841_s6 = sshll.u32 %s10301_s27, 4  ;;  %6991 = vmatpush3.msra.mxu0 %v602_v13  ;;  %7018 = vmatprep.subr.mxu1 %v6861_v21  ;;  %vm609_vm4 = vcmask 130048   ;;  %vm584_vm5 = vcmask 97280   ;;  %vm6474_vm6 = vcmask 25600  }
  0x11   : > { %s7268_s26 = scalar_lea.vmem %s7265_s24, %s6917_s19  ;;  %s219_s7 = scalar_lea.vmem %s7265_s24, %s6841_s6  ;;  %6992 = vmatprep.subr.mxu0 %v601_v19  ;;  %7019 = vmatpush3.msra.mxu1 %v6861_v21 }
  0x12   : > { %v199_v0 = vld [vmem:[%s7268_s26] sm:$0xff]  ;;  %v200_v1 = vld [vmem:[%s7268_s26 + $0x8] sm:$0xff]  ;;  %s189_s28 = scalar_select %p188_p6, %s7259_s20, 15  ;;  %v201_v16 = vld [vmem:[%s7268_s26 + $0x10] sm:$0xff]  ;;  %6993 = vmatpush3.msra.mxu0 %v601_v19  ;;  %7020 = vmatprep.subr.mxu1 %v6860_v29 }
  0x13   : > { %v265_v2 = vrot.slane %v199_v0, 7  ;;  %v266_v3 = vrot.slane %v200_v1, 7  ;;  %s7147_s8 = scalar_select %p229_p8, 255, 0  ;;  %v202_v18 = vld [vmem:[%s7268_s26 + $0x18] sm:$0xff]  ;;  %v268_v25 = vrot.slane %v201_v16, 7  ;;  %7021 = vmatpush3.msra.mxu1 %v6860_v29 }
  0x14   : > { %s6835_s29 = sshll.u32 %s189_s28, 5  ;;  %v269_v28 = vrot.slane %v202_v18, 7  ;;  %s222_s27 = sadd.s32 8, %s7259_s20  ;;  %v203_v38 = vld [vmem:[%s7268_s26 + $0x20] sm:$0xff]  ;;  %v204_v39 = vld [vmem:[%s7268_s26 + $0x28] sm:$0xff]  ;;  %v205_v62 = vld [vmem:[%s7268_s26 + $0x30] sm:$0xff] }
  0x15   : > { %v7275_v4 = vsel %vm261_vm0, 0.0, %v265_v2  ;;  %v7278_v5 = vsel %vm261_vm0, %v266_v3, 0.0  ;;  %v7281_v6 = vsel %vm261_vm0, %v265_v2, %v266_v3  ;;  %s7283_s30 = sadd.s32 %s6836_s25, %s6835_s29  ;;  %v7148_v11 = vld [vmem:[%s219_s7] sm:%s7147_s8]  ;;  %v7151_v14 = vld [vmem:[%s219_s7 + $0x8] sm:%s7147_s8]  ;;  %s7203_s25 = smov 4   ;;  %v7333_v31 = vsel %vm261_vm0, 0.0, %v268_v25 }
  0x16   : > { %448 = vrot.lane.b32.xlu1 %v7275_v4, %s7201_s4  ;;  %v367_v7 = vrot.slane %v7278_v5, 1  ;;  %v365_v8 = vrot.slane %v7281_v6, 1  ;;  %v364_v10 = vrot.slane %v7275_v4, 1  ;;  %v262_v15 = vrot.slane %v7148_v11, 7  ;;  %p223_p10 = scmp.lt.s32.totalorder %s222_s27, 15  ;;  %v206_v63 = vld [vmem:[%s7268_s26 + $0x38] sm:$0xff] }
  0x17   : > { %v263_v17 = vrot.slane %v7151_v14, 7  ;;  %v7336_v32 = vsel %vm261_vm0, %v268_v25, %v269_v28  ;;  %v7339_v33 = vsel %vm261_vm0, %v269_v28, 0.0  ;;  %s7153_s29 = scalar_select %p235_p9, 255, 0  ;;  %v369_v41 = vrot.slane %v7333_v31, 1  ;;  %v207_v13 = vld [vmem:[%s7268_s26 + $0x40] sm:$0xff] }
  0x18   : > { %851 = vrot.lane.b32.xlu0 %v367_v7, %s7202_s5  ;;  %v368_v9 = vsel %vm358_vm1, %v365_v8, %v367_v7  ;;  %v366_v12 = vsel %vm358_vm1, %v364_v10, %v365_v8  ;;  %v7312_v20 = vsel %vm261_vm0, 0.0, %v262_v15  ;;  %v370_v35 = vrot.slane %v7336_v32, 1  ;;  %s10303_s27 = smov (!%p223_p10, %s222_s27), 15  ;;  %v208_v14 = vld [vmem:[%s7268_s26 + $0x48] sm:$0xff]  ;;  %v209_v28 = vld [vmem:[%s7268_s26 + $0x50] sm:$0xff]  ;;  %v210_v29 = vld [vmem:[%s7268_s26 + $0x58] sm:$0xff] }
  0x19   : > { %v7318_v22 = vsel %vm261_vm0, %v263_v17, 0.0  ;;  %v7321_v23 = vsel %vm261_vm0, %v262_v15, %v263_v17  ;;  %v359_v24 = vrot.slane %v7312_v20, 1  ;;  %v372_v36 = vrot.slane %v7339_v33, 1  ;;  %s6842_s28 = sshll.u32 %s10303_s27, 4  ;;  %s6837_s11 = sshll.u32 %s7283_s30, 1 }
  0x1a   : > { %450 = vrot.lane.b32.xlu1 %v7281_v6, %s7201_s4  ;;  %v362_v26 = vrot.slane %v7318_v22, 1  ;;  %v360_v27 = vrot.slane %v7321_v23, 1  ;;  %s226_s20 = scalar_lea.vmem %s7265_s24, %s6842_s28  ;;  %v271_v44 = vrot.slane %v203_v38, 7  ;;  %v272_v45 = vrot.slane %v204_v39, 7  ;;  %s7944_s19 = scalar_lea.vmem %s10287_s3, %s6837_s11 }
  0x1b   : > { %v373_v37 = vsel %vm358_vm1, %v370_v35, %v372_v36  ;;  %v7154_v40 = vld [vmem:[%s226_s20] sm:%s7153_s29]  ;;  %v7157_v42 = vld [vmem:[%s226_s20 + $0x8] sm:%s7153_s29]  ;;  %v371_v50 = vsel %vm358_vm1, %v369_v41, %v370_v35  ;;  %v274_v1 = vrot.slane %v205_v62, 7  ;;  %v275_v2 = vrot.slane %v206_v63, 7 }
  0x1c   : > { %504 = vrot.lane.b32.xlu0 %v368_v9, %s7202_s5  ;;  %v361_v30 = vsel %vm358_vm1, %v359_v24, %v360_v27  ;;  %v363_v34 = vsel %vm358_vm1, %v360_v27, %v362_v26  ;;  %v289_v43 = vrot.slane %v7154_v40, 7  ;;  %v290_v46 = vrot.slane %v7157_v42, 7  ;;  %v7509_v62 = vld [vmem:[%s10285_s1 + $0x38] sm:$0xff]  ;;  %v7518_v63 = vld [vmem:[%s10285_s1 + $0x28] sm:$0xff] }
  0x1d   : > { %v7373_v52 = vsel %vm261_vm0, %v271_v44, %v272_v45  ;;  %v7376_v53 = vsel %vm261_vm0, 0.0, %v271_v44  ;;  %v7402_v61 = vsel %vm261_vm0, %v272_v45, 0.0  ;;  %v7418_v8 = vsel %vm261_vm0, %v274_v1, %v275_v2  ;;  %v212_v44 = vld [vmem:[%s7268_s26 + $0x68] sm:$0xff]  ;;  %7074 = vmatprep.subr.mxu1 %v7509_v62  ;;  %7046 = vmatprep.subr.mxu0 %v7518_v63 }
  0x1e   : > { %827 = vrot.lane.b32.xlu1 %v7278_v5, %s7201_s4  ;;  %v7361_v47 = vsel %vm261_vm0, 0.0, %v289_v43  ;;  %v7368_v49 = vsel %vm261_vm0, %v289_v43, %v290_v46  ;;  %v7379_v54 = vsel %vm261_vm0, %v290_v46, 0.0  ;;  %v375_v57 = vrot.slane %v7373_v52, 1  ;;  %v211_v43 = vld [vmem:[%s7268_s26 + $0x60] sm:$0xff] }
  0x1f   : > { %v3637_v48 = vrot.slane %v7361_v47, 1  ;;  %v3638_v51 = vrot.slane %v7368_v49, 1  ;;  %v3640_v55 = vrot.slane %v7379_v54, 1  ;;  %v374_v58 = vrot.slane %v7376_v53, 1 }
  0x20   : > { %803 = vrot.lane.b32.xlu0 %v362_v26, %s7203_s25  ;;  %v377_v0 = vrot.slane %v7402_v61, 1  ;;  %v380_v10 = vrot.slane %v7418_v8, 1  ;;  %v277_v16 = vrot.slane %v207_v13, 7  ;;  %v278_v17 = vrot.slane %v208_v14, 7 }
  0x21   : > { %v7385_v56 = vsel %vm358_vm1, %v3637_v48, %v3638_v51  ;;  %v7392_v59 = vsel %vm358_vm1, %v3638_v51, %v3640_v55  ;;  %v376_v60 = vsel %vm358_vm1, %v374_v58, %v375_v57  ;;  %v281_v35 = vrot.slane %v210_v29, 7 }
  0x22   : > { %502 = vrot.lane.b32.xlu1 %v366_v12, %s7202_s5  ;;  %v378_v3 = vsel %vm358_vm1, %v375_v57, %v377_v0  ;;  %v7441_v19 = vsel %vm261_vm0, %v277_v16, %v278_v17  ;;  %v7444_v21 = vsel %vm261_vm0, 0.0, %v277_v16  ;;  %v7458_v27 = vsel %vm261_vm0, %v278_v17, 0.0 }
  0x23   : > { %v385_v24 = vrot.slane %v7441_v19, 1  ;;  %v384_v25 = vrot.slane %v7444_v21, 1  ;;  %v7477_v39 = vsel %vm261_vm0, %v281_v35, 0.0  ;;  %v283_v46 = vrot.slane %v211_v43, 7 }
  0x24   : > { %399 = vrot.lane.b32.xlu0 %v361_v30, %s7203_s25  ;;  %v387_v30 = vrot.slane %v7458_v27, 1  ;;  %v392_v41 = vrot.slane %v7477_v39, 1  ;;  %v284_v48 = vrot.slane %v212_v44, 7 }
  0x25   : > { %v386_v26 = vsel %vm358_vm1, %v384_v25, %v385_v24  ;;  %v7500_v57 = vsel %vm261_vm0, 0.0, %v283_v46 }
  0x26   : > { %403 = vrot.lane.b32.xlu1 %v366_v12, %s7203_s25  ;;  %v7497_v51 = vsel %vm261_vm0, %v283_v46, %v284_v48 }
  0x27   : > { %v395_v58 = vrot.slane %v7497_v51, 1 }
  0x28   : > { %401 = vrot.lane.b32.xlu0 %v363_v34, %s7203_s25  ;;  %v280_v34 = vrot.slane %v209_v28, 7 }
  0x2a   : > { %452 = vrot.lane.b32.xlu1 %v7333_v31, %s7201_s4  ;;  %v7474_v38 = vsel %vm261_vm0, %v280_v34, %v281_v35 }
  0x2b   : > { %v390_v40 = vrot.slane %v7474_v38, 1 }
  0x2c   : > { %405 = vrot.lane.b32.xlu0 %v368_v9, %s7203_s25  ;;  %v7421_v9 = vsel %vm261_vm0, %v275_v2, 0.0  ;;  %v7526_v2 = vsel %vm261_vm0, %v284_v48, 0.0 }
  0x2d   : > { %v382_v11 = vrot.slane %v7421_v9, 1  ;;  %v393_v42 = vsel %vm358_vm1, %v390_v40, %v392_v41  ;;  %v397_v13 = vrot.slane %v7526_v2, 1 }
  0x2e   : > { %805 = vrot.lane.b32.xlu1 %v367_v7, %s7203_s25  ;;  %v7415_v7 = vsel %vm261_vm0, 0.0, %v274_v1 }
  0x2f   : > { %v383_v12 = vsel %vm358_vm1, %v380_v10, %v382_v11  ;;  %v379_v15 = vrot.slane %v7415_v7, 1 }
  0x30   : > { %454 = vrot.lane.b32.xlu0 %v7336_v32, %s7201_s4 }
  0x31   : > { %v381_v18 = vsel %vm358_vm1, %v379_v15, %v380_v10 }
  0x32   : > { %508 = vrot.lane.b32.xlu1 %v373_v37, %s7202_s5 }
  0x34   : > { %506 = vrot.lane.b32.xlu0 %v371_v50, %s7202_s5 }
  0x36   : > { %853 = vrot.lane.b32.xlu1 %v372_v36, %s7202_s5 }
  0x38   : > { %829 = vrot.lane.b32.xlu0 %v7339_v33, %s7201_s4 }
  0x3a   : > { %409 = vrot.lane.b32.xlu1 %v373_v37, %s7203_s25  ;;  %v7471_v37 = vsel %vm261_vm0, 0.0, %v280_v34 }
  0x3b   : > { %v389_v45 = vrot.slane %v7471_v37, 1 }
  0x3c   : > { %407 = vrot.lane.b32.xlu0 %v371_v50, %s7203_s25 }
  0x3d   : > { %v391_v50 = vsel %vm358_vm1, %v389_v45, %v390_v40 }
  0x3e   : > { %458 = vrot.lane.b32.xlu1 %v7373_v52, %s7201_s4 }
  0x40   : > { %456 = vrot.lane.b32.xlu0 %v7376_v53, %s7201_s4 }
  0x42   : > { %510 = vrot.lane.b32.xlu1 %v376_v60, %s7202_s5 }
  0x44   : > { %807 = vrot.lane.b32.xlu0 %v372_v36, %s7203_s25  ;;  %v388_v36 = vsel %vm358_vm1, %v385_v24, %v387_v30 }
  0x46   : > { %831 = vrot.lane.b32.xlu1 %v7402_v61, %s7201_s4 }
  0x48   : > { %512 = vrot.lane.b32.xlu0 %v378_v3, %s7202_s5 }
  0x4a   : > { %411 = vrot.lane.b32.xlu1 %v376_v60, %s7203_s25  ;;  %v394_v60 = vrot.slane %v7500_v57, 1 }
  0x4c   : > { %855 = vrot.lane.b32.xlu0 %v377_v0, %s7202_s5 }
  0x4e   : > { %460 = vrot.lane.b32.xlu1 %v7415_v7, %s7201_s4 }
  0x50   : > { %413 = vrot.lane.b32.xlu0 %v378_v3, %s7203_s25 }
  0x52   : > { %809 = vrot.lane.b32.xlu1 %v377_v0, %s7203_s25  ;;  %v396_v0 = vsel %vm358_vm1, %v394_v60, %v395_v58 }
  0x54   : > { %462 = vrot.lane.b32.xlu0 %v7418_v8, %s7201_s4 }
  0x56   : > { %516 = vrot.lane.b32.xlu1 %v383_v12, %s7202_s5 }
  0x58   : > { %514 = vrot.lane.b32.xlu0 %v381_v18, %s7202_s5 }
  0x5a   : > { %857 = vrot.lane.b32.xlu1 %v382_v11, %s7202_s5 }
  0x5c   : > { %833 = vrot.lane.b32.xlu0 %v7421_v9, %s7201_s4 }
  0x5e   : > { %417 = vrot.lane.b32.xlu1 %v383_v12, %s7203_s25  ;;  %v214_v12 = vld [vmem:[%s7268_s26 + $0x78] sm:$0xff] }
  0x5f   : > { %v287_v16 = vrot.slane %v214_v12, 7 }
  0x60   : > { %415 = vrot.lane.b32.xlu0 %v381_v18, %s7203_s25  ;;  %v398_v18 = vsel %vm358_vm1, %v395_v58, %v397_v13 }
  0x61   : > { %v7545_v28 = vsel %vm261_vm0, %v287_v16, 0.0 }
  0x62   : > { %466 = vrot.lane.b32.xlu1 %v7441_v19, %s7201_s4 }
  0x64   : > { %464 = vrot.lane.b32.xlu0 %v7444_v21, %s7201_s4 }
  0x66   : > { %518 = vrot.lane.b32.xlu1 %v386_v26, %s7202_s5 }
  0x68   : > { %811 = vrot.lane.b32.xlu0 %v382_v11, %s7203_s25  ;;  %v213_v11 = vld [vmem:[%s7268_s26 + $0x70] sm:$0xff] }
  0x69   : > { %v286_v14 = vrot.slane %v213_v11, 7 }
  0x6a   : > { %835 = vrot.lane.b32.xlu1 %v7458_v27, %s7201_s4 }
  0x6b   : > { %v7539_v24 = vsel %vm261_vm0, 0.0, %v286_v14 }
  0x6c   : > { %520 = vrot.lane.b32.xlu0 %v388_v36, %s7202_s5 }
  0x6e   : > { %419 = vrot.lane.b32.xlu1 %v386_v26, %s7203_s25  ;;  %v7542_v26 = vsel %vm261_vm0, %v286_v14, %v287_v16 }
  0x6f   : > { %v498_v29 = vrot.slane %v7542_v26, 1 }
  0x70   : > { %859 = vrot.lane.b32.xlu0 %v387_v30, %s7202_s5 }
  0x72   : > { %468 = vrot.lane.b32.xlu1 %v7471_v37, %s7201_s4 }
  0x74   : > { %421 = vrot.lane.b32.xlu0 %v388_v36, %s7203_s25 }
  0x76   : > { %813 = vrot.lane.b32.xlu1 %v387_v30, %s7203_s25  ;;  %v7552_v30 = vrot.slane %v7545_v28, 1 }
  0x78   : > { %470 = vrot.lane.b32.xlu0 %v7474_v38, %s7201_s4  ;;  %v501_v40 = vsel %vm358_vm1, %v498_v29, %v7552_v30 }
  0x7a   : > { %524 = vrot.lane.b32.xlu1 %v393_v42, %s7202_s5 }
  0x7c   : > { %522 = vrot.lane.b32.xlu0 %v391_v50, %s7202_s5 }
  0x7e   : > { %861 = vrot.lane.b32.xlu1 %v392_v41, %s7202_s5 }
  0x80   : > { %837 = vrot.lane.b32.xlu0 %v7477_v39, %s7201_s4 }
  0x82   : > { %425 = vrot.lane.b32.xlu1 %v393_v42, %s7203_s25 }
  0x84   : > { %423 = vrot.lane.b32.xlu0 %v391_v50, %s7203_s25 }
  0x86   : > { %474 = vrot.lane.b32.xlu1 %v7497_v51, %s7201_s4 }
  0x88   : > { %v449_v1 = vpop.permute.xlu1 %448  ;;  %472 = vrot.lane.b32.xlu0 %v7500_v57, %s7201_s4 }
  0x8a   : > { %526 = vrot.lane.b32.xlu1 %v396_v0, %s7202_s5  ;;  %v852_v3 = vpop.permute.xlu0 %851 }
  0x8c   : > { %v451_v10 = vpop.permute.xlu1 %450  ;;  %815 = vrot.lane.b32.xlu0 %v392_v41, %s7203_s25 }
  0x8e   : > { %839 = vrot.lane.b32.xlu1 %v7526_v2, %s7201_s4  ;;  %v505_v17 = vpop.permute.xlu0 %504 }
  0x90   : > { %v828_v15 = vpop.permute.xlu1 %827  ;;  %528 = vrot.lane.b32.xlu0 %v398_v18, %s7202_s5 }
  0x92   : > { %427 = vrot.lane.b32.xlu1 %v396_v0, %s7203_s25  ;;  %v804_v34 = vpop.permute.xlu0 %803 }
  0x93   : > { %v875_v36 = vsel %vm550_vm2, %v7318_v22, %v804_v34  ;;  %v497_v22 = vrot.slane %v7539_v24, 1 }
  0x94   : > { %v503_v25 = vpop.permute.xlu1 %502  ;;  %863 = vrot.lane.b32.xlu0 %v397_v13, %s7202_s5  ;;  %v883_v44 = vsel %vm567_vm3, %v875_v36, %v828_v15 }
  0x96   : > { %476 = vrot.lane.b32.xlu1 %v7539_v24, %s7201_s4  ;;  %v400_v41 = vpop.permute.xlu0 %399 }
  0x97   : > { %v551_v43 = vsel %vm550_vm2, %v7312_v20, %v400_v41  ;;  %v891_v20 = vsel %vm584_vm5, %v883_v44, %v852_v3 }
  0x98   : > { %v404_v35 = vpop.permute.xlu1 %403  ;;  %429 = vrot.lane.b32.xlu0 %v398_v18, %s7203_s25  ;;  %v568_v45 = vsel %vm567_vm3, %v551_v43, %v449_v1  ;;  %v499_v1 = vsel %vm358_vm1, %v497_v22, %v498_v29  ;;  %v910_v11 = vrot.slane %v891_v20, 1 }
  0x99   : > { %v585_v46 = vsel %vm584_vm5, %v568_v45, %v503_v25  ;;  %v553_v25 = vsel %vm550_vm2, %v7275_v4, %v404_v35 }
  0x9a   : > { %817 = vrot.lane.b32.xlu1 %v397_v13, %s7203_s25  ;;  %v402_v48 = vpop.permute.xlu0 %401  ;;  %6994 = vmatprep.mubr.msk.f32.mxu0 %vm609_vm4, %v585_v46  ;;  %v907_v12 = vrot.slane %v585_v46, 1 }
  0x9b   : > { %v552_v58 = vsel %vm550_vm2, %v7321_v23, %v402_v48  ;;  %v6878_v23 = vld [vmem:[%s10285_s1 + $0x20] sm:$0xff] }
  0x9c   : > { %v453_v42 = vpop.permute.xlu1 %452  ;;  %v569_v60 = vsel %vm567_vm3, %v552_v58, %v451_v10  ;;  %478 = vrot.lane.b32.xlu0 %v7542_v26, %s7201_s4 }
  0x9d   : > { %v586_v0 = vsel %vm584_vm5, %v569_v60, %v505_v17  ;;  %v570_v34 = vsel %vm567_vm3, %v553_v25, %v453_v42 }
  0x9e   : > { %532 = vrot.lane.b32.xlu1 %v501_v40, %s7202_s5  ;;  %v406_v13 = vpop.permute.xlu0 %405  ;;  %6995 = vmatmul.mubr.msk.f32.vlgmr.msra.gmra.mxu0 %vm609_vm4, %v586_v0  ;;  %v908_v3 = vrot.slane %v586_v0, 1 }
  0x9f   : > { %7047 = vmatpush3.msra.mxu0 %v7518_v63  ;;  %v554_v16 = vsel %vm550_vm2, %v7281_v6, %v406_v13  ;;  %v6896_v63 = vld [vmem:[%s10285_s1 + $0x30] sm:$0xff] }
  0xa0   : > { %v806_v50 = vpop.permute.xlu1 %805  ;;  %530 = vrot.lane.b32.xlu0 %v499_v1, %s7202_s5  ;;  %v909_v10 = vsel %vm358_vm1, %v907_v12, %v908_v3  ;;  %v911_v15 = vsel %vm358_vm1, %v908_v3, %v910_v11  ;;  %7048 = vmatprep.subr.mxu0 %v6878_v23 }
  0xa1   : > { %7022 = vmatprep.mubr.msk.f32.mxu1 %vm609_vm4, %v909_v10  ;;  %7049 = vmatpush3.msra.mxu0 %v6878_v23 }
  0xa2   : > { %865 = vrot.lane.b32.xlu1 %v7552_v30, %s7202_s5  ;;  %v455_v17 = vpop.permute.xlu0 %454  ;;  %7023 = vmatmul.mubr.msk.f32.vlgmr.msra.gmra.mxu1 %vm609_vm4, %v911_v15 }
  0xa3   : > { %v571_v29 = vsel %vm567_vm3, %v554_v16, %v455_v17  ;;  %7075 = vmatpush3.msra.mxu1 %v7509_v62 }
  0xa4   : > { %v509_v14 = vpop.permute.xlu1 %508  ;;  %841 = vrot.lane.b32.xlu0 %v7545_v28, %s7201_s4  ;;  %7076 = vmatprep.subr.mxu1 %v6896_v63 }
  0xa5   : > { %v7604_v6 = vsel %vm584_vm5, %v571_v29, %v509_v14  ;;  %7077 = vmatpush3.msra.mxu1 %v6896_v63 }
  0xa6   : > { %3625 = vrot.lane.b32.xlu1 %v501_v40, %s7203_s25  ;;  %v507_v36 = vpop.permute.xlu0 %506  ;;  %v913_v62 = vrot.slane %v7604_v6, 1 }
  0xa7   : > { %v7608_v4 = vsel %vm584_vm5, %v570_v34, %v507_v36 }
  0xa8   : > { %v854_v18 = vpop.permute.xlu1 %853  ;;  %v912_v35 = vrot.slane %v7608_v4, 1  ;;  %6997 = vmatprep.mubr.msk.f32.mxu0 %vm609_vm4, %v7608_v4  ;;  %3623 = vrot.lane.b32.xlu0 %v499_v1, %s7203_s25 }
  0xa9   : > { %6998 = vmatmul.mubr.msk.f32.gmra.mxu0 %vm609_vm4, %v7604_v6 }
  0xaa   : > { %3632 = vrot.lane.b32.xlu1 %v7368_v49, %s7201_s4  ;;  %v876_v49 = vsel %vm550_vm2, %v7278_v5, %v806_v50  ;;  %v830_v41 = vpop.permute.xlu0 %829  ;;  %v7622_v42 = vsel %vm358_vm1, %v912_v35, %v913_v62 }
  0xab   : > { %v884_v44 = vsel %vm567_vm3, %v876_v49, %v830_v41  ;;  %7025 = vmatprep.mubr.msk.f32.mxu1 %vm609_vm4, %v7622_v42 }
  0xac   : > { %v410_v40 = vpop.permute.xlu1 %409  ;;  %v892_v45 = vsel %vm584_vm5, %v884_v44, %v854_v18  ;;  %3630 = vrot.lane.b32.xlu0 %v7361_v47, %s7201_s4 }
  0xad   : > { %v915_v22 = vrot.slane %v892_v45, 1 }
  0xae   : > { %3642 = vrot.lane.b32.xlu1 %v7385_v56, %s7202_s5  ;;  %v408_v5 = vpop.permute.xlu0 %407 }
  0xaf   : > { %v7633_v46 = vsel %vm358_vm1, %v913_v62, %v915_v22  ;;  %v555_v48 = vsel %vm550_vm2, %v7333_v31, %v408_v5 }
  0xb0   : > { %v459_v43 = vpop.permute.xlu1 %458  ;;  %7026 = vmatmul.mubr.msk.f32.gmra.mxu1 %vm609_vm4, %v7633_v46  ;;  %3808 = vrot.lane.b32.xlu0 %v7552_v30, %s7203_s25  ;;  %v556_v30 = vsel %vm550_vm2, %v7336_v32, %v410_v40 }
  0xb1   : > { %v573_v31 = vsel %vm567_vm3, %v556_v30, %v459_v43 }
  0xb2   : > { %3811 = vrot.lane.b32.xlu1 %v7379_v54, %s7201_s4  ;;  %v457_v50 = vpop.permute.xlu0 %456 }
  0xb3   : > { %v572_v20 = vsel %vm567_vm3, %v555_v48, %v457_v50 }
  0xb4   : > { %v511_v56 = vpop.permute.xlu1 %510  ;;  %3644 = vrot.lane.b32.xlu0 %v7392_v59, %s7202_s5 }
  0xb5   : > { %v7643_v58 = vsel %vm584_vm5, %v572_v20, %v511_v56 }
  0xb6   : > { %7000 = vmatprep.mubr.msk.f32.mxu0 %vm609_vm4, %v7643_v58  ;;  %v808_v60 = vpop.permute.xlu0 %807  ;;  %v917_v13 = vrot.slane %v7643_v58, 1 }
  0xb7   : > { %v877_v12 = vsel %vm550_vm2, %v7339_v33, %v808_v60 }
  0xb8   : > { %v832_v47 = vpop.permute.xlu1 %831  ;;  %3814 = vrot.lane.b32.xlu0 %v3640_v55, %s7202_s5 }
  0xb9   : > { %v885_v32 = vsel %vm567_vm3, %v877_v12, %v832_v47 }
  0xba   : > { %v513_v1 = vpop.permute.xlu0 %512 }
  0xbb   : > { %v7658_v59 = vsel %vm584_vm5, %v573_v31, %v513_v1 }
  0xbc   : > { %v412_v0 = vpop.permute.xlu1 %411  ;;  %v918_v3 = vrot.slane %v7658_v59, 1  ;;  %7001 = vmatmul.mubr.msk.f32.gmra.mxu0 %vm609_vm4, %v7658_v59 }
  0xbd   : > { %v557_v25 = vsel %vm550_vm2, %v7376_v53, %v412_v0 }
  0xbe   : > { %v856_v54 = vpop.permute.xlu0 %855  ;;  %v7666_v55 = vsel %vm358_vm1, %v917_v13, %v918_v3 }
  0xbf   : > { %v893_v23 = vsel %vm584_vm5, %v885_v32, %v856_v54  ;;  %7028 = vmatprep.mubr.msk.f32.mxu1 %vm609_vm4, %v7666_v55 }
  0xc0   : > { %v461_v11 = vpop.permute.xlu1 %460  ;;  %v920_v33 = vrot.slane %v893_v23, 1 }
  0xc1   : > { %v574_v36 = vsel %vm567_vm3, %v557_v25, %v461_v11 }
  0xc2   : > { %v414_v10 = vpop.permute.xlu0 %413  ;;  %v7672_v15 = vsel %vm358_vm1, %v918_v3, %v920_v33 }
  0xc3   : > { %7029 = vmatmul.mubr.msk.f32.gmra.mxu1 %vm609_vm4, %v7672_v15  ;;  %v558_v17 = vsel %vm550_vm2, %v7373_v52, %v414_v10 }
  0xc4   : > { %v810_v14 = vpop.permute.xlu1 %809 }
  0xc5   : > { %v878_v53 = vsel %vm550_vm2, %v7402_v61, %v810_v14 }
  0xc6   : > { %v463_v18 = vpop.permute.xlu0 %462 }
  0xc7   : > { %v575_v29 = vsel %vm567_vm3, %v558_v17, %v463_v18 }
  0xc8   : > { %v517_v16 = vpop.permute.xlu1 %516 }
  0xc9   : > { %v7682_v34 = vsel %vm584_vm5, %v575_v29, %v517_v16 }
  0xca   : > { %v515_v40 = vpop.permute.xlu0 %514  ;;  %v923_v49 = vrot.slane %v7682_v34, 1 }
  0xcb   : > { %v7686_v35 = vsel %vm584_vm5, %v574_v36, %v515_v40 }
  0xcc   : > { %v858_v63 = vpop.permute.xlu1 %857  ;;  %v922_v52 = vrot.slane %v7686_v35, 1  ;;  %7003 = vmatprep.mubr.msk.f32.mxu0 %vm609_vm4, %v7686_v35 }
  0xcd   : > { %7004 = vmatmul.mubr.msk.f32.gmra.mxu0 %vm609_vm4, %v7682_v34 }
  0xce   : > { %v834_v41 = vpop.permute.xlu0 %833  ;;  %v7697_v43 = vsel %vm358_vm1, %v922_v52, %v923_v49 }
  0xcf   : > { %v886_v45 = vsel %vm567_vm3, %v878_v53, %v834_v41  ;;  %7031 = vmatprep.mubr.msk.f32.mxu1 %vm609_vm4, %v7697_v43 }
  0xd0   : > { %v418_v62 = vpop.permute.xlu1 %417  ;;  %v894_v22 = vsel %vm584_vm5, %v886_v45, %v858_v63 }
  0xd1   : > { %v925_v5 = vrot.slane %v894_v22, 1  ;;  %v560_v1 = vsel %vm550_vm2, %v7418_v8, %v418_v62 }
  0xd2   : > { %v416_v56 = vpop.permute.xlu0 %415 }
  0xd3   : > { %v7704_v50 = vsel %vm358_vm1, %v923_v49, %v925_v5  ;;  %v559_v61 = vsel %vm550_vm2, %v7415_v7, %v416_v56 }
  0xd4   : > { %v467_v44 = vpop.permute.xlu1 %466  ;;  %7032 = vmatmul.mubr.msk.f32.gmra.mxu1 %vm609_vm4, %v7704_v50 }
  0xd5   : > { %v577_v11 = vsel %vm567_vm3, %v560_v1, %v467_v44 }
  0xd6   : > { %v465_v47 = vpop.permute.xlu0 %464 }
  0xd7   : > { %v576_v60 = vsel %vm567_vm3, %v559_v61, %v465_v47 }
  0xd8   : > { %v519_v48 = vpop.permute.xlu1 %518 }
  0xd9   : > { %v7712_v0 = vsel %vm584_vm5, %v576_v60, %v519_v48 }
  0xda   : > { %7006 = vmatprep.mubr.msk.f32.mxu0 %vm609_vm4, %v7712_v0  ;;  %v812_v30 = vpop.permute.xlu0 %811  ;;  %v927_v32 = vrot.slane %v7712_v0, 1 }
  0xdb   : > { %v879_v7 = vsel %vm550_vm2, %v7421_v9, %v812_v30 }
  0xdc   : > { %v836_v20 = vpop.permute.xlu1 %835 }
  0xdd   : > { %v887_v14 = vsel %vm567_vm3, %v879_v7, %v836_v20 }
  0xde   : > { %v521_v12 = vpop.permute.xlu0 %520 }
  0xdf   : > { %v7722_v3 = vsel %vm584_vm5, %v577_v11, %v521_v12 }
  0xe0   : > { %v420_v31 = vpop.permute.xlu1 %419  ;;  %v928_v54 = vrot.slane %v7722_v3, 1  ;;  %7007 = vmatmul.mubr.msk.f32.gmra.mxu0 %vm609_vm4, %v7722_v3 }
  0xe1   : > { %v561_v36 = vsel %vm550_vm2, %v7444_v21, %v420_v31 }
  0xe2   : > { %v860_v8 = vpop.permute.xlu0 %859  ;;  %v7730_v23 = vsel %vm358_vm1, %v927_v32, %v928_v54 }
  0xe3   : > { %v895_v10 = vsel %vm584_vm5, %v887_v14, %v860_v8  ;;  %7034 = vmatprep.mubr.msk.f32.mxu1 %vm609_vm4, %v7730_v23 }
  0xe4   : > { %v469_v13 = vpop.permute.xlu1 %468  ;;  %v930_v9 = vrot.slane %v895_v10, 1 }
  0xe5   : > { %v578_v49 = vsel %vm567_vm3, %v561_v36, %v469_v13 }
  0xe6   : > { %v422_v16 = vpop.permute.xlu0 %421  ;;  %v7736_v17 = vsel %vm358_vm1, %v928_v54, %v930_v9 }
  0xe7   : > { %7035 = vmatmul.mubr.msk.f32.gmra.mxu1 %vm609_vm4, %v7736_v17  ;;  %v562_v63 = vsel %vm550_vm2, %v7441_v19, %v422_v16 }
  0xe8   : > { %v814_v33 = vpop.permute.xlu1 %813 }
  0xe9   : > { %v880_v21 = vsel %vm550_vm2, %v7458_v27, %v814_v33 }
  0xea   : > { %v471_v25 = vpop.permute.xlu0 %470 }
  0xeb   : > { %v579_v40 = vsel %vm567_vm3, %v562_v63, %v471_v25 }
  0xec   : > { %v525_v18 = vpop.permute.xlu1 %524 }
  0xed   : > { %v7746_v62 = vsel %vm584_vm5, %v579_v40, %v525_v18 }
  0xee   : > { %v523_v52 = vpop.permute.xlu0 %522  ;;  %v933_v44 = vrot.slane %v7746_v62, 1 }
  0xef   : > { %v7750_v41 = vsel %vm584_vm5, %v578_v49, %v523_v52 }
  0xf0   : > { %v862_v29 = vpop.permute.xlu1 %861  ;;  %v932_v19 = vrot.slane %v7750_v41, 1  ;;  %7009 = vmatprep.mubr.msk.f32.mxu0 %vm609_vm4, %v7750_v41 }
  0xf1   : > { %7010 = vmatmul.mubr.msk.f32.gmra.mxu0 %vm609_vm4, %v7746_v62 }
  0xf2   : > { %v838_v45 = vpop.permute.xlu0 %837  ;;  %v7761_v22 = vsel %vm358_vm1, %v932_v19, %v933_v44 }
  0xf3   : > { %v888_v56 = vsel %vm567_vm3, %v880_v21, %v838_v45  ;;  %7037 = vmatprep.mubr.msk.f32.mxu1 %vm609_vm4, %v7761_v22 }
  0xf4   : > { %v426_v53 = vpop.permute.xlu1 %425  ;;  %v896_v48 = vsel %vm584_vm5, %v888_v56, %v862_v29 }
  0xf5   : > { %v935_v61 = vrot.slane %v896_v48, 1  ;;  %v564_v7 = vsel %vm550_vm2, %v7474_v38, %v426_v53 }
  0xf6   : > { %v424_v47 = vpop.permute.xlu0 %423 }
  0xf7   : > { %v7768_v60 = vsel %vm358_vm1, %v933_v44, %v935_v61  ;;  %v563_v27 = vsel %vm550_vm2, %v7471_v37, %v424_v47 }
  0xf8   : > { %v475_v5 = vpop.permute.xlu1 %474  ;;  %7038 = vmatmul.mubr.msk.f32.gmra.mxu1 %vm609_vm4, %v7768_v60 }
  0xf9   : > { %v581_v32 = vsel %vm567_vm3, %v564_v7, %v475_v5 }
  0xfa   : > { %v473_v30 = vpop.permute.xlu0 %472 }
  0xfb   : > { %v580_v1 = vsel %vm567_vm3, %v563_v27, %v473_v30 }
  0xfc   : > { %v527_v20 = vpop.permute.xlu1 %526 }
  0xfd   : > { %v7776_v11 = vsel %vm584_vm5, %v580_v1, %v527_v20  ;;  %v1147_v1 = vlaneseq }
  0xfe   : > { %7012 = vmatprep.mubr.msk.f32.mxu0 %vm609_vm4, %v7776_v11  ;;  %v816_v12 = vpop.permute.xlu0 %815  ;;  %v937_v33 = vrot.slane %v7776_v11, 1 }
  0xff   : > { %v881_v37 = vsel %vm550_vm2, %v7477_v39, %v816_v12  ;;  %v1148_v12 = vshrl.u32 %v1147_v1, 7 }
 0x100   : > { %v840_v31 = vpop.permute.xlu1 %839 }
 0x101   : > { %v889_v9 = vsel %vm567_vm3, %v881_v37, %v840_v31 }
 0x102   : > { %v529_v54 = vpop.permute.xlu0 %528 }
 0x103   : > { %v7786_v8 = vsel %vm584_vm5, %v581_v32, %v529_v54 }
 0x104   : > { %v428_v13 = vpop.permute.xlu1 %427  ;;  %v938_v10 = vrot.slane %v7786_v8, 1  ;;  %7013 = vmatmul.mubr.msk.f32.gmra.mxu0 %vm609_vm4, %v7786_v8 }
 0x105   : > { %v565_v52 = vsel %vm550_vm2, %v7500_v57, %v428_v13  ;;  %v7895_v13 = vld [vmem:[%s10286_s2] ss:$0 sm:$0xff] }
 0x106   : > { %v864_v38 = vpop.permute.xlu0 %863  ;;  %v7794_v16 = vsel %vm358_vm1, %v937_v33, %v938_v10 }
 0x107   : > { %v897_v18 = vsel %vm584_vm5, %v889_v9, %v864_v38  ;;  %7040 = vmatprep.mubr.msk.f32.mxu1 %vm609_vm4, %v7794_v16 }
 0x108   : > { %v477_v14 = vpop.permute.xlu1 %476  ;;  %v940_v39 = vrot.slane %v897_v18, 1 }
 0x109   : > { %v582_v19 = vsel %vm567_vm3, %v565_v52, %v477_v14 }
 0x10a   : > { %v430_v25 = vpop.permute.xlu0 %429  ;;  %v7800_v29 = vsel %vm358_vm1, %v938_v10, %v940_v39 }
 0x10b   : > { %7041 = vmatmul.mubr.msk.f32.gmra.mxu1 %vm609_vm4, %v7800_v29  ;;  %v566_v36 = vsel %vm550_vm2, %v7497_v51, %v430_v25  ;;  %v7906_v25 = vsub.s32 0, %v1148_v12 }
 0x10c   : > { %v818_v63 = vpop.permute.xlu1 %817 }
 0x10d   : > { %v882_v48 = vsel %vm550_vm2, %v7526_v2, %v818_v63 }
 0x10e   : > { %v479_v40 = vpop.permute.xlu0 %478 }
 0x10f   : > { %v583_v53 = vsel %vm567_vm3, %v566_v36, %v479_v40 }
 0x110   : > { %v533_v49 = vpop.permute.xlu1 %532 }
 0x111   : > { %v600_v44 = vsel %vm584_vm5, %v583_v53, %v533_v49 }
 0x112   : > { %v531_v21 = vpop.permute.xlu0 %530  ;;  %v943_v5 = vrot.slane %v600_v44, 1 }
 0x113   : > { %v599_v45 = vsel %vm584_vm5, %v582_v19, %v531_v21 }
 0x114   : > { %v942_v56 = vrot.slane %v599_v45, 1  ;;  %7015 = vmatprep.mubr.msk.f32.mxu0 %vm609_vm4, %v599_v45  ;;  %v866_v51 = vpop.permute.xlu1 %865 }
 0x115   : > { %7016 = vmatmul.mubr.msk.f32.gmra.mxu0 %vm609_vm4, %v600_v44 }
 0x116   : > { %v842_v57 = vpop.permute.xlu0 %841  ;;  %7050 = vmatprep.mubr.msk.f32.mxu0 %vm609_vm4, %v7608_v4  ;;  %v944_v61 = vsel %vm358_vm1, %v942_v56, %v943_v5 }
 0x117   : > { %v890_v47 = vsel %vm567_vm3, %v882_v48, %v842_v57  ;;  %7043 = vmatprep.mubr.msk.f32.mxu1 %vm609_vm4, %v944_v61 }
 0x118   : > { %v898_v20 = vsel %vm584_vm5, %v890_v47, %v866_v51  ;;  %v3626_v4 = vpop.permute.xlu1 %3625 }
 0x119   : > { %v945_v27 = vrot.slane %v898_v20, 1  ;;  %7051 = vmatmul.mubr.msk.f32.vlgmr.msra.gmra.mxu0 %vm609_vm4, %v7604_v6 }
 0x11a   : > { %7053 = vmatprep.mubr.msk.f32.mxu0 %vm609_vm4, %v7643_v58  ;;  %v3624_v2 = vpop.permute.xlu0 %3623 }
 0x11b   : > { %v946_v30 = vsel %vm358_vm1, %v943_v5, %v945_v27  ;;  %v3648_v58 = vsel %vm550_vm2, %v7539_v24, %v3624_v2 }
 0x11c   : > { %7044 = vmatmul.mubr.msk.f32.gmra.mxu1 %vm609_vm4, %v946_v30  ;;  %v3633_v6 = vpop.permute.xlu1 %3632 }
 0x11d   : > { %7054 = vmatmul.mubr.msk.f32.gmra.mxu0 %vm609_vm4, %v7658_v59  ;;  %7078 = vmatprep.mubr.msk.f32.mxu1 %vm609_vm4, %v7622_v42  ;;  %v3649_v59 = vsel %vm550_vm2, %v7542_v26, %v3626_v4 }
 0x11e   : > { %7056 = vmatprep.mubr.msk.f32.mxu0 %vm609_vm4, %v7686_v35  ;;  %v3631_v31 = vpop.permute.xlu0 %3630 }
 0x120   : > { %7079 = vmatmul.mubr.msk.f32.vlgmr.msra.gmra.mxu1 %vm609_vm4, %v7633_v46  ;;  %v3643_v46 = vpop.permute.xlu1 %3642 }
 0x121   : > { %7057 = vmatmul.mubr.msk.f32.gmra.mxu0 %vm609_vm4, %v7682_v34  ;;  %7081 = vmatprep.mubr.msk.f32.mxu1 %vm609_vm4, %v7666_v55  ;;  %v3651_v34 = vsel %vm567_vm3, %v3649_v59, %v3633_v6 }
 0x122   : > { %7059 = vmatprep.mubr.msk.f32.mxu0 %vm609_vm4, %v7712_v0  ;;  %v3809_v42 = vpop.permute.xlu0 %3808 }
 0x123   : > { %v3817_v24 = vsel %vm550_vm2, %v7545_v28, %v3809_v42 }
 0x124   : > { %7082 = vmatmul.mubr.msk.f32.gmra.mxu1 %vm609_vm4, %v7672_v15  ;;  %v3650_v15 = vsel %vm567_vm3, %v3648_v58, %v3631_v31  ;;  %v3812_v35 = vpop.permute.xlu1 %3811 }
 0x125   : > { %7060 = vmatmul.mubr.msk.f32.gmra.mxu0 %vm609_vm4, %v7722_v3  ;;  %7084 = vmatprep.mubr.msk.f32.mxu1 %vm609_vm4, %v7697_v43  ;;  %v3652_v26 = vsel %vm584_vm5, %v3650_v15, %v3643_v46 }
 0x126   : > { %7062 = vmatprep.mubr.msk.f32.mxu0 %vm609_vm4, %v7750_v41  ;;  %v3645_v55 = vpop.permute.xlu0 %3644  ;;  %v3821_v28 = vrot.slane %v3652_v26, 1 }
 0x127   : > { %v3653_v43 = vsel %vm584_vm5, %v3651_v34, %v3645_v55 }
 0x128   : > { %7085 = vmatmul.mubr.msk.f32.gmra.mxu1 %vm609_vm4, %v7704_v50  ;;  %v3818_v50 = vsel %vm567_vm3, %v3817_v24, %v3812_v35  ;;  %v3822_v3 = vrot.slane %v3653_v43, 1 }
 0x129   : > { %7063 = vmatmul.mubr.msk.f32.gmra.mxu0 %vm609_vm4, %v7746_v62  ;;  %7087 = vmatprep.mubr.msk.f32.mxu1 %vm609_vm4, %v7730_v23 }
 0x12a   : > { %7065 = vmatprep.mubr.msk.f32.mxu0 %vm609_vm4, %v7776_v11  ;;  %v3815_v0 = vpop.permute.xlu0 %3814  ;;  %v3823_v62 = vsel %vm358_vm1, %v3821_v28, %v3822_v3 }
 0x12b   : > { %v3819_v23 = vsel %vm584_vm5, %v3818_v50, %v3815_v0 }
 0x12c   : > { %7088 = vmatmul.mubr.msk.f32.gmra.mxu1 %vm609_vm4, %v7736_v17  ;;  %v3824_v17 = vrot.slane %v3819_v23, 1 }
 0x12d   : > { %7066 = vmatmul.mubr.msk.f32.gmra.mxu0 %vm609_vm4, %v7786_v8  ;;  %7090 = vmatprep.mubr.msk.f32.mxu1 %vm609_vm4, %v7761_v22  ;;  %v7204_v22 = vmov 1966171168  }
 0x12e   : > { %7068 = vmatprep.mubr.msk.f32.mxu0 %vm609_vm4, %v599_v45  ;;  %v3825_v41 = vsel %vm358_vm1, %v3822_v3, %v3824_v17 }
 0x130   : > { %7091 = vmatmul.mubr.msk.f32.gmra.mxu1 %vm609_vm4, %v7768_v60  ;;  %v1145_v60 = vunpack.c.l.s4 %v7204_v22 }
 0x131   : > { %7069 = vmatmul.mubr.msk.f32.gmra.mxu0 %vm609_vm4, %v600_v44  ;;  %7093 = vmatprep.mubr.msk.f32.mxu1 %vm609_vm4, %v7794_v16 }
 0x132   : > { %7071 = vmatprep.mubr.msk.f32.mxu0 %vm609_vm4, %v3652_v26  ;;  %v1146_v11 = vunpack.c.0.s8 %v1145_v60 }
 0x134   : > { %7094 = vmatmul.mubr.msk.f32.gmra.mxu1 %vm609_vm4, %v7800_v29  ;;  %v7897_v7 = vsub.s32 %v1146_v11, %v1148_v12 }
 0x135   : > { %7072 = vmatmul.mubr.msk.f32.gmra.mxu0 %vm609_vm4, %v3653_v43  ;;  %7096 = vmatprep.mubr.msk.f32.mxu1 %vm609_vm4, %v944_v61 }
 0x138   : > { %7097 = vmatmul.mubr.msk.f32.gmra.mxu1 %vm609_vm4, %v946_v30 }
 0x139   : > { %7099 = vmatprep.mubr.msk.f32.mxu1 %vm609_vm4, %v3823_v62 }
 0x13c   : > { %7100 = vmatmul.mubr.msk.f32.gmra.mxu1 %vm609_vm4, %v3825_v41 }
 0x15e   : > { %v6996_v32 = vpop.f32.mrf.mxu0 }
 0x15f   : > { %v730_v54 = vadd.f32 %v6996_v32, %v7895_v13 }
 0x160   : > { %v724_v14 = vpop.f32.mrf.mxu0 }
 0x161   : > { %v1192_v37 = vcombine.high %v730_v54, %v730_v54  ;;  %v1199_v8 = vrot.slane %v730_v54, %v7897_v7  ;;  %v725_v33 = vadd.f32 %v7895_v13, %v724_v14 }
 0x162   : > { %v7024_v10 = vpop.f32.mrf.mxu1 }
 0x163   : > { %v1206_v9 = vrot.slane %v1192_v37, %v7897_v7  ;;  %v1207_v38 = vcombine.high %v1199_v8, %v1199_v8  ;;  %v1215_v16 = vrot.slane %v1199_v8, %v7897_v7  ;;  %v1143_v18 = vcombine.high %v725_v33, %v725_v33 }
 0x164   : > { %v1150_v39 = vrot.slane %v725_v33, %v7897_v7  ;;  %v1054_v63 = vadd.f32 %v7024_v10, %v7895_v13  ;;  %v1048_v51 = vpop.f32.mrf.mxu1 }
 0x165   : > { %v1208_v29 = vcombine.high %v1206_v9, %v1206_v9  ;;  %v1222_v36 = vrot.slane %v1206_v9, %v7897_v7  ;;  %v1229_v40 = vrot.slane %v1207_v38, %v7897_v7  ;;  %v1237_v49 = vcombine.high %v1215_v16, %v1215_v16 }
 0x166   : > { %v1157_v52 = vrot.slane %v1143_v18, %v7897_v7  ;;  %v1158_v53 = vcombine.high %v1150_v39, %v1150_v39  ;;  %v7912_v44 = vrot.slane %v1150_v39, %v7897_v7  ;;  %v2120_v19 = vcombine.high %v1054_v63, %v1054_v63 }
 0x167   : > { %v7915_v21 = vrot.slane %v1208_v29, %v7897_v7  ;;  %v1238_v45 = vcombine.high %v1222_v36, %v1222_v36  ;;  %v1239_v5 = vcombine.high %v1229_v40, %v1229_v40  ;;  %v2127_v56 = vrot.slane %v1054_v63, %v7897_v7 }
 0x168   : > { %v1159_v48 = vcombine.high %v1157_v52, %v1157_v52  ;;  %v7919_v57 = vrot.slane %v1157_v52, %v7897_v7  ;;  %v7922_v61 = vrot.slane %v1158_v53, %v7897_v7  ;;  %v1188_v47 = vcombine.high %v7912_v44, %v7912_v44 }
 0x169   : > { %v1240_v20 = vcombine.high %v7915_v21, %v7915_v21  ;;  %v2134_v27 = vrot.slane %v2120_v19, %v7897_v7  ;;  %v2135_v2 = vcombine.high %v2127_v56, %v2127_v56  ;;  %v2143_v30 = vrot.slane %v2127_v56, %v7897_v7  ;;  %v6999_v26 = vpop.f32.mrf.mxu0 }
 0x16a   : > { %v7932_v4 = vrot.slane %v1159_v48, %v7897_v7  ;;  %v1189_v31 = vcombine.high %v7919_v57, %v7919_v57  ;;  %v1190_v6 = vcombine.high %v7922_v61, %v7922_v61  ;;  %v1049_v42 = vadd.f32 %v7895_v13, %v1048_v51 }
 0x16b   : > { %v2136_v46 = vcombine.high %v2134_v27, %v2134_v27  ;;  %v2150_v58 = vrot.slane %v2134_v27, %v7897_v7  ;;  %v2157_v59 = vrot.slane %v2135_v2, %v7897_v7  ;;  %v2165_v55 = vcombine.high %v2143_v30, %v2143_v30  ;;  %v734_v14 = vpop.f32.mrf.mxu0 }
 0x16c   : > { %v1191_v15 = vcombine.high %v7932_v4, %v7932_v4  ;;  %v2890_v34 = vrot.slane %v2143_v30, %v7906_v25  ;;  %v2071_v24 = vcombine.high %v1049_v42, %v1049_v42  ;;  %v2078_v35 = vrot.slane %v1049_v42, %v7897_v7 }
 0x16d   : > { %v2164_v43 = vrot.slane %v2136_v46, %v7897_v7  ;;  %v2166_v50 = vcombine.high %v2150_v58, %v2150_v58  ;;  %v2167_v0 = vcombine.high %v2157_v59, %v2157_v59  ;;  %v2894_v28 = vrot.slane %v2157_v59, %v7906_v25 }
 0x16e   : > { %v2898_v3 = vrot.slane %v2165_v55, %v7906_v25  ;;  %v2906_v23 = vrot.slane %v2150_v58, %v7906_v25  ;;  %v3503_v17 = vsel %vm261_vm0, %v1215_v16, %v2890_v34  ;;  %v2085_v62 = vrot.slane %v2071_v24, %v7897_v7 }
 0x16f   : > { %v2168_v41 = vcombine.high %v2164_v43, %v2164_v43  ;;  %v2902_v22 = vrot.slane %v2167_v0, %v7906_v25  ;;  %v2910_v60 = vrot.slane %v2164_v43, %v7906_v25  ;;  %v2914_v1 = vrot.slane %v2166_v50, %v7906_v25  ;;  %6483 = vst.msk [vmem:[%s7944_s19 + $0x10] sm:$0x3] %vm6474_vm6, %v3503_v17 }
 0x170   : > { %v3504_v11 = vsel %vm261_vm0, %v1229_v40, %v2894_v28  ;;  %v3505_v12 = vsel %vm261_vm0, %v1237_v49, %v2898_v3  ;;  %v3507_v32 = vsel %vm261_vm0, %v1222_v36, %v2906_v23  ;;  %v2086_v54 = vcombine.high %v2078_v35, %v2078_v35  ;;  %v7027_v37 = vpop.f32.mrf.mxu1 }
 0x171   : > { %v2918_v8 = vrot.slane %v2168_v41, %v7906_v25  ;;  %v3506_v33 = vsel %vm261_vm0, %v1239_v5, %v2902_v22  ;;  %v3508_v10 = vsel %vm261_vm0, %v7915_v21, %v2910_v60  ;;  %v3509_v9 = vsel %vm261_vm0, %v1238_v45, %v2914_v1  ;;  %6484 = vst.msk [vmem:[%s7944_s19 + $0x12] sm:$0x3] %vm6474_vm6, %v3504_v11 }
 0x172   : > { %6485 = vst.msk [vmem:[%s7944_s19 + $0x14] sm:$0x3] %vm6474_vm6, %v3505_v12  ;;  %6487 = vst.msk [vmem:[%s7944_s19 + $0x18] sm:$0x3] %vm6474_vm6, %v3507_v32  ;;  %v2087_v38 = vcombine.high %v2085_v62, %v2085_v62  ;;  %v2094_v16 = vrot.slane %v2078_v35, %v7897_v7  ;;  %v2101_v18 = vrot.slane %v2085_v62, %v7897_v7  ;;  %v1058_v12 = vpop.f32.mrf.mxu1 }
 0x173   : > { %6486 = vst.msk [vmem:[%s7944_s19 + $0x16] sm:$0x3] %vm6474_vm6, %v3506_v33  ;;  %6488 = vst.msk [vmem:[%s7944_s19 + $0x1a] sm:$0x3] %vm6474_vm6, %v3508_v10  ;;  %v2108_v39 = vrot.slane %v2086_v54, %v7897_v7  ;;  %v3510_v63 = vsel %vm261_vm0, %v1240_v20, %v2918_v8  ;;  %v740_v29 = vadd.f32 %v6999_v26, %v7895_v13 }
 0x174   : > { %6489 = vst.msk [vmem:[%s7944_s19 + $0x1c] sm:$0x3] %vm6474_vm6, %v3509_v9  ;;  %v735_v36 = vadd.f32 %v7895_v13, %v734_v14  ;;  %v1064_v40 = vadd.f32 %v7027_v37, %v7895_v13  ;;  %6490 = vst.msk [vmem:[%s7944_s19 + $0x1e] sm:$0x3] %vm6474_vm6, %v3510_v63  ;;  %v2115_v49 = vrot.slane %v2087_v38, %v7897_v7 }
 0x175   : > { %v2116_v52 = vcombine.high %v2094_v16, %v2094_v16  ;;  %v2117_v53 = vcombine.high %v2101_v18, %v2101_v18  ;;  %v2118_v19 = vcombine.high %v2108_v39, %v2108_v39  ;;  %v2858_v21 = vrot.slane %v2094_v16, %v7906_v25 }
 0x176   : > { %v2862_v45 = vrot.slane %v2108_v39, %v7906_v25  ;;  %v2874_v5 = vrot.slane %v2101_v18, %v7906_v25  ;;  %v1290_v56 = vcombine.high %v740_v29, %v740_v29  ;;  %v2119_v51 = vcombine.high %v2115_v49, %v2115_v49 }
 0x177   : > { %v2866_v48 = vrot.slane %v2116_v52, %v7906_v25  ;;  %v2870_v20 = vrot.slane %v2118_v19, %v7906_v25  ;;  %v2878_v27 = vrot.slane %v2115_v49, %v7906_v25  ;;  %v2882_v2 = vrot.slane %v2117_v53, %v7906_v25 }
 0x178   : > { %v3495_v30 = vsel %vm261_vm0, %v7912_v44, %v2858_v21  ;;  %v3496_v42 = vsel %vm261_vm0, %v7922_v61, %v2862_v45  ;;  %v3499_v46 = vsel %vm261_vm0, %v7919_v57, %v2874_v5  ;;  %v2886_v58 = vrot.slane %v2119_v51, %v7906_v25 }
 0x179   : > { %v3497_v59 = vsel %vm261_vm0, %v1188_v47, %v2866_v48  ;;  %v3498_v55 = vsel %vm261_vm0, %v1190_v6, %v2870_v20  ;;  %v3500_v34 = vsel %vm261_vm0, %v7932_v4, %v2878_v27  ;;  %6475 = vst.msk [vmem:[%s7944_s19] sm:$0x3] %vm6474_vm6, %v3495_v30  ;;  %6476 = vst.msk [vmem:[%s7944_s19 + $0x2] sm:$0x3] %vm6474_vm6, %v3496_v42 }
 0x17a   : > { %6479 = vst.msk [vmem:[%s7944_s19 + $0x8] sm:$0x3] %vm6474_vm6, %v3499_v46  ;;  %v3501_v44 = vsel %vm261_vm0, %v1189_v31, %v2882_v2  ;;  %6477 = vst.msk [vmem:[%s7944_s19 + $0x4] sm:$0x3] %vm6474_vm6, %v3497_v59  ;;  %v1297_v61 = vrot.slane %v740_v29, %v7897_v7  ;;  %v1304_v47 = vrot.slane %v1290_v56, %v7897_v7 }
 0x17b   : > { %6478 = vst.msk [vmem:[%s7944_s19 + $0x6] sm:$0x3] %vm6474_vm6, %v3498_v55  ;;  %6480 = vst.msk [vmem:[%s7944_s19 + $0xa] sm:$0x3] %vm6474_vm6, %v3500_v34  ;;  %v1241_v6 = vcombine.high %v735_v36, %v735_v36  ;;  %v3502_v24 = vsel %vm261_vm0, %v1191_v15, %v2886_v58  ;;  %v1248_v57 = vrot.slane %v735_v36, %v7897_v7 }
 0x17c   : > { %6481 = vst.msk [vmem:[%s7944_s19 + $0xc] sm:$0x3] %vm6474_vm6, %v3501_v44  ;;  %v2218_v31 = vcombine.high %v1064_v40, %v1064_v40  ;;  %v2225_v35 = vrot.slane %v1064_v40, %v7897_v7  ;;  %6482 = vst.msk [vmem:[%s7944_s19 + $0xe] sm:$0x3] %vm6474_vm6, %v3502_v24  ;;  %v1305_v26 = vcombine.high %v1297_v61, %v1297_v61  ;;  %v7002_v8 = vpop.f32.mrf.mxu0 }
 0x17d   : > { %v1306_v43 = vcombine.high %v1304_v47, %v1304_v47  ;;  %v1313_v50 = vrot.slane %v1297_v61, %v7897_v7  ;;  %v1320_v0 = vrot.slane %v1304_v47, %v7897_v7  ;;  %v1255_v28 = vrot.slane %v1241_v6, %v7897_v7 }
 0x17e   : > { %v1256_v4 = vcombine.high %v1248_v57, %v1248_v57  ;;  %v8047_v15 = vrot.slane %v1248_v57, %v7897_v7  ;;  %v2232_v3 = vrot.slane %v2218_v31, %v7897_v7  ;;  %v1327_v23 = vrot.slane %v1305_v26, %v7897_v7  ;;  %v744_v42 = vpop.f32.mrf.mxu0 }
 0x17f   : > { %v1334_v17 = vrot.slane %v1306_v43, %v7897_v7  ;;  %v1335_v62 = vcombine.high %v1313_v50, %v1313_v50  ;;  %v1336_v41 = vcombine.high %v1320_v0, %v1320_v0  ;;  %v1257_v22 = vcombine.high %v1255_v28, %v1255_v28 }
 0x180   : > { %v8053_v60 = vrot.slane %v1255_v28, %v7897_v7  ;;  %v8056_v1 = vrot.slane %v1256_v4, %v7897_v7  ;;  %v1286_v11 = vcombine.high %v8047_v15, %v8047_v15  ;;  %v1337_v32 = vcombine.high %v1327_v23, %v1327_v23 }
 0x181   : > { %v1338_v54 = vcombine.high %v1334_v17, %v1334_v17  ;;  %v2233_v14 = vcombine.high %v2225_v35, %v2225_v35  ;;  %v2234_v37 = vcombine.high %v2232_v3, %v2232_v3  ;;  %v8061_v33 = vrot.slane %v1257_v22, %v7897_v7 }
 0x182   : > { %v1287_v10 = vcombine.high %v8053_v60, %v8053_v60  ;;  %v1288_v9 = vcombine.high %v8056_v1, %v8056_v1  ;;  %v2241_v38 = vrot.slane %v2225_v35, %v7897_v7  ;;  %v2248_v16 = vrot.slane %v2232_v3, %v7897_v7 }
 0x183   : > { %v2255_v18 = vrot.slane %v2233_v14, %v7897_v7  ;;  %v2262_v39 = vrot.slane %v2234_v37, %v7897_v7  ;;  %v1059_v63 = vadd.f32 %v7895_v13, %v1058_v12  ;;  %v1289_v29 = vcombine.high %v8061_v33, %v8061_v33  ;;  %v7030_v45 = vpop.f32.mrf.mxu1 }
 0x184   : > { %v2263_v36 = vcombine.high %v2241_v38, %v2241_v38  ;;  %v2954_v40 = vrot.slane %v2241_v38, %v7906_v25  ;;  %v750_v49 = vadd.f32 %v7002_v8, %v7895_v13  ;;  %v2264_v52 = vcombine.high %v2248_v16, %v2248_v16 }
 0x185   : > { %v2265_v53 = vcombine.high %v2255_v18, %v2255_v18  ;;  %v2266_v19 = vcombine.high %v2262_v39, %v2262_v39  ;;  %v2958_v21 = vrot.slane %v2255_v18, %v7906_v25  ;;  %v2970_v56 = vrot.slane %v2248_v16, %v7906_v25  ;;  %v1068_v34 = vpop.f32.mrf.mxu1 }
 0x186   : > { %v2962_v5 = vrot.slane %v2263_v36, %v7906_v25  ;;  %v2974_v51 = vrot.slane %v2262_v39, %v7906_v25  ;;  %v3519_v48 = vsel %vm261_vm0, %v1313_v50, %v2954_v40  ;;  %v2978_v27 = vrot.slane %v2264_v52, %v7906_v25 }
 0x187   : > { %v2966_v20 = vrot.slane %v2265_v53, %v7906_v25  ;;  %v2982_v2 = vrot.slane %v2266_v19, %v7906_v25  ;;  %v3520_v30 = vsel %vm261_vm0, %v1327_v23, %v2958_v21  ;;  %6515 = vst.msk [vmem:[%s7944_s19 + $0x50] sm:$0x3] %vm6474_vm6, %v3519_v48  ;;  %v3523_v58 = vsel %vm261_vm0, %v1320_v0, %v2970_v56 }
 0x188   : > { %v3521_v46 = vsel %vm261_vm0, %v1335_v62, %v2962_v5  ;;  %v3524_v59 = vsel %vm261_vm0, %v1334_v17, %v2974_v51  ;;  %6516 = vst.msk [vmem:[%s7944_s19 + $0x52] sm:$0x3] %vm6474_vm6, %v3520_v30  ;;  %v2169_v55 = vcombine.high %v1059_v63, %v1059_v63  ;;  %v3525_v61 = vsel %vm261_vm0, %v1336_v41, %v2978_v27 }
 0x189   : > { %v3522_v44 = vsel %vm261_vm0, %v1337_v32, %v2966_v20  ;;  %v3526_v47 = vsel %vm261_vm0, %v1338_v54, %v2982_v2  ;;  %6517 = vst.msk [vmem:[%s7944_s19 + $0x54] sm:$0x3] %vm6474_vm6, %v3521_v46  ;;  %6519 = vst.msk [vmem:[%s7944_s19 + $0x58] sm:$0x3] %vm6474_vm6, %v3523_v58  ;;  %v2176_v6 = vrot.slane %v1059_v63, %v7897_v7 }
 0x18a   : > { %6520 = vst.msk [vmem:[%s7944_s19 + $0x5a] sm:$0x3] %vm6474_vm6, %v3524_v59  ;;  %6518 = vst.msk [vmem:[%s7944_s19 + $0x56] sm:$0x3] %vm6474_vm6, %v3522_v44  ;;  %v2183_v24 = vrot.slane %v2169_v55, %v7897_v7  ;;  %v1388_v57 = vcombine.high %v750_v49, %v750_v49  ;;  %v1395_v31 = vrot.slane %v750_v49, %v7897_v7 }
 0x18b   : > { %6521 = vst.msk [vmem:[%s7944_s19 + $0x5c] sm:$0x3] %vm6474_vm6, %v3525_v61  ;;  %6522 = vst.msk [vmem:[%s7944_s19 + $0x5e] sm:$0x3] %vm6474_vm6, %v3526_v47  ;;  %v745_v35 = vadd.f32 %v7895_v13, %v744_v42  ;;  %v2184_v26 = vcombine.high %v2176_v6, %v2176_v6  ;;  %v2192_v43 = vrot.slane %v2176_v6, %v7897_v7 }
 0x18c   : > { %v1074_v50 = vadd.f32 %v7030_v45, %v7895_v13  ;;  %v1069_v0 = vadd.f32 %v7895_v13, %v1068_v34  ;;  %v2185_v28 = vcombine.high %v2183_v24, %v2183_v24  ;;  %v2199_v4 = vrot.slane %v2183_v24, %v7897_v7 }
 0x18d   : > { %v1402_v3 = vrot.slane %v1388_v57, %v7897_v7  ;;  %v1403_v23 = vcombine.high %v1395_v31, %v1395_v31  ;;  %v2206_v17 = vrot.slane %v2184_v26, %v7897_v7  ;;  %v2214_v62 = vcombine.high %v2192_v43, %v2192_v43 }
 0x18e   : > { %v2922_v41 = vrot.slane %v2192_v43, %v7906_v25  ;;  %v8119_v22 = vrot.slane %v1395_v31, %v7897_v7  ;;  %v2213_v12 = vrot.slane %v2185_v28, %v7897_v7  ;;  %v2215_v32 = vcombine.high %v2199_v4, %v2199_v4 }
 0x18f   : > { %v2938_v54 = vrot.slane %v2199_v4, %v7906_v25  ;;  %v1404_v14 = vcombine.high %v1402_v3, %v1402_v3  ;;  %v2216_v37 = vcombine.high %v2206_v17, %v2206_v17  ;;  %v2926_v8 = vrot.slane %v2206_v17, %v7906_v25 }
 0x190   : > { %v2930_v38 = vrot.slane %v2214_v62, %v7906_v25  ;;  %v3511_v16 = vsel %vm261_vm0, %v8047_v15, %v2922_v41  ;;  %v2217_v18 = vcombine.high %v2213_v12, %v2213_v12  ;;  %v2942_v39 = vrot.slane %v2213_v12, %v7906_v25 }
 0x191   : > { %v2946_v63 = vrot.slane %v2215_v32, %v7906_v25  ;;  %v3515_v36 = vsel %vm261_vm0, %v8053_v60, %v2938_v54  ;;  %6507 = vst.msk [vmem:[%s7944_s19 + $0x40] sm:$0x3] %vm6474_vm6, %v3511_v16  ;;  %v2934_v40 = vrot.slane %v2216_v37, %v7906_v25  ;;  %v3512_v49 = vsel %vm261_vm0, %v8056_v1, %v2926_v8 }
 0x192   : > { %v3513_v52 = vsel %vm261_vm0, %v1286_v11, %v2930_v38  ;;  %6511 = vst.msk [vmem:[%s7944_s19 + $0x48] sm:$0x3] %vm6474_vm6, %v3515_v36  ;;  %v8143_v53 = vrot.slane %v1402_v3, %v7897_v7  ;;  %v2950_v19 = vrot.slane %v2217_v18, %v7906_v25  ;;  %v3516_v21 = vsel %vm261_vm0, %v8061_v33, %v2942_v39 }
 0x193   : > { %v3517_v45 = vsel %vm261_vm0, %v1287_v10, %v2946_v63  ;;  %6508 = vst.msk [vmem:[%s7944_s19 + $0x42] sm:$0x3] %vm6474_vm6, %v3512_v49  ;;  %6509 = vst.msk [vmem:[%s7944_s19 + $0x44] sm:$0x3] %vm6474_vm6, %v3513_v52  ;;  %v1425_v15 = vrot.slane %v1403_v23, %v7897_v7  ;;  %v3514_v11 = vsel %vm261_vm0, %v1288_v9, %v2934_v40 }
 0x194   : > { %6512 = vst.msk [vmem:[%s7944_s19 + $0x4a] sm:$0x3] %vm6474_vm6, %v3516_v21  ;;  %6513 = vst.msk [vmem:[%s7944_s19 + $0x4c] sm:$0x3] %vm6474_vm6, %v3517_v45  ;;  %v8166_v60 = vrot.slane %v1404_v14, %v7897_v7  ;;  %v1433_v10 = vcombine.high %v8119_v22, %v8119_v22  ;;  %v1434_v5 = vcombine.high %v8143_v53, %v8143_v53  ;;  %v7033_v39 = vpop.f32.mrf.mxu1 }
 0x195   : > { %v3518_v1 = vsel %vm261_vm0, %v1289_v29, %v2950_v19  ;;  %6510 = vst.msk [vmem:[%s7944_s19 + $0x46] sm:$0x3] %vm6474_vm6, %v3514_v11  ;;  %v1435_v9 = vcombine.high %v1425_v15, %v1425_v15  ;;  %v1339_v56 = vcombine.high %v745_v35, %v745_v35  ;;  %v1346_v51 = vrot.slane %v745_v35, %v7897_v7 }
 0x196   : > { %6514 = vst.msk [vmem:[%s7944_s19 + $0x4e] sm:$0x3] %vm6474_vm6, %v3518_v1  ;;  %v1436_v48 = vcombine.high %v8166_v60, %v8166_v60  ;;  %v2316_v20 = vcombine.high %v1074_v50, %v1074_v50  ;;  %v2323_v27 = vrot.slane %v1074_v50, %v7897_v7  ;;  %v2267_v2 = vcombine.high %v1069_v0, %v1069_v0 }
 0x197   : > { %v1353_v30 = vrot.slane %v1339_v56, %v7897_v7  ;;  %v1354_v33 = vcombine.high %v1346_v51, %v1346_v51  ;;  %v8186_v29 = vrot.slane %v1346_v51, %v7897_v7  ;;  %v2274_v42 = vrot.slane %v1069_v0, %v7897_v7  ;;  %v7005_v0 = vpop.f32.mrf.mxu0 }
 0x198   : > { %v2330_v46 = vrot.slane %v2316_v20, %v7897_v7  ;;  %v2331_v58 = vcombine.high %v2323_v27, %v2323_v27  ;;  %v2339_v59 = vrot.slane %v2323_v27, %v7897_v7  ;;  %v2281_v55 = vrot.slane %v2267_v2, %v7897_v7 }
 0x199   : > { %v1355_v34 = vcombine.high %v1353_v30, %v1353_v30  ;;  %v8193_v44 = vrot.slane %v1353_v30, %v7897_v7  ;;  %v8196_v61 = vrot.slane %v1354_v33, %v7897_v7  ;;  %v1384_v47 = vcombine.high %v8186_v29, %v8186_v29  ;;  %v754_v18 = vpop.f32.mrf.mxu0 }
 0x19a   : > { %v2332_v6 = vcombine.high %v2330_v46, %v2330_v46  ;;  %v2346_v24 = vrot.slane %v2330_v46, %v7897_v7  ;;  %v2353_v57 = vrot.slane %v2331_v58, %v7897_v7  ;;  %v2361_v31 = vcombine.high %v2339_v59, %v2339_v59 }
 0x19b   : > { %v8203_v35 = vrot.slane %v1355_v34, %v7897_v7  ;;  %v1385_v26 = vcombine.high %v8193_v44, %v8193_v44  ;;  %v1386_v43 = vcombine.high %v8196_v61, %v8196_v61  ;;  %v3018_v50 = vrot.slane %v2339_v59, %v7906_v25 }
 0x19c   : > { %v2360_v28 = vrot.slane %v2332_v6, %v7897_v7  ;;  %v2362_v4 = vcombine.high %v2346_v24, %v2346_v24  ;;  %v2363_v3 = vcombine.high %v2353_v57, %v2353_v57  ;;  %v3022_v23 = vrot.slane %v2353_v57, %v7906_v25 }
 0x19d   : > { %v1387_v17 = vcombine.high %v8203_v35, %v8203_v35  ;;  %v3026_v62 = vrot.slane %v2361_v31, %v7906_v25  ;;  %v3034_v41 = vrot.slane %v2346_v24, %v7906_v25  ;;  %v3535_v12 = vsel %vm261_vm0, %v8119_v22, %v3018_v50 }
 0x19e   : > { %v2364_v32 = vcombine.high %v2360_v28, %v2360_v28  ;;  %v3030_v54 = vrot.slane %v2363_v3, %v7906_v25  ;;  %v3038_v14 = vrot.slane %v2360_v28, %v7906_v25  ;;  %v3042_v37 = vrot.slane %v2362_v4, %v7906_v25  ;;  %6547 = vst.msk [vmem:[%s7944_s19 + $0x90] sm:$0x3] %vm6474_vm6, %v3535_v12 }
 0x19f   : > { %v3536_v8 = vsel %vm261_vm0, %v1425_v15, %v3022_v23  ;;  %v3537_v38 = vsel %vm261_vm0, %v1433_v10, %v3026_v62  ;;  %v3539_v22 = vsel %vm261_vm0, %v8143_v53, %v3034_v41  ;;  %v2282_v16 = vcombine.high %v2274_v42, %v2274_v42 }
 0x1a0   : > { %v3046_v63 = vrot.slane %v2364_v32, %v7906_v25  ;;  %v3538_v36 = vsel %vm261_vm0, %v1435_v9, %v3030_v54  ;;  %v3540_v40 = vsel %vm261_vm0, %v8166_v60, %v3038_v14  ;;  %v3541_v49 = vsel %vm261_vm0, %v1434_v5, %v3042_v37  ;;  %6548 = vst.msk [vmem:[%s7944_s19 + $0x92] sm:$0x3] %vm6474_vm6, %v3536_v8 }
 0x1a1   : > { %6549 = vst.msk [vmem:[%s7944_s19 + $0x94] sm:$0x3] %vm6474_vm6, %v3537_v38  ;;  %6551 = vst.msk [vmem:[%s7944_s19 + $0x98] sm:$0x3] %vm6474_vm6, %v3539_v22  ;;  %v2283_v52 = vcombine.high %v2281_v55, %v2281_v55  ;;  %v2290_v53 = vrot.slane %v2274_v42, %v7897_v7  ;;  %v2297_v19 = vrot.slane %v2281_v55, %v7897_v7  ;;  %v1078_v38 = vpop.f32.mrf.mxu1 }
 0x1a2   : > { %6550 = vst.msk [vmem:[%s7944_s19 + $0x96] sm:$0x3] %vm6474_vm6, %v3538_v36  ;;  %6552 = vst.msk [vmem:[%s7944_s19 + $0x9a] sm:$0x3] %vm6474_vm6, %v3540_v40  ;;  %v2304_v21 = vrot.slane %v2282_v16, %v7897_v7  ;;  %v3542_v45 = vsel %vm261_vm0, %v1436_v48, %v3046_v63  ;;  %v760_v15 = vadd.f32 %v7005_v0, %v7895_v13  ;;  %v7008_v63 = vpop.f32.mrf.mxu0 }
 0x1a3   : > { %6553 = vst.msk [vmem:[%s7944_s19 + $0x9c] sm:$0x3] %vm6474_vm6, %v3541_v49  ;;  %v755_v11 = vadd.f32 %v7895_v13, %v754_v18  ;;  %v1084_v60 = vadd.f32 %v7033_v39, %v7895_v13  ;;  %6554 = vst.msk [vmem:[%s7944_s19 + $0x9e] sm:$0x3] %vm6474_vm6, %v3542_v45  ;;  %v2311_v10 = vrot.slane %v2283_v52, %v7897_v7 }
 0x1a4   : > { %v2312_v5 = vcombine.high %v2290_v53, %v2290_v53  ;;  %v2313_v1 = vcombine.high %v2297_v19, %v2297_v19  ;;  %v2314_v9 = vcombine.high %v2304_v21, %v2304_v21  ;;  %v2986_v56 = vrot.slane %v2290_v53, %v7906_v25 }
 0x1a5   : > { %v2990_v51 = vrot.slane %v2304_v21, %v7906_v25  ;;  %v3002_v48 = vrot.slane %v2297_v19, %v7906_v25  ;;  %v1486_v20 = vcombine.high %v760_v15, %v760_v15  ;;  %v2315_v27 = vcombine.high %v2311_v10, %v2311_v10 }
 0x1a6   : > { %v2994_v2 = vrot.slane %v2312_v5, %v7906_v25  ;;  %v2998_v30 = vrot.slane %v2314_v9, %v7906_v25  ;;  %v3006_v33 = vrot.slane %v2311_v10, %v7906_v25  ;;  %v3010_v42 = vrot.slane %v2313_v1, %v7906_v25 }
 0x1a7   : > { %v3527_v46 = vsel %vm261_vm0, %v8186_v29, %v2986_v56  ;;  %v3528_v58 = vsel %vm261_vm0, %v8196_v61, %v2990_v51  ;;  %v3531_v59 = vsel %vm261_vm0, %v8193_v44, %v3002_v48  ;;  %v3014_v55 = vrot.slane %v2315_v27, %v7906_v25  ;;  %v7036_v5 = vpop.f32.mrf.mxu1 }
 0x1a8   : > { %v3529_v34 = vsel %vm261_vm0, %v1384_v47, %v2994_v2  ;;  %v3530_v6 = vsel %vm261_vm0, %v1386_v43, %v2998_v30  ;;  %v3532_v24 = vsel %vm261_vm0, %v8203_v35, %v3006_v33  ;;  %6539 = vst.msk [vmem:[%s7944_s19 + $0x80] sm:$0x3] %vm6474_vm6, %v3527_v46  ;;  %6540 = vst.msk [vmem:[%s7944_s19 + $0x82] sm:$0x3] %vm6474_vm6, %v3528_v58  ;;  %v764_v58 = vpop.f32.mrf.mxu0 }
 0x1a9   : > { %6543 = vst.msk [vmem:[%s7944_s19 + $0x88] sm:$0x3] %vm6474_vm6, %v3531_v59  ;;  %v3533_v61 = vsel %vm261_vm0, %v1385_v26, %v3010_v42  ;;  %6541 = vst.msk [vmem:[%s7944_s19 + $0x84] sm:$0x3] %vm6474_vm6, %v3529_v34  ;;  %v1493_v29 = vrot.slane %v760_v15, %v7897_v7  ;;  %v1500_v47 = vrot.slane %v1486_v20, %v7897_v7 }
 0x1aa   : > { %6542 = vst.msk [vmem:[%s7944_s19 + $0x86] sm:$0x3] %vm6474_vm6, %v3530_v6  ;;  %6544 = vst.msk [vmem:[%s7944_s19 + $0x8a] sm:$0x3] %vm6474_vm6, %v3532_v24  ;;  %v1437_v57 = vcombine.high %v755_v11, %v755_v11  ;;  %v3534_v31 = vsel %vm261_vm0, %v1387_v17, %v3014_v55  ;;  %v1444_v44 = vrot.slane %v755_v11, %v7897_v7  ;;  %v1088_v24 = vpop.f32.mrf.mxu1 }
 0x1ab   : > { %6545 = vst.msk [vmem:[%s7944_s19 + $0x8c] sm:$0x3] %vm6474_vm6, %v3533_v61  ;;  %v2414_v26 = vcombine.high %v1084_v60, %v1084_v60  ;;  %v2421_v43 = vrot.slane %v1084_v60, %v7897_v7  ;;  %6546 = vst.msk [vmem:[%s7944_s19 + $0x8e] sm:$0x3] %vm6474_vm6, %v3534_v31  ;;  %v1501_v50 = vcombine.high %v1493_v29, %v1493_v29 }
 0x1ac   : > { %v1502_v0 = vcombine.high %v1500_v47, %v1500_v47  ;;  %v1509_v28 = vrot.slane %v1493_v29, %v7897_v7  ;;  %v1516_v4 = vrot.slane %v1500_v47, %v7897_v7  ;;  %v1451_v3 = vrot.slane %v1437_v57, %v7897_v7 }
 0x1ad   : > { %v1452_v35 = vcombine.high %v1444_v44, %v1444_v44  ;;  %v8307_v23 = vrot.slane %v1444_v44, %v7897_v7  ;;  %v2428_v17 = vrot.slane %v2414_v26, %v7897_v7  ;;  %v1523_v62 = vrot.slane %v1501_v50, %v7897_v7 }
 0x1ae   : > { %v1530_v41 = vrot.slane %v1502_v0, %v7897_v7  ;;  %v1531_v12 = vcombine.high %v1509_v28, %v1509_v28  ;;  %v1532_v32 = vcombine.high %v1516_v4, %v1516_v4  ;;  %v1453_v54 = vcombine.high %v1451_v3, %v1451_v3 }
 0x1af   : > { %v8313_v14 = vrot.slane %v1451_v3, %v7897_v7  ;;  %v8316_v37 = vrot.slane %v1452_v35, %v7897_v7  ;;  %v1482_v8 = vcombine.high %v8307_v23, %v8307_v23  ;;  %v1533_v22 = vcombine.high %v1523_v62, %v1523_v62 }
 0x1b0   : > { %v1534_v16 = vcombine.high %v1530_v41, %v1530_v41  ;;  %v2429_v18 = vcombine.high %v2421_v43, %v2421_v43  ;;  %v2430_v39 = vcombine.high %v2428_v17, %v2428_v17  ;;  %v8321_v36 = vrot.slane %v1453_v54, %v7897_v7 }
 0x1b1   : > { %v1483_v40 = vcombine.high %v8313_v14, %v8313_v14  ;;  %v1484_v49 = vcombine.high %v8316_v37, %v8316_v37  ;;  %v2437_v52 = vrot.slane %v2421_v43, %v7897_v7  ;;  %v2444_v53 = vrot.slane %v2428_v17, %v7897_v7 }
 0x1b2   : > { %v2451_v19 = vrot.slane %v2429_v18, %v7897_v7  ;;  %v2458_v21 = vrot.slane %v2430_v39, %v7897_v7  ;;  %v1079_v45 = vadd.f32 %v7895_v13, %v1078_v38  ;;  %v1485_v15 = vcombine.high %v8321_v36, %v8321_v36 }
 0x1b3   : > { %v2459_v11 = vcombine.high %v2437_v52, %v2437_v52  ;;  %v3082_v60 = vrot.slane %v2437_v52, %v7906_v25  ;;  %v770_v10 = vadd.f32 %v7008_v63, %v7895_v13  ;;  %v2460_v1 = vcombine.high %v2444_v53, %v2444_v53 }
 0x1b4   : > { %v2461_v9 = vcombine.high %v2451_v19, %v2451_v19  ;;  %v2462_v56 = vcombine.high %v2458_v21, %v2458_v21  ;;  %v3086_v51 = vrot.slane %v2451_v19, %v7906_v25  ;;  %v3098_v20 = vrot.slane %v2444_v53, %v7906_v25 }
 0x1b5   : > { %v3090_v48 = vrot.slane %v2459_v11, %v7906_v25  ;;  %v3102_v27 = vrot.slane %v2458_v21, %v7906_v25  ;;  %v3551_v2 = vsel %vm261_vm0, %v1509_v28, %v3082_v60  ;;  %v3106_v33 = vrot.slane %v2460_v1, %v7906_v25 }
 0x1b6   : > { %v3094_v30 = vrot.slane %v2461_v9, %v7906_v25  ;;  %v3110_v42 = vrot.slane %v2462_v56, %v7906_v25  ;;  %v3552_v46 = vsel %vm261_vm0, %v1523_v62, %v3086_v51  ;;  %6579 = vst.msk [vmem:[%s7944_s19 + $0xd0] sm:$0x3] %vm6474_vm6, %v3551_v2  ;;  %v3555_v55 = vsel %vm261_vm0, %v1516_v4, %v3098_v20 }
 0x1b7   : > { %v3553_v59 = vsel %vm261_vm0, %v1531_v12, %v3090_v48  ;;  %v3556_v34 = vsel %vm261_vm0, %v1530_v41, %v3102_v27  ;;  %6580 = vst.msk [vmem:[%s7944_s19 + $0xd2] sm:$0x3] %vm6474_vm6, %v3552_v46  ;;  %v2365_v6 = vcombine.high %v1079_v45, %v1079_v45  ;;  %v3557_v29 = vsel %vm261_vm0, %v1532_v32, %v3106_v33 }
 0x1b8   : > { %v3554_v61 = vsel %vm261_vm0, %v1533_v22, %v3094_v30  ;;  %v3558_v47 = vsel %vm261_vm0, %v1534_v16, %v3110_v42  ;;  %6581 = vst.msk [vmem:[%s7944_s19 + $0xd4] sm:$0x3] %vm6474_vm6, %v3553_v59  ;;  %6583 = vst.msk [vmem:[%s7944_s19 + $0xd8] sm:$0x3] %vm6474_vm6, %v3555_v55  ;;  %v2372_v57 = vrot.slane %v1079_v45, %v7897_v7 }
 0x1b9   : > { %6584 = vst.msk [vmem:[%s7944_s19 + $0xda] sm:$0x3] %vm6474_vm6, %v3556_v34  ;;  %6582 = vst.msk [vmem:[%s7944_s19 + $0xd6] sm:$0x3] %vm6474_vm6, %v3554_v61  ;;  %v2379_v31 = vrot.slane %v2365_v6, %v7897_v7  ;;  %v1584_v44 = vcombine.high %v770_v10, %v770_v10  ;;  %v1591_v26 = vrot.slane %v770_v10, %v7897_v7 }
 0x1ba   : > { %6585 = vst.msk [vmem:[%s7944_s19 + $0xdc] sm:$0x3] %vm6474_vm6, %v3557_v29  ;;  %6586 = vst.msk [vmem:[%s7944_s19 + $0xde] sm:$0x3] %vm6474_vm6, %v3558_v47  ;;  %v765_v43 = vadd.f32 %v7895_v13, %v764_v58  ;;  %v2380_v50 = vcombine.high %v2372_v57, %v2372_v57  ;;  %v2388_v0 = vrot.slane %v2372_v57, %v7897_v7 }
 0x1bb   : > { %v1094_v28 = vadd.f32 %v7036_v5, %v7895_v13  ;;  %v1089_v4 = vadd.f32 %v7895_v13, %v1088_v24  ;;  %v2381_v3 = vcombine.high %v2379_v31, %v2379_v31  ;;  %v2395_v35 = vrot.slane %v2379_v31, %v7897_v7 }
 0x1bc   : > { %v1598_v17 = vrot.slane %v1584_v44, %v7897_v7  ;;  %v1599_v62 = vcombine.high %v1591_v26, %v1591_v26  ;;  %v2402_v41 = vrot.slane %v2380_v50, %v7897_v7  ;;  %v2410_v12 = vcombine.high %v2388_v0, %v2388_v0 }
 0x1bd   : > { %v3050_v32 = vrot.slane %v2388_v0, %v7906_v25  ;;  %v8379_v54 = vrot.slane %v1591_v26, %v7897_v7  ;;  %v2409_v38 = vrot.slane %v2381_v3, %v7897_v7  ;;  %v2411_v22 = vcombine.high %v2395_v35, %v2395_v35 }
 0x1be   : > { %v3066_v13 = vrot.slane %v2395_v35, %v7906_v25  ;;  %v1600_v16 = vcombine.high %v1598_v17, %v1598_v17  ;;  %v2412_v18 = vcombine.high %v2402_v41, %v2402_v41  ;;  %v3054_v39 = vrot.slane %v2402_v41, %v7906_v25 }
 0x1bf   : > { %v3058_v63 = vrot.slane %v2410_v12, %v7906_v25  ;;  %v3543_v52 = vsel %vm261_vm0, %v8307_v23, %v3050_v32  ;;  %v2413_v53 = vcombine.high %v2409_v38, %v2409_v38  ;;  %v3070_v19 = vrot.slane %v2409_v38, %v7906_v25 }
 0x1c0   : > { %v3074_v21 = vrot.slane %v2411_v22, %v7906_v25  ;;  %v3547_v45 = vsel %vm261_vm0, %v8313_v14, %v3066_v13  ;;  %6571 = vst.msk [vmem:[%s7944_s19 + $0xc0] sm:$0x3] %vm6474_vm6, %v3543_v52  ;;  %v3062_v11 = vrot.slane %v2412_v18, %v7906_v25  ;;  %v3544_v60 = vsel %vm261_vm0, %v8316_v37, %v3054_v39 }
 0x1c1   : > { %v3545_v10 = vsel %vm261_vm0, %v1482_v8, %v3058_v63  ;;  %6575 = vst.msk [vmem:[%s7944_s19 + $0xc8] sm:$0x3] %vm6474_vm6, %v3547_v45  ;;  %v8403_v5 = vrot.slane %v1598_v17, %v7897_v7  ;;  %v3078_v1 = vrot.slane %v2413_v53, %v7906_v25  ;;  %v3548_v9 = vsel %vm261_vm0, %v8321_v36, %v3070_v19  ;;  %v7039_v53 = vpop.f32.mrf.mxu1 }
 0x1c2   : > { %v3549_v56 = vsel %vm261_vm0, %v1483_v40, %v3074_v21  ;;  %6572 = vst.msk [vmem:[%s7944_s19 + $0xc2] sm:$0x3] %vm6474_vm6, %v3544_v60  ;;  %6573 = vst.msk [vmem:[%s7944_s19 + $0xc4] sm:$0x3] %vm6474_vm6, %v3545_v10  ;;  %v1621_v23 = vrot.slane %v1599_v62, %v7897_v7  ;;  %v3546_v8 = vsel %vm261_vm0, %v1484_v49, %v3062_v11 }
 0x1c3   : > { %6576 = vst.msk [vmem:[%s7944_s19 + $0xca] sm:$0x3] %vm6474_vm6, %v3548_v9  ;;  %6577 = vst.msk [vmem:[%s7944_s19 + $0xcc] sm:$0x3] %vm6474_vm6, %v3549_v56  ;;  %v8426_v14 = vrot.slane %v1600_v16, %v7897_v7  ;;  %v1629_v40 = vcombine.high %v8379_v54, %v8379_v54  ;;  %v1630_v51 = vcombine.high %v8403_v5, %v8403_v5  ;;  %v8511_v56 = vld [vmem:[%s10286_s2] ss:$0 sm:$0xff] }
 0x1c4   : > { %v3550_v37 = vsel %vm261_vm0, %v1485_v15, %v3078_v1  ;;  %6574 = vst.msk [vmem:[%s7944_s19 + $0xc6] sm:$0x3] %vm6474_vm6, %v3546_v8  ;;  %v1631_v49 = vcombine.high %v1621_v23, %v1621_v23  ;;  %v1535_v48 = vcombine.high %v765_v43, %v765_v43  ;;  %v1542_v20 = vrot.slane %v765_v43, %v7897_v7 }
 0x1c5   : > { %6578 = vst.msk [vmem:[%s7944_s19 + $0xce] sm:$0x3] %vm6474_vm6, %v3550_v37  ;;  %v1632_v27 = vcombine.high %v8426_v14, %v8426_v14  ;;  %v2512_v2 = vcombine.high %v1094_v28, %v1094_v28  ;;  %v2519_v30 = vrot.slane %v1094_v28, %v7897_v7  ;;  %v2463_v33 = vcombine.high %v1089_v4, %v1089_v4  ;;  %v7011_v28 = vpop.f32.mrf.mxu0 }
 0x1c6   : > { %v1549_v42 = vrot.slane %v1535_v48, %v7897_v7  ;;  %v1550_v36 = vcombine.high %v1542_v20, %v1542_v20  ;;  %v8446_v15 = vrot.slane %v1542_v20, %v7897_v7  ;;  %v2470_v46 = vrot.slane %v1089_v4, %v7897_v7 }
 0x1c7   : > { %v2526_v58 = vrot.slane %v2512_v2, %v7897_v7  ;;  %v2527_v59 = vcombine.high %v2519_v30, %v2519_v30  ;;  %v2535_v55 = vrot.slane %v2519_v30, %v7897_v7  ;;  %v2477_v34 = vrot.slane %v2463_v33, %v7897_v7  ;;  %v774_v52 = vpop.f32.mrf.mxu0 }
 0x1c8   : > { %v1551_v6 = vcombine.high %v1549_v42, %v1549_v42  ;;  %v8453_v24 = vrot.slane %v1549_v42, %v7897_v7  ;;  %v8456_v61 = vrot.slane %v1550_v36, %v7897_v7  ;;  %v1580_v29 = vcombine.high %v8446_v15, %v8446_v15 }
 0x1c9   : > { %v2528_v47 = vcombine.high %v2526_v58, %v2526_v58  ;;  %v2542_v57 = vrot.slane %v2526_v58, %v7897_v7  ;;  %v2549_v31 = vrot.slane %v2527_v59, %v7897_v7  ;;  %v2557_v44 = vcombine.high %v2535_v55, %v2535_v55 }
 0x1ca   : > { %v8463_v26 = vrot.slane %v1551_v6, %v7897_v7  ;;  %v1581_v43 = vcombine.high %v8453_v24, %v8453_v24  ;;  %v1582_v50 = vcombine.high %v8456_v61, %v8456_v61  ;;  %v3146_v0 = vrot.slane %v2535_v55, %v7906_v25 }
 0x1cb   : > { %v2556_v4 = vrot.slane %v2528_v47, %v7897_v7  ;;  %v2558_v3 = vcombine.high %v2542_v57, %v2542_v57  ;;  %v2559_v35 = vcombine.high %v2549_v31, %v2549_v31  ;;  %v3150_v17 = vrot.slane %v2549_v31, %v7906_v25 }
 0x1cc   : > { %v1583_v62 = vcombine.high %v8463_v26, %v8463_v26  ;;  %v3154_v41 = vrot.slane %v2557_v44, %v7906_v25  ;;  %v3162_v12 = vrot.slane %v2542_v57, %v7906_v25  ;;  %v3567_v32 = vsel %vm261_vm0, %v8379_v54, %v3146_v0 }
 0x1cd   : > { %v2560_v38 = vcombine.high %v2556_v4, %v2556_v4  ;;  %v3158_v22 = vrot.slane %v2559_v35, %v7906_v25  ;;  %v3166_v13 = vrot.slane %v2556_v4, %v7906_v25  ;;  %v3170_v16 = vrot.slane %v2558_v3, %v7906_v25  ;;  %6611 = vst.msk [vmem:[%s7944_s19 + $0x110] sm:$0x3] %vm6474_vm6, %v3567_v32 }
 0x1ce   : > { %v3568_v18 = vsel %vm261_vm0, %v1621_v23, %v3150_v17  ;;  %v3569_v39 = vsel %vm261_vm0, %v1629_v40, %v3154_v41  ;;  %v3571_v54 = vsel %vm261_vm0, %v8403_v5, %v3162_v12  ;;  %v2478_v63 = vcombine.high %v2470_v46, %v2470_v46 }
 0x1cf   : > { %v3174_v19 = vrot.slane %v2560_v38, %v7906_v25  ;;  %v3570_v21 = vsel %vm261_vm0, %v1631_v49, %v3158_v22  ;;  %v3572_v45 = vsel %vm261_vm0, %v8426_v14, %v3166_v13  ;;  %v3573_v11 = vsel %vm261_vm0, %v1630_v51, %v3170_v16  ;;  %6612 = vst.msk [vmem:[%s7944_s19 + $0x112] sm:$0x3] %vm6474_vm6, %v3568_v18 }
 0x1d0   : > { %6613 = vst.msk [vmem:[%s7944_s19 + $0x114] sm:$0x3] %vm6474_vm6, %v3569_v39  ;;  %6615 = vst.msk [vmem:[%s7944_s19 + $0x118] sm:$0x3] %vm6474_vm6, %v3571_v54  ;;  %v2479_v60 = vcombine.high %v2477_v34, %v2477_v34  ;;  %v2486_v10 = vrot.slane %v2470_v46, %v7897_v7  ;;  %v2493_v5 = vrot.slane %v2477_v34, %v7897_v7  ;;  %v1098_v39 = vpop.f32.mrf.mxu1 }
 0x1d1   : > { %6614 = vst.msk [vmem:[%s7944_s19 + $0x116] sm:$0x3] %vm6474_vm6, %v3570_v21  ;;  %6616 = vst.msk [vmem:[%s7944_s19 + $0x11a] sm:$0x3] %vm6474_vm6, %v3572_v45  ;;  %v2500_v1 = vrot.slane %v2478_v63, %v7897_v7  ;;  %v3574_v9 = vsel %vm261_vm0, %v1632_v27, %v3174_v19  ;;  %v780_v23 = vadd.f32 %v8511_v56, %v7011_v28  ;;  %v7014_v19 = vpop.f32.mrf.mxu0 }
 0x1d2   : > { %6617 = vst.msk [vmem:[%s7944_s19 + $0x11c] sm:$0x3] %vm6474_vm6, %v3573_v11  ;;  %v775_v8 = vadd.f32 %v8511_v56, %v774_v52  ;;  %v1104_v14 = vadd.f32 %v8511_v56, %v7039_v53  ;;  %6618 = vst.msk [vmem:[%s7944_s19 + $0x11e] sm:$0x3] %vm6474_vm6, %v3574_v9  ;;  %v2507_v40 = vrot.slane %v2479_v60, %v7897_v7 }
 0x1d3   : > { %v2508_v51 = vcombine.high %v2486_v10, %v2486_v10  ;;  %v2509_v37 = vcombine.high %v2493_v5, %v2493_v5  ;;  %v2510_v49 = vcombine.high %v2500_v1, %v2500_v1  ;;  %v3114_v48 = vrot.slane %v2486_v10, %v7906_v25 }
 0x1d4   : > { %v3118_v20 = vrot.slane %v2500_v1, %v7906_v25  ;;  %v3130_v27 = vrot.slane %v2493_v5, %v7906_v25  ;;  %v1682_v2 = vcombine.high %v780_v23, %v780_v23  ;;  %v2511_v30 = vcombine.high %v2507_v40, %v2507_v40 }
 0x1d5   : > { %v3122_v33 = vrot.slane %v2508_v51, %v7906_v25  ;;  %v3126_v42 = vrot.slane %v2510_v49, %v7906_v25  ;;  %v3134_v36 = vrot.slane %v2507_v40, %v7906_v25  ;;  %v3138_v46 = vrot.slane %v2509_v37, %v7906_v25  ;;  %v7042_v51 = vpop.f32.mrf.mxu1 }
 0x1d6   : > { %v3559_v58 = vsel %vm261_vm0, %v8446_v15, %v3114_v48  ;;  %v3560_v59 = vsel %vm261_vm0, %v8456_v61, %v3118_v20  ;;  %v3563_v55 = vsel %vm261_vm0, %v8453_v24, %v3130_v27  ;;  %v3142_v34 = vrot.slane %v2511_v30, %v7906_v25 }
 0x1d7   : > { %v3561_v6 = vsel %vm261_vm0, %v1580_v29, %v3122_v33  ;;  %v3562_v47 = vsel %vm261_vm0, %v1582_v50, %v3126_v42  ;;  %v3564_v57 = vsel %vm261_vm0, %v8463_v26, %v3134_v36  ;;  %6603 = vst.msk [vmem:[%s7944_s19 + $0x100] sm:$0x3] %vm6474_vm6, %v3559_v58  ;;  %6604 = vst.msk [vmem:[%s7944_s19 + $0x102] sm:$0x3] %vm6474_vm6, %v3560_v59  ;;  %v784_v59 = vpop.f32.mrf.mxu0 }
 0x1d8   : > { %6607 = vst.msk [vmem:[%s7944_s19 + $0x108] sm:$0x3] %vm6474_vm6, %v3563_v55  ;;  %v3565_v61 = vsel %vm261_vm0, %v1581_v43, %v3138_v46  ;;  %6605 = vst.msk [vmem:[%s7944_s19 + $0x104] sm:$0x3] %vm6474_vm6, %v3561_v6  ;;  %v1689_v15 = vrot.slane %v780_v23, %v7897_v7  ;;  %v1696_v29 = vrot.slane %v1682_v2, %v7897_v7 }
 0x1d9   : > { %6606 = vst.msk [vmem:[%s7944_s19 + $0x106] sm:$0x3] %vm6474_vm6, %v3562_v47  ;;  %6608 = vst.msk [vmem:[%s7944_s19 + $0x10a] sm:$0x3] %vm6474_vm6, %v3564_v57  ;;  %v1633_v31 = vcombine.high %v775_v8, %v775_v8  ;;  %v3566_v44 = vsel %vm261_vm0, %v1583_v62, %v3142_v34  ;;  %v1640_v24 = vrot.slane %v775_v8, %v7897_v7  ;;  %v1108_v57 = vpop.f32.mrf.mxu1 }
 0x1da   : > { %6609 = vst.msk [vmem:[%s7944_s19 + $0x10c] sm:$0x3] %vm6474_vm6, %v3565_v61  ;;  %v2610_v43 = vcombine.high %v1104_v14, %v1104_v14  ;;  %v2617_v50 = vrot.slane %v1104_v14, %v7897_v7  ;;  %6610 = vst.msk [vmem:[%s7944_s19 + $0x10e] sm:$0x3] %vm6474_vm6, %v3566_v44  ;;  %v1697_v0 = vcombine.high %v1689_v15, %v1689_v15 }
 0x1db   : > { %v1698_v28 = vcombine.high %v1696_v29, %v1696_v29  ;;  %v1705_v4 = vrot.slane %v1689_v15, %v7897_v7  ;;  %v1712_v3 = vrot.slane %v1696_v29, %v7897_v7  ;;  %v1647_v35 = vrot.slane %v1633_v31, %v7897_v7 }
 0x1dc   : > { %v1648_v26 = vcombine.high %v1640_v24, %v1640_v24  ;;  %v8572_v17 = vrot.slane %v1640_v24, %v7897_v7  ;;  %v2624_v62 = vrot.slane %v2610_v43, %v7897_v7  ;;  %v1719_v41 = vrot.slane %v1697_v0, %v7897_v7 }
 0x1dd   : > { %v1726_v12 = vrot.slane %v1698_v28, %v7897_v7  ;;  %v1727_v32 = vcombine.high %v1705_v4, %v1705_v4  ;;  %v1728_v38 = vcombine.high %v1712_v3, %v1712_v3  ;;  %v1649_v22 = vcombine.high %v1647_v35, %v1647_v35 }
 0x1de   : > { %v8578_v13 = vrot.slane %v1647_v35, %v7897_v7  ;;  %v8581_v16 = vrot.slane %v1648_v26, %v7897_v7  ;;  %v1678_v18 = vcombine.high %v8572_v17, %v8572_v17  ;;  %v1729_v54 = vcombine.high %v1719_v41, %v1719_v41 }
 0x1df   : > { %v1730_v63 = vcombine.high %v1726_v12, %v1726_v12  ;;  %v2625_v52 = vcombine.high %v2617_v50, %v2617_v50  ;;  %v2626_v53 = vcombine.high %v2624_v62, %v2624_v62  ;;  %v8586_v21 = vrot.slane %v1649_v22, %v7897_v7 }
 0x1e0   : > { %v1679_v45 = vcombine.high %v8578_v13, %v8578_v13  ;;  %v1680_v11 = vcombine.high %v8581_v16, %v8581_v16  ;;  %v2633_v60 = vrot.slane %v2617_v50, %v7897_v7  ;;  %v2640_v10 = vrot.slane %v2624_v62, %v7897_v7 }
 0x1e1   : > { %v2647_v5 = vrot.slane %v2625_v52, %v7897_v7  ;;  %v2654_v1 = vrot.slane %v2626_v53, %v7897_v7  ;;  %v1099_v9 = vadd.f32 %v8511_v56, %v1098_v39  ;;  %v1681_v23 = vcombine.high %v8586_v21, %v8586_v21 }
 0x1e2   : > { %v2655_v8 = vcombine.high %v2633_v60, %v2633_v60  ;;  %v3210_v14 = vrot.slane %v2633_v60, %v7906_v25  ;;  %v790_v40 = vadd.f32 %v8511_v56, %v7014_v19  ;;  %v2656_v37 = vcombine.high %v2640_v10, %v2640_v10 }
 0x1e3   : > { %v2657_v49 = vcombine.high %v2647_v5, %v2647_v5  ;;  %v2658_v48 = vcombine.high %v2654_v1, %v2654_v1  ;;  %v3214_v20 = vrot.slane %v2647_v5, %v7906_v25  ;;  %v3226_v2 = vrot.slane %v2640_v10, %v7906_v25 }
 0x1e4   : > { %v3218_v27 = vrot.slane %v2655_v8, %v7906_v25  ;;  %v3230_v30 = vrot.slane %v2654_v1, %v7906_v25  ;;  %v3583_v33 = vsel %vm261_vm0, %v1705_v4, %v3210_v14  ;;  %v3234_v36 = vrot.slane %v2656_v37, %v7906_v25 }
 0x1e5   : > { %v3222_v42 = vrot.slane %v2657_v49, %v7906_v25  ;;  %v3238_v46 = vrot.slane %v2658_v48, %v7906_v25  ;;  %v3584_v58 = vsel %vm261_vm0, %v1719_v41, %v3214_v20  ;;  %6643 = vst.msk [vmem:[%s7944_s19 + $0x150] sm:$0x3] %vm6474_vm6, %v3583_v33  ;;  %v3587_v34 = vsel %vm261_vm0, %v1712_v3, %v3226_v2 }
 0x1e6   : > { %v3585_v55 = vsel %vm261_vm0, %v1727_v32, %v3218_v27  ;;  %v3588_v6 = vsel %vm261_vm0, %v1726_v12, %v3230_v30  ;;  %6644 = vst.msk [vmem:[%s7944_s19 + $0x152] sm:$0x3] %vm6474_vm6, %v3584_v58  ;;  %v2561_v47 = vcombine.high %v1099_v9, %v1099_v9  ;;  %v3589_v15 = vsel %vm261_vm0, %v1728_v38, %v3234_v36 }
 0x1e7   : > { %v3586_v61 = vsel %vm261_vm0, %v1729_v54, %v3222_v42  ;;  %v3590_v29 = vsel %vm261_vm0, %v1730_v63, %v3238_v46  ;;  %6645 = vst.msk [vmem:[%s7944_s19 + $0x154] sm:$0x3] %vm6474_vm6, %v3585_v55  ;;  %6647 = vst.msk [vmem:[%s7944_s19 + $0x158] sm:$0x3] %vm6474_vm6, %v3587_v34  ;;  %v2568_v31 = vrot.slane %v1099_v9, %v7897_v7  ;;  %v7017_v55 = vpop.f32.mrf.mxu0 }
 0x1e8   : > { %6648 = vst.msk [vmem:[%s7944_s19 + $0x15a] sm:$0x3] %vm6474_vm6, %v3588_v6  ;;  %6646 = vst.msk [vmem:[%s7944_s19 + $0x156] sm:$0x3] %vm6474_vm6, %v3586_v61  ;;  %v2575_v44 = vrot.slane %v2561_v47, %v7897_v7  ;;  %v1780_v24 = vcombine.high %v790_v40, %v790_v40  ;;  %v1787_v43 = vrot.slane %v790_v40, %v7897_v7 }
 0x1e9   : > { %6649 = vst.msk [vmem:[%s7944_s19 + $0x15c] sm:$0x3] %vm6474_vm6, %v3589_v15  ;;  %6650 = vst.msk [vmem:[%s7944_s19 + $0x15e] sm:$0x3] %vm6474_vm6, %v3590_v29  ;;  %v785_v50 = vadd.f32 %v8511_v56, %v784_v59  ;;  %v2576_v0 = vcombine.high %v2568_v31, %v2568_v31  ;;  %v2584_v28 = vrot.slane %v2568_v31, %v7897_v7 }
 0x1ea   : > { %v1114_v4 = vadd.f32 %v8511_v56, %v7042_v51  ;;  %v1109_v3 = vadd.f32 %v8511_v56, %v1108_v57  ;;  %v2577_v35 = vcombine.high %v2575_v44, %v2575_v44  ;;  %v2591_v26 = vrot.slane %v2575_v44, %v7897_v7 }
 0x1eb   : > { %v1794_v62 = vrot.slane %v1780_v24, %v7897_v7  ;;  %v1795_v41 = vcombine.high %v1787_v43, %v1787_v43  ;;  %v2598_v12 = vrot.slane %v2576_v0, %v7897_v7  ;;  %v2606_v32 = vcombine.high %v2584_v28, %v2584_v28 }
 0x1ec   : > { %v3178_v38 = vrot.slane %v2584_v28, %v7906_v25  ;;  %v8644_v22 = vrot.slane %v1787_v43, %v7897_v7  ;;  %v2605_v39 = vrot.slane %v2577_v35, %v7897_v7  ;;  %v2607_v54 = vcombine.high %v2591_v26, %v2591_v26  ;;  %v794_v35 = vpop.f32.mrf.mxu0 }
 0x1ed   : > { %v3194_v63 = vrot.slane %v2591_v26, %v7906_v25  ;;  %v1796_v52 = vcombine.high %v1794_v62, %v1794_v62  ;;  %v2608_v53 = vcombine.high %v2598_v12, %v2598_v12  ;;  %v3182_v19 = vrot.slane %v2598_v12, %v7906_v25 }
 0x1ee   : > { %v3186_v60 = vrot.slane %v2606_v32, %v7906_v25  ;;  %v3575_v10 = vsel %vm261_vm0, %v8572_v17, %v3178_v38  ;;  %v2609_v5 = vcombine.high %v2605_v39, %v2605_v39  ;;  %v3198_v1 = vrot.slane %v2605_v39, %v7906_v25 }
 0x1ef   : > { %v3202_v9 = vrot.slane %v2607_v54, %v7906_v25  ;;  %v3579_v8 = vsel %vm261_vm0, %v8578_v13, %v3194_v63  ;;  %6635 = vst.msk [vmem:[%s7944_s19 + $0x140] sm:$0x3] %vm6474_vm6, %v3575_v10  ;;  %v3190_v14 = vrot.slane %v2608_v53, %v7906_v25  ;;  %v3576_v40 = vsel %vm261_vm0, %v8581_v16, %v3182_v19 }
 0x1f0   : > { %v3577_v51 = vsel %vm261_vm0, %v1678_v18, %v3186_v60  ;;  %6639 = vst.msk [vmem:[%s7944_s19 + $0x148] sm:$0x3] %vm6474_vm6, %v3579_v8  ;;  %v8668_v37 = vrot.slane %v1794_v62, %v7897_v7  ;;  %v3206_v49 = vrot.slane %v2609_v5, %v7906_v25  ;;  %v3580_v48 = vsel %vm261_vm0, %v8586_v21, %v3198_v1  ;;  %v7052_v1 = vpop.f32.mrf.mxu0 }
 0x1f1   : > { %v3581_v20 = vsel %vm261_vm0, %v1679_v45, %v3202_v9  ;;  %6636 = vst.msk [vmem:[%s7944_s19 + $0x142] sm:$0x3] %vm6474_vm6, %v3576_v40  ;;  %6637 = vst.msk [vmem:[%s7944_s19 + $0x144] sm:$0x3] %vm6474_vm6, %v3577_v51  ;;  %v1817_v17 = vrot.slane %v1795_v41, %v7897_v7  ;;  %v3578_v18 = vsel %vm261_vm0, %v1680_v11, %v3190_v14 }
 0x1f2   : > { %6640 = vst.msk [vmem:[%s7944_s19 + $0x14a] sm:$0x3] %vm6474_vm6, %v3580_v48  ;;  %6641 = vst.msk [vmem:[%s7944_s19 + $0x14c] sm:$0x3] %vm6474_vm6, %v3581_v20  ;;  %v8691_v13 = vrot.slane %v1796_v52, %v7897_v7  ;;  %v1825_v45 = vcombine.high %v8644_v22, %v8644_v22  ;;  %v1826_v27 = vcombine.high %v8668_v37, %v8668_v37 }
 0x1f3   : > { %v3582_v16 = vsel %vm261_vm0, %v1681_v23, %v3206_v49  ;;  %6638 = vst.msk [vmem:[%s7944_s19 + $0x146] sm:$0x3] %vm6474_vm6, %v3578_v18  ;;  %v1827_v11 = vcombine.high %v1817_v17, %v1817_v17  ;;  %v1731_v2 = vcombine.high %v785_v50, %v785_v50  ;;  %v1738_v30 = vrot.slane %v785_v50, %v7897_v7 }
 0x1f4   : > { %6642 = vst.msk [vmem:[%s7944_s19 + $0x14e] sm:$0x3] %vm6474_vm6, %v3582_v16  ;;  %v1828_v33 = vcombine.high %v8691_v13, %v8691_v13  ;;  %v2708_v42 = vcombine.high %v1114_v4, %v1114_v4  ;;  %v2715_v36 = vrot.slane %v1114_v4, %v7897_v7  ;;  %v2659_v46 = vcombine.high %v1109_v3, %v1109_v3 }
 0x1f5   : > { %v1745_v58 = vrot.slane %v1731_v2, %v7897_v7  ;;  %v1746_v21 = vcombine.high %v1738_v30, %v1738_v30  ;;  %v8711_v23 = vrot.slane %v1738_v30, %v7897_v7  ;;  %v2666_v59 = vrot.slane %v1109_v3, %v7897_v7 }
 0x1f6   : > { %v2722_v34 = vrot.slane %v2708_v42, %v7897_v7  ;;  %v2723_v6 = vcombine.high %v2715_v36, %v2715_v36  ;;  %v2731_v47 = vrot.slane %v2715_v36, %v7897_v7  ;;  %v2673_v57 = vrot.slane %v2659_v46, %v7897_v7 }
 0x1f7   : > { %v1747_v61 = vcombine.high %v1745_v58, %v1745_v58  ;;  %v8718_v15 = vrot.slane %v1745_v58, %v7897_v7  ;;  %v8721_v29 = vrot.slane %v1746_v21, %v7897_v7  ;;  %v1776_v31 = vcombine.high %v8711_v23, %v8711_v23 }
 0x1f8   : > { %v2724_v44 = vcombine.high %v2722_v34, %v2722_v34  ;;  %v2738_v24 = vrot.slane %v2722_v34, %v7897_v7  ;;  %v2745_v43 = vrot.slane %v2723_v6, %v7897_v7  ;;  %v2753_v50 = vcombine.high %v2731_v47, %v2731_v47 }
 0x1f9   : > { %v8728_v0 = vrot.slane %v1747_v61, %v7897_v7  ;;  %v1777_v28 = vcombine.high %v8718_v15, %v8718_v15  ;;  %v1778_v4 = vcombine.high %v8721_v29, %v8721_v29  ;;  %v3274_v3 = vrot.slane %v2731_v47, %v7906_v25 }
 0x1fa   : > { %v2752_v26 = vrot.slane %v2724_v44, %v7897_v7  ;;  %v2754_v62 = vcombine.high %v2738_v24, %v2738_v24  ;;  %v2755_v41 = vcombine.high %v2745_v43, %v2745_v43  ;;  %v3278_v12 = vrot.slane %v2745_v43, %v7906_v25 }
 0x1fb   : > { %v1779_v32 = vcombine.high %v8728_v0, %v8728_v0  ;;  %v3282_v38 = vrot.slane %v2753_v50, %v7906_v25  ;;  %v3290_v39 = vrot.slane %v2738_v24, %v7906_v25  ;;  %v3599_v54 = vsel %vm261_vm0, %v8644_v22, %v3274_v3 }
 0x1fc   : > { %v2756_v63 = vcombine.high %v2752_v26, %v2752_v26  ;;  %v3286_v52 = vrot.slane %v2755_v41, %v7906_v25  ;;  %v3294_v53 = vrot.slane %v2752_v26, %v7906_v25  ;;  %v3298_v19 = vrot.slane %v2754_v62, %v7906_v25  ;;  %6675 = vst.msk [vmem:[%s7944_s19 + $0x190] sm:$0x3] %vm6474_vm6, %v3599_v54  ;;  %v7045_v54 = vpop.f32.mrf.mxu1 }
 0x1fd   : > { %v3600_v60 = vsel %vm261_vm0, %v1817_v17, %v3278_v12  ;;  %v3601_v10 = vsel %vm261_vm0, %v1825_v45, %v3282_v38  ;;  %v3603_v22 = vsel %vm261_vm0, %v8668_v37, %v3290_v39  ;;  %v2674_v5 = vcombine.high %v2666_v59, %v2666_v59 }
 0x1fe   : > { %v3302_v9 = vrot.slane %v2756_v63, %v7906_v25  ;;  %v3602_v8 = vsel %vm261_vm0, %v1827_v11, %v3286_v52  ;;  %v3604_v14 = vsel %vm261_vm0, %v8691_v13, %v3294_v53  ;;  %v3605_v40 = vsel %vm261_vm0, %v1826_v27, %v3298_v19  ;;  %6676 = vst.msk [vmem:[%s7944_s19 + $0x192] sm:$0x3] %vm6474_vm6, %v3600_v60 }
 0x1ff   : > { %6677 = vst.msk [vmem:[%s7944_s19 + $0x194] sm:$0x3] %vm6474_vm6, %v3601_v10  ;;  %6679 = vst.msk [vmem:[%s7944_s19 + $0x198] sm:$0x3] %vm6474_vm6, %v3603_v22  ;;  %v2675_v51 = vcombine.high %v2673_v57, %v2673_v57  ;;  %v2682_v37 = vrot.slane %v2666_v59, %v7897_v7  ;;  %v2689_v49 = vrot.slane %v2673_v57, %v7897_v7 }
 0x200   : > { %6678 = vst.msk [vmem:[%s7944_s19 + $0x196] sm:$0x3] %vm6474_vm6, %v3602_v8  ;;  %6680 = vst.msk [vmem:[%s7944_s19 + $0x19a] sm:$0x3] %vm6474_vm6, %v3604_v14  ;;  %v2696_v48 = vrot.slane %v2674_v5, %v7897_v7  ;;  %v3606_v20 = vsel %vm261_vm0, %v1828_v33, %v3302_v9  ;;  %v800_v17 = vadd.f32 %v8511_v56, %v7017_v55 }
 0x201   : > { %6681 = vst.msk [vmem:[%s7944_s19 + $0x19c] sm:$0x3] %vm6474_vm6, %v3605_v40  ;;  %v795_v18 = vadd.f32 %v8511_v56, %v794_v35  ;;  %v3735_v13 = vadd.f32 %v8511_v56, %v7052_v1  ;;  %6682 = vst.msk [vmem:[%s7944_s19 + $0x19e] sm:$0x3] %vm6474_vm6, %v3606_v20  ;;  %v2703_v45 = vrot.slane %v2675_v51, %v7897_v7 }
 0x202   : > { %v2704_v27 = vcombine.high %v2682_v37, %v2682_v37  ;;  %v2705_v16 = vcombine.high %v2689_v49, %v2689_v49  ;;  %v2706_v11 = vcombine.high %v2696_v48, %v2696_v48  ;;  %v3242_v2 = vrot.slane %v2682_v37, %v7906_v25 }
 0x203   : > { %v3246_v30 = vrot.slane %v2696_v48, %v7906_v25  ;;  %v3258_v33 = vrot.slane %v2689_v49, %v7906_v25  ;;  %v1878_v42 = vcombine.high %v800_v17, %v800_v17  ;;  %v2707_v36 = vcombine.high %v2703_v45, %v2703_v45 }
 0x204   : > { %v3250_v46 = vrot.slane %v2704_v27, %v7906_v25  ;;  %v3254_v58 = vrot.slane %v2706_v11, %v7906_v25  ;;  %v3262_v21 = vrot.slane %v2703_v45, %v7906_v25  ;;  %v3266_v59 = vrot.slane %v2705_v16, %v7906_v25 }
 0x205   : > { %v3591_v55 = vsel %vm261_vm0, %v8711_v23, %v3242_v2  ;;  %v3592_v34 = vsel %vm261_vm0, %v8721_v29, %v3246_v30  ;;  %v3595_v6 = vsel %vm261_vm0, %v8718_v15, %v3258_v33  ;;  %v3270_v47 = vrot.slane %v2707_v36, %v7906_v25  ;;  %v1118_v2 = vpop.f32.mrf.mxu1 }
 0x206   : > { %v3593_v57 = vsel %vm261_vm0, %v1776_v31, %v3250_v46  ;;  %v3594_v61 = vsel %vm261_vm0, %v1778_v4, %v3254_v58  ;;  %v3596_v44 = vsel %vm261_vm0, %v8728_v0, %v3262_v21  ;;  %6667 = vst.msk [vmem:[%s7944_s19 + $0x180] sm:$0x3] %vm6474_vm6, %v3591_v55  ;;  %6668 = vst.msk [vmem:[%s7944_s19 + $0x182] sm:$0x3] %vm6474_vm6, %v3592_v34  ;;  %v3729_v0 = vpop.f32.mrf.mxu0 }
 0x207   : > { %6671 = vst.msk [vmem:[%s7944_s19 + $0x188] sm:$0x3] %vm6474_vm6, %v3595_v6  ;;  %v3597_v29 = vsel %vm261_vm0, %v1777_v28, %v3266_v59  ;;  %6669 = vst.msk [vmem:[%s7944_s19 + $0x184] sm:$0x3] %vm6474_vm6, %v3593_v57  ;;  %v1885_v23 = vrot.slane %v800_v17, %v7897_v7  ;;  %v1892_v31 = vrot.slane %v1878_v42, %v7897_v7 }
 0x208   : > { %6670 = vst.msk [vmem:[%s7944_s19 + $0x186] sm:$0x3] %vm6474_vm6, %v3594_v61  ;;  %6672 = vst.msk [vmem:[%s7944_s19 + $0x18a] sm:$0x3] %vm6474_vm6, %v3596_v44  ;;  %v1829_v24 = vcombine.high %v795_v18, %v795_v18  ;;  %v3598_v43 = vsel %vm261_vm0, %v1779_v32, %v3270_v47  ;;  %v1836_v15 = vrot.slane %v795_v18, %v7897_v7  ;;  %v7055_v60 = vpop.f32.mrf.mxu0 }
 0x209   : > { %6673 = vst.msk [vmem:[%s7944_s19 + $0x18c] sm:$0x3] %vm6474_vm6, %v3597_v29  ;;  %v4043_v50 = vcombine.high %v3735_v13, %v3735_v13  ;;  %6674 = vst.msk [vmem:[%s7944_s19 + $0x18e] sm:$0x3] %vm6474_vm6, %v3598_v43  ;;  %v1893_v28 = vcombine.high %v1885_v23, %v1885_v23  ;;  %v1894_v4 = vcombine.high %v1892_v31, %v1892_v31 }
 0x20a   : > { %v8828_v3 = vrot.slane %v1885_v23, %v7897_v7  ;;  %v8831_v35 = vrot.slane %v1892_v31, %v7897_v7  ;;  %v1843_v26 = vrot.slane %v1829_v24, %v7897_v7  ;;  %v1844_v62 = vcombine.high %v1836_v15, %v1836_v15 }
 0x20b   : > { %v4050_v41 = vrot.slane %v3735_v13, %v7897_v7  ;;  %v4057_v12 = vrot.slane %v4043_v50, %v7897_v7  ;;  %v8837_v32 = vrot.slane %v1893_v28, %v7897_v7  ;;  %v8840_v39 = vrot.slane %v1836_v15, %v7897_v7 }
 0x20c   : > { %v1845_v38 = vcombine.high %v1843_v26, %v1843_v26  ;;  %v8843_v63 = vrot.slane %v1894_v4, %v7897_v7  ;;  %v1923_v52 = vcombine.high %v8828_v3, %v8828_v3  ;;  %v1924_v53 = vcombine.high %v8831_v35, %v8831_v35 }
 0x20d   : > { %v8850_v19 = vrot.slane %v1843_v26, %v7897_v7  ;;  %v8853_v10 = vrot.slane %v1844_v62, %v7897_v7  ;;  %v4058_v22 = vcombine.high %v4050_v41, %v4050_v41  ;;  %v4059_v5 = vcombine.high %v4057_v12, %v4057_v12 }
 0x20e   : > { %v3730_v1 = vadd.f32 %v8511_v56, %v3729_v0  ;;  %v1925_v9 = vcombine.high %v8837_v32, %v8837_v32  ;;  %v8859_v8 = vrot.slane %v1845_v38, %v7897_v7  ;;  %v1874_v14 = vcombine.high %v8840_v39, %v8840_v39 }
 0x20f   : > { %v1124_v40 = vadd.f32 %v8511_v56, %v7045_v54  ;;  %v8865_v51 = vrot.slane %v4050_v41, %v7897_v7  ;;  %v8868_v37 = vrot.slane %v4057_v12, %v7897_v7  ;;  %v3745_v48 = vadd.f32 %v8511_v56, %v7055_v60  ;;  %v3739_v12 = vpop.f32.mrf.mxu0 }
 0x210   : > { %v3994_v49 = vcombine.high %v3730_v1, %v3730_v1  ;;  %v1926_v20 = vcombine.high %v8843_v63, %v8843_v63  ;;  %v1875_v17 = vcombine.high %v8850_v19, %v8850_v19  ;;  %v1876_v45 = vcombine.high %v8853_v10, %v8853_v10 }
 0x211   : > { %v2806_v18 = vcombine.high %v1124_v40, %v1124_v40  ;;  %v2813_v13 = vrot.slane %v1124_v40, %v7897_v7  ;;  %v8879_v27 = vrot.slane %v4058_v22, %v7897_v7  ;;  %v8882_v16 = vrot.slane %v4059_v5, %v7897_v7 }
 0x212   : > { %v4001_v11 = vrot.slane %v3730_v1, %v7897_v7  ;;  %v1877_v30 = vcombine.high %v8859_v8, %v8859_v8  ;;  %v4008_v33 = vrot.slane %v3994_v49, %v7897_v7  ;;  %v4088_v46 = vcombine.high %v8865_v51, %v8865_v51 }
 0x213   : > { %v2820_v42 = vrot.slane %v2806_v18, %v7897_v7  ;;  %v2821_v36 = vcombine.high %v2813_v13, %v2813_v13  ;;  %v4089_v58 = vcombine.high %v8868_v37, %v8868_v37  ;;  %v2829_v21 = vrot.slane %v2813_v13, %v7897_v7 }
 0x214   : > { %v4141_v59 = vcombine.high %v3745_v48, %v3745_v48  ;;  %v4148_v6 = vrot.slane %v3745_v48, %v7897_v7  ;;  %v1119_v47 = vadd.f32 %v8511_v56, %v1118_v2  ;;  %v4009_v57 = vcombine.high %v4001_v11, %v4001_v11 }
 0x215   : > { %v2822_v55 = vcombine.high %v2820_v42, %v2820_v42  ;;  %v2836_v34 = vrot.slane %v2820_v42, %v7897_v7  ;;  %v8898_v61 = vrot.slane %v4001_v11, %v7897_v7  ;;  %v2843_v44 = vrot.slane %v2821_v36, %v7897_v7 }
 0x216   : > { %v2851_v29 = vcombine.high %v2829_v21, %v2829_v21  ;;  %v4010_v23 = vcombine.high %v4008_v33, %v4008_v33  ;;  %v3338_v43 = vrot.slane %v2829_v21, %v7906_v25  ;;  %v4155_v4 = vrot.slane %v4141_v59, %v7897_v7 }
 0x217   : > { %v2850_v31 = vrot.slane %v2822_v55, %v7897_v7  ;;  %v2852_v24 = vcombine.high %v2836_v34, %v2836_v34  ;;  %v2853_v15 = vcombine.high %v2843_v44, %v2843_v44  ;;  %v3342_v50 = vrot.slane %v2843_v44, %v7906_v25 }
 0x218   : > { %v3346_v28 = vrot.slane %v2851_v29, %v7906_v25  ;;  %v3354_v0 = vrot.slane %v2836_v34, %v7906_v25  ;;  %v3615_v54 = vsel %vm261_vm0, %v8828_v3, %v3338_v43  ;;  %v4090_v3 = vcombine.high %v8879_v27, %v8879_v27  ;;  %v7080_v43 = vpop.f32.mrf.mxu1 }
 0x219   : > { %v2854_v26 = vcombine.high %v2850_v31, %v2850_v31  ;;  %v3358_v62 = vrot.slane %v2850_v31, %v7906_v25  ;;  %v3362_v41 = vrot.slane %v2852_v24, %v7906_v25  ;;  %v3350_v38 = vrot.slane %v2853_v15, %v7906_v25  ;;  %6707 = vst.msk [vmem:[%s7944_s19 + $0x1d0] sm:$0x3] %vm6474_vm6, %v3615_v54 }
 0x21a   : > { %v3616_v60 = vsel %vm261_vm0, %v8837_v32, %v3342_v50  ;;  %v3617_v22 = vsel %vm261_vm0, %v1923_v52, %v3346_v28  ;;  %v3619_v1 = vsel %vm261_vm0, %v8831_v35, %v3354_v0  ;;  %v8930_v32 = vrot.slane %v4008_v33, %v7897_v7 }
 0x21b   : > { %v3366_v5 = vrot.slane %v2854_v26, %v7906_v25  ;;  %v3620_v40 = vsel %vm261_vm0, %v8843_v63, %v3358_v62  ;;  %v3621_v49 = vsel %vm261_vm0, %v1924_v53, %v3362_v41  ;;  %6708 = vst.msk [vmem:[%s7944_s19 + $0x1d2] sm:$0x3] %vm6474_vm6, %v3616_v60  ;;  %6709 = vst.msk [vmem:[%s7944_s19 + $0x1d4] sm:$0x3] %vm6474_vm6, %v3617_v22  ;;  %v7058_v22 = vpop.f32.mrf.mxu0 }
 0x21c   : > { %v3618_v35 = vsel %vm261_vm0, %v1925_v9, %v3350_v38  ;;  %6711 = vst.msk [vmem:[%s7944_s19 + $0x1d8] sm:$0x3] %vm6474_vm6, %v3619_v1  ;;  %6712 = vst.msk [vmem:[%s7944_s19 + $0x1da] sm:$0x3] %vm6474_vm6, %v3620_v40  ;;  %v3740_v63 = vadd.f32 %v8511_v56, %v3739_v12  ;;  %v4091_v52 = vcombine.high %v8882_v16, %v8882_v16 }
 0x21d   : > { %6713 = vst.msk [vmem:[%s7944_s19 + $0x1dc] sm:$0x3] %vm6474_vm6, %v3621_v49  ;;  %v3622_v53 = vsel %vm261_vm0, %v1926_v20, %v3366_v5  ;;  %6710 = vst.msk [vmem:[%s7944_s19 + $0x1d6] sm:$0x3] %vm6474_vm6, %v3618_v35  ;;  %v2757_v48 = vcombine.high %v1119_v47, %v1119_v47  ;;  %v2764_v18 = vrot.slane %v1119_v47, %v7897_v7  ;;  %v3899_v35 = vpop.f32.mrf.mxu1 }
 0x21e   : > { %v8947_v9 = vrot.slane %v4009_v57, %v7897_v7  ;;  %v4039_v13 = vcombine.high %v8898_v61, %v8898_v61  ;;  %6714 = vst.msk [vmem:[%s7944_s19 + $0x1de] sm:$0x3] %vm6474_vm6, %v3622_v53  ;;  %v4156_v11 = vcombine.high %v4148_v6, %v4148_v6  ;;  %v4157_v2 = vcombine.high %v4155_v4, %v4155_v4 }
 0x21f   : > { %v8954_v33 = vrot.slane %v4010_v23, %v7897_v7  ;;  %v2771_v20 = vrot.slane %v2757_v48, %v7897_v7  ;;  %v2772_v42 = vcombine.high %v2764_v18, %v2764_v18  ;;  %v2780_v36 = vrot.slane %v2764_v18, %v7897_v7 }
 0x220   : > { %v4040_v21 = vcombine.high %v8930_v32, %v8930_v32  ;;  %v8961_v59 = vrot.slane %v4148_v6, %v7897_v7  ;;  %v8964_v55 = vrot.slane %v4155_v4, %v7897_v7  ;;  %v4092_v34 = vcombine.high %v3740_v63, %v3740_v63 }
 0x221   : > { %v2773_v47 = vcombine.high %v2771_v20, %v2771_v20  ;;  %v2787_v57 = vrot.slane %v2771_v20, %v7897_v7  ;;  %v2794_v44 = vrot.slane %v2772_v42, %v7897_v7  ;;  %v2802_v29 = vcombine.high %v2780_v36, %v2780_v36  ;;  %v3749_v20 = vpop.f32.mrf.mxu0 }
 0x222   : > { %v8969_v23 = vrot.slane %v4156_v11, %v7897_v7  ;;  %v8972_v31 = vrot.slane %v4157_v2, %v7897_v7  ;;  %v3306_v6 = vrot.slane %v2780_v36, %v7906_v25  ;;  %v4099_v24 = vrot.slane %v3740_v63, %v7897_v7 }
 0x223   : > { %v2801_v15 = vrot.slane %v2773_v47, %v7897_v7  ;;  %v2803_v50 = vcombine.high %v2787_v57, %v2787_v57  ;;  %v2804_v28 = vcombine.high %v2794_v44, %v2794_v44  ;;  %v3310_v4 = vrot.slane %v2794_v44, %v7906_v25 }
 0x224   : > { %v3314_v26 = vrot.slane %v2802_v29, %v7906_v25  ;;  %v3322_v0 = vrot.slane %v2787_v57, %v7906_v25  ;;  %v3607_v62 = vsel %vm261_vm0, %v8840_v39, %v3306_v6  ;;  %v4106_v41 = vrot.slane %v4092_v34, %v7897_v7  ;;  %v7083_v29 = vpop.f32.mrf.mxu1 }
 0x225   : > { %v2805_v12 = vcombine.high %v2801_v15, %v2801_v15  ;;  %v3318_v38 = vrot.slane %v2804_v28, %v7906_v25  ;;  %v3326_v54 = vrot.slane %v2801_v15, %v7906_v25  ;;  %v3330_v60 = vrot.slane %v2803_v50, %v7906_v25  ;;  %6699 = vst.msk [vmem:[%s7944_s19 + $0x1c0] sm:$0x3] %vm6474_vm6, %v3607_v62 }
 0x226   : > { %v3608_v5 = vsel %vm261_vm0, %v8853_v10, %v3310_v4  ;;  %v3609_v1 = vsel %vm261_vm0, %v1874_v14, %v3314_v26  ;;  %v3611_v40 = vsel %vm261_vm0, %v8850_v19, %v3322_v0  ;;  %v4107_v49 = vcombine.high %v4099_v24, %v4099_v24 }
 0x227   : > { %v3334_v63 = vrot.slane %v2805_v12, %v7906_v25  ;;  %v3610_v53 = vsel %vm261_vm0, %v1876_v45, %v3318_v38  ;;  %v3612_v48 = vsel %vm261_vm0, %v8859_v8, %v3326_v54  ;;  %v3613_v39 = vsel %vm261_vm0, %v1875_v17, %v3330_v60  ;;  %6700 = vst.msk [vmem:[%s7944_s19 + $0x1c2] sm:$0x3] %vm6474_vm6, %v3608_v5 }
 0x228   : > { %6701 = vst.msk [vmem:[%s7944_s19 + $0x1c4] sm:$0x3] %vm6474_vm6, %v3609_v1  ;;  %6703 = vst.msk [vmem:[%s7944_s19 + $0x1c8] sm:$0x3] %vm6474_vm6, %v3611_v40  ;;  %v4041_v10 = vcombine.high %v8947_v9, %v8947_v9  ;;  %v4042_v14 = vcombine.high %v8954_v33, %v8954_v33  ;;  %v4108_v19 = vcombine.high %v4106_v41, %v4106_v41 }
 0x229   : > { %6702 = vst.msk [vmem:[%s7944_s19 + $0x1c6] sm:$0x3] %vm6474_vm6, %v3610_v53  ;;  %6704 = vst.msk [vmem:[%s7944_s19 + $0x1ca] sm:$0x3] %vm6474_vm6, %v3612_v48  ;;  %v9024_v17 = vrot.slane %v4099_v24, %v7897_v7  ;;  %v3614_v45 = vsel %vm261_vm0, %v1877_v30, %v3334_v63  ;;  %v3905_v18 = vadd.f32 %v8511_v56, %v7080_v43 }
 0x22a   : > { %6705 = vst.msk [vmem:[%s7944_s19 + $0x1cc] sm:$0x3] %vm6474_vm6, %v3613_v39  ;;  %v3755_v11 = vadd.f32 %v8511_v56, %v7058_v22  ;;  %v3900_v2 = vadd.f32 %v8511_v56, %v3899_v35  ;;  %v4186_v42 = vcombine.high %v8961_v59, %v8961_v59  ;;  %v4187_v36 = vcombine.high %v8964_v55, %v8964_v55 }
 0x22b   : > { %v4188_v34 = vcombine.high %v8969_v23, %v8969_v23  ;;  %6706 = vst.msk [vmem:[%s7944_s19 + $0x1ce] sm:$0x3] %vm6474_vm6, %v3614_v45  ;;  %v9042_v8 = vrot.slane %v4106_v41, %v7897_v7  ;;  %v4189_v30 = vcombine.high %v8972_v31, %v8972_v31  ;;  %v9047_v47 = vrot.slane %v4107_v49, %v7897_v7 }
 0x22c   : > { %v4971_v57 = vcombine.high %v3905_v18, %v3905_v18  ;;  %v4978_v44 = vrot.slane %v3905_v18, %v7897_v7  ;;  %v9051_v6 = vrot.slane %v4108_v19, %v7897_v7  ;;  %v4239_v24 = vcombine.high %v3755_v11, %v3755_v11 }
 0x22d   : > { %v4922_v43 = vcombine.high %v3900_v2, %v3900_v2  ;;  %v3750_v15 = vadd.f32 %v8511_v56, %v3749_v20  ;;  %v4137_v50 = vcombine.high %v9024_v17, %v9024_v17  ;;  %v4138_v0 = vcombine.high %v9042_v8, %v9042_v8 }
 0x22e   : > { %v4985_v28 = vrot.slane %v4971_v57, %v7897_v7  ;;  %v4986_v4 = vcombine.high %v4978_v44, %v4978_v44  ;;  %v4994_v26 = vrot.slane %v4978_v44, %v7897_v7  ;;  %v4246_v62 = vrot.slane %v3755_v11, %v7897_v7 }
 0x22f   : > { %v4929_v41 = vrot.slane %v3900_v2, %v7897_v7  ;;  %v9063_v12 = vadd.f32 %v8511_v56, %v7083_v29  ;;  %v4253_v1 = vrot.slane %v4239_v24, %v7897_v7  ;;  %v4936_v40 = vrot.slane %v4922_v43, %v7897_v7 }
 0x230   : > { %v4987_v38 = vcombine.high %v4985_v28, %v4985_v28  ;;  %v5001_v54 = vrot.slane %v4985_v28, %v7897_v7  ;;  %v5008_v60 = vrot.slane %v4986_v4, %v7897_v7  ;;  %v5016_v22 = vcombine.high %v4994_v26, %v4994_v26 }
 0x231   : > { %v5741_v5 = vrot.slane %v4994_v26, %v7906_v25  ;;  %v4190_v49 = vcombine.high %v3750_v15, %v3750_v15  ;;  %v4937_v45 = vcombine.high %v4929_v41, %v4929_v41  ;;  %v4254_v24 = vcombine.high %v4246_v62, %v4246_v62 }
 0x232   : > { %v5015_v35 = vrot.slane %v4987_v38, %v7897_v7  ;;  %v5017_v63 = vcombine.high %v5001_v54, %v5001_v54  ;;  %v5018_v53 = vcombine.high %v5008_v60, %v5008_v60  ;;  %v5745_v56 = vrot.slane %v5008_v60, %v7906_v25 }
 0x233   : > { %v5749_v48 = vrot.slane %v5016_v22, %v7906_v25  ;;  %v5757_v39 = vrot.slane %v5001_v54, %v7906_v25  ;;  %v6354_v19 = vsel %vm261_vm0, %v8865_v51, %v5741_v5  ;;  %v4945_v26 = vrot.slane %v4929_v41, %v7897_v7 }
 0x234   : > { %v5019_v18 = vcombine.high %v5015_v35, %v5015_v35  ;;  %v5753_v11 = vrot.slane %v5018_v53, %v7906_v25  ;;  %v5761_v2 = vrot.slane %v5015_v35, %v7906_v25  ;;  %v5765_v20 = vrot.slane %v5017_v63, %v7906_v25  ;;  %6499 = vst.msk [vmem:[%s7944_s19 + $0x30] sm:$0x3] %vm6474_vm6, %v6354_v19 }
 0x235   : > { %v6355_v57 = vsel %vm261_vm0, %v8879_v27, %v5745_v56  ;;  %v6356_v44 = vsel %vm261_vm0, %v4088_v46, %v5749_v48  ;;  %v6358_v29 = vsel %vm261_vm0, %v8868_v37, %v5757_v39  ;;  %v4255_v27 = vcombine.high %v4253_v1, %v4253_v1 }
 0x236   : > { %v5769_v43 = vrot.slane %v5019_v18, %v7906_v25  ;;  %v6357_v28 = vsel %vm261_vm0, %v4090_v3, %v5753_v11  ;;  %v6359_v4 = vsel %vm261_vm0, %v8882_v16, %v5761_v2  ;;  %v6360_v51 = vsel %vm261_vm0, %v4089_v58, %v5765_v20  ;;  %6500 = vst.msk [vmem:[%s7944_s19 + $0x32] sm:$0x3] %vm6474_vm6, %v6355_v57  ;;  %v7061_v11 = vpop.f32.mrf.mxu0 }
 0x237   : > { %6501 = vst.msk [vmem:[%s7944_s19 + $0x34] sm:$0x3] %vm6474_vm6, %v6356_v44  ;;  %6503 = vst.msk [vmem:[%s7944_s19 + $0x38] sm:$0x3] %vm6474_vm6, %v6358_v29  ;;  %v9113_v46 = vrot.slane %v4246_v62, %v7897_v7  ;;  %v4938_v37 = vcombine.high %v4936_v40, %v4936_v40  ;;  %v4197_v3 = vrot.slane %v3750_v15, %v7897_v7 }
 0x238   : > { %6502 = vst.msk [vmem:[%s7944_s19 + $0x36] sm:$0x3] %vm6474_vm6, %v6357_v28  ;;  %6504 = vst.msk [vmem:[%s7944_s19 + $0x3a] sm:$0x3] %vm6474_vm6, %v6359_v4  ;;  %v6361_v58 = vsel %vm261_vm0, %v4091_v52, %v5769_v43  ;;  %v4952_v38 = vrot.slane %v4936_v40, %v7897_v7  ;;  %v4959_v54 = vrot.slane %v4937_v45, %v7897_v7 }
 0x239   : > { %6505 = vst.msk [vmem:[%s7944_s19 + $0x3c] sm:$0x3] %vm6474_vm6, %v6360_v51  ;;  %6506 = vst.msk [vmem:[%s7944_s19 + $0x3e] sm:$0x3] %vm6474_vm6, %v6361_v58  ;;  %v9126_v60 = vrot.slane %v4253_v1, %v7897_v7  ;;  %v9129_v62 = vrot.slane %v4254_v24, %v7897_v7  ;;  %v4966_v15 = vrot.slane %v4938_v37, %v7897_v7  ;;  %v3909_v24 = vpop.f32.mrf.mxu1 }
 0x23a   : > { %v4204_v16 = vrot.slane %v4190_v49, %v7897_v7  ;;  %v4967_v22 = vcombine.high %v4945_v26, %v4945_v26  ;;  %v4968_v52 = vcombine.high %v4952_v38, %v4952_v38  ;;  %v4969_v41 = vcombine.high %v4959_v54, %v4959_v54 }
 0x23b   : > { %v5709_v5 = vrot.slane %v4945_v26, %v7906_v25  ;;  %v4970_v40 = vcombine.high %v4966_v15, %v4966_v15  ;;  %v5713_v35 = vrot.slane %v4959_v54, %v7906_v25  ;;  %v5725_v63 = vrot.slane %v4952_v38, %v7906_v25 }
 0x23c   : > { %v5729_v1 = vrot.slane %v4966_v15, %v7906_v25  ;;  %v5717_v53 = vrot.slane %v4967_v22, %v7906_v25  ;;  %v5721_v49 = vrot.slane %v4969_v41, %v7906_v25  ;;  %v5733_v56 = vrot.slane %v4968_v52, %v7906_v25 }
 0x23d   : > { %v6346_v48 = vsel %vm261_vm0, %v8898_v61, %v5709_v5  ;;  %v5737_v39 = vrot.slane %v4970_v40, %v7906_v25  ;;  %v6347_v19 = vsel %vm261_vm0, %v8947_v9, %v5713_v35  ;;  %v6350_v45 = vsel %vm261_vm0, %v8930_v32, %v5725_v63 }
 0x23e   : > { %v6351_v18 = vsel %vm261_vm0, %v8954_v33, %v5729_v1  ;;  %6491 = vst.msk [vmem:[%s7944_s19 + $0x20] sm:$0x3] %vm6474_vm6, %v6346_v48  ;;  %v9152_v2 = vrot.slane %v4255_v27, %v7897_v7  ;;  %v6348_v20 = vsel %vm261_vm0, %v4039_v13, %v5717_v53  ;;  %v6349_v57 = vsel %vm261_vm0, %v4041_v10, %v5721_v49 }
 0x23f   : > { %v6352_v44 = vsel %vm261_vm0, %v4040_v21, %v5733_v56  ;;  %6492 = vst.msk [vmem:[%s7944_s19 + $0x22] sm:$0x3] %vm6474_vm6, %v6347_v19  ;;  %6495 = vst.msk [vmem:[%s7944_s19 + $0x28] sm:$0x3] %vm6474_vm6, %v6350_v45  ;;  %v4139_v61 = vcombine.high %v9047_v47, %v9047_v47  ;;  %v6353_v9 = vsel %vm261_vm0, %v4042_v14, %v5737_v39  ;;  %v9198_v14 = vld [vmem:[%s10286_s2] ss:$0 sm:$0xff]  ;;  %v3759_v45 = vpop.f32.mrf.mxu0 }
 0x240   : > { %6496 = vst.msk [vmem:[%s7944_s19 + $0x2a] sm:$0x3] %vm6474_vm6, %v6351_v18  ;;  %6493 = vst.msk [vmem:[%s7944_s19 + $0x24] sm:$0x3] %vm6474_vm6, %v6348_v20  ;;  %v4205_v32 = vcombine.high %v4197_v3, %v4197_v3  ;;  %v9185_v13 = vrot.slane %v4197_v3, %v7897_v7  ;;  %v4140_v21 = vcombine.high %v9051_v6, %v9051_v6 }
 0x241   : > { %6494 = vst.msk [vmem:[%s7944_s19 + $0x26] sm:$0x3] %vm6474_vm6, %v6349_v57  ;;  %6497 = vst.msk [vmem:[%s7944_s19 + $0x2c] sm:$0x3] %vm6474_vm6, %v6352_v44  ;;  %v5069_v33 = vcombine.high %v9063_v12, %v9063_v12  ;;  %v5076_v10 = vrot.slane %v9063_v12, %v7897_v7  ;;  %v3765_v29 = vadd.f32 %v9198_v14, %v7061_v11 }
 0x242   : > { %6498 = vst.msk [vmem:[%s7944_s19 + $0x2e] sm:$0x3] %vm6474_vm6, %v6353_v9  ;;  %v4284_v43 = vcombine.high %v9113_v46, %v9113_v46  ;;  %v4285_v28 = vcombine.high %v9126_v60, %v9126_v60  ;;  %v4286_v4 = vcombine.high %v9129_v62, %v9129_v62  ;;  %v4206_v51 = vcombine.high %v4204_v16, %v4204_v16 }
 0x243   : > { %v4287_v12 = vcombine.high %v9152_v2, %v9152_v2  ;;  %v5083_v27 = vrot.slane %v5069_v33, %v7897_v7  ;;  %v5084_v37 = vcombine.high %v5076_v10, %v5076_v10  ;;  %v5092_v3 = vrot.slane %v5076_v10, %v7897_v7  ;;  %v7086_v10 = vpop.f32.mrf.mxu1 }
 0x244   : > { %v9212_v58 = vrot.slane %v4204_v16, %v7897_v7  ;;  %v9215_v26 = vrot.slane %v4205_v32, %v7897_v7  ;;  %v4235_v38 = vcombine.high %v9185_v13, %v9185_v13  ;;  %v3910_v54 = vadd.f32 %v9198_v14, %v3909_v24 }
 0x245   : > { %v5085_v15 = vcombine.high %v5083_v27, %v5083_v27  ;;  %v5099_v22 = vrot.slane %v5083_v27, %v7897_v7  ;;  %v5106_v52 = vrot.slane %v5084_v37, %v7897_v7  ;;  %v5114_v41 = vcombine.high %v5092_v3, %v5092_v3 }
 0x246   : > { %v9223_v5 = vrot.slane %v4206_v51, %v7897_v7  ;;  %v5805_v16 = vrot.slane %v5092_v3, %v7906_v25  ;;  %v4337_v40 = vcombine.high %v3765_v29, %v3765_v29  ;;  %v9227_v35 = vrot.slane %v3765_v29, %v7897_v7 }
 0x247   : > { %v5113_v63 = vrot.slane %v5085_v15, %v7897_v7  ;;  %v5115_v1 = vcombine.high %v5099_v22, %v5099_v22  ;;  %v5116_v53 = vcombine.high %v5106_v52, %v5106_v52  ;;  %v5809_v49 = vrot.slane %v5106_v52, %v7906_v25 }
 0x248   : > { %v5813_v56 = vrot.slane %v5114_v41, %v7906_v25  ;;  %v5821_v48 = vrot.slane %v5099_v22, %v7906_v25  ;;  %v6370_v39 = vsel %vm261_vm0, %v8961_v59, %v5805_v16  ;;  %v5020_v19 = vcombine.high %v3910_v54, %v3910_v54 }
 0x249   : > { %v5117_v18 = vcombine.high %v5113_v63, %v5113_v63  ;;  %v5817_v11 = vrot.slane %v5116_v53, %v7906_v25  ;;  %v5825_v20 = vrot.slane %v5113_v63, %v7906_v25  ;;  %v5829_v57 = vrot.slane %v5115_v1, %v7906_v25  ;;  %6531 = vst.msk [vmem:[%s7944_s19 + $0x70] sm:$0x3] %vm6474_vm6, %v6370_v39 }
 0x24a   : > { %v6371_v44 = vsel %vm261_vm0, %v8969_v23, %v5809_v49  ;;  %v6372_v9 = vsel %vm261_vm0, %v4186_v42, %v5813_v56  ;;  %v6374_v32 = vsel %vm261_vm0, %v8964_v55, %v5821_v48  ;;  %v4351_v33 = vrot.slane %v4337_v40, %v7897_v7 }
 0x24b   : > { %v5833_v29 = vrot.slane %v5117_v18, %v7906_v25  ;;  %v6373_v24 = vsel %vm261_vm0, %v4188_v34, %v5817_v11  ;;  %v6375_v51 = vsel %vm261_vm0, %v8972_v31, %v5825_v20  ;;  %v6376_v59 = vsel %vm261_vm0, %v4187_v36, %v5829_v57  ;;  %6532 = vst.msk [vmem:[%s7944_s19 + $0x72] sm:$0x3] %vm6474_vm6, %v6371_v44  ;;  %v7064_v34 = vpop.f32.mrf.mxu0 }
 0x24c   : > { %6533 = vst.msk [vmem:[%s7944_s19 + $0x74] sm:$0x3] %vm6474_vm6, %v6372_v9  ;;  %6535 = vst.msk [vmem:[%s7944_s19 + $0x78] sm:$0x3] %vm6474_vm6, %v6374_v32  ;;  %v4236_v23 = vcombine.high %v9212_v58, %v9212_v58  ;;  %v4237_v42 = vcombine.high %v9215_v26, %v9215_v26  ;;  %v4352_v55 = vcombine.high %v9227_v35, %v9227_v35 }
 0x24d   : > { %6534 = vst.msk [vmem:[%s7944_s19 + $0x76] sm:$0x3] %vm6474_vm6, %v6373_v24  ;;  %6536 = vst.msk [vmem:[%s7944_s19 + $0x7a] sm:$0x3] %vm6474_vm6, %v6375_v51  ;;  %v5027_v36 = vrot.slane %v3910_v54, %v7897_v7  ;;  %v6377_v27 = vsel %vm261_vm0, %v4189_v30, %v5833_v29  ;;  %v5034_v37 = vrot.slane %v5020_v19, %v7897_v7 }
 0x24e   : > { %6537 = vst.msk [vmem:[%s7944_s19 + $0x7c] sm:$0x3] %vm6474_vm6, %v6376_v59  ;;  %v3760_v3 = vadd.f32 %v9198_v14, %v3759_v45  ;;  %v3925_v15 = vadd.f32 %v9198_v14, %v7086_v10  ;;  %6538 = vst.msk [vmem:[%s7944_s19 + $0x7e] sm:$0x3] %vm6474_vm6, %v6377_v27  ;;  %v4353_v22 = vcombine.high %v4351_v33, %v4351_v33 }
 0x24f   : > { %v9290_v52 = vrot.slane %v9227_v35, %v7897_v7  ;;  %v5035_v54 = vcombine.high %v5027_v36, %v5027_v36  ;;  %v5043_v41 = vrot.slane %v5027_v36, %v7897_v7  ;;  %v9294_v31 = vrot.slane %v4351_v33, %v7897_v7 }
 0x250   : > { %v5036_v30 = vcombine.high %v5034_v37, %v5034_v37  ;;  %v5050_v16 = vrot.slane %v5034_v37, %v7897_v7  ;;  %v3775_v40 = vadd.f32 %v9198_v14, %v7064_v34  ;;  %v4288_v49 = vcombine.high %v3760_v3, %v3760_v3 }
 0x251   : > { %v5057_v63 = vrot.slane %v5035_v54, %v7897_v7  ;;  %v5065_v1 = vcombine.high %v5043_v41, %v5043_v41  ;;  %v5773_v53 = vrot.slane %v5043_v41, %v7906_v25  ;;  %v5167_v39 = vcombine.high %v3925_v15, %v3925_v15 }
 0x252   : > { %v5064_v35 = vrot.slane %v5036_v30, %v7897_v7  ;;  %v5066_v56 = vcombine.high %v5050_v16, %v5050_v16  ;;  %v5789_v48 = vrot.slane %v5050_v16, %v7906_v25  ;;  %v9322_v29 = vrot.slane %v3760_v3, %v7897_v7 }
 0x253   : > { %v5067_v19 = vcombine.high %v5057_v63, %v5057_v63  ;;  %v5777_v45 = vrot.slane %v5057_v63, %v7906_v25  ;;  %v5781_v18 = vrot.slane %v5065_v1, %v7906_v25  ;;  %v6362_v11 = vsel %vm261_vm0, %v9024_v17, %v5773_v53 }
 0x254   : > { %v5068_v20 = vcombine.high %v5064_v35, %v5064_v35  ;;  %v5793_v57 = vrot.slane %v5064_v35, %v7906_v25  ;;  %v5797_v44 = vrot.slane %v5066_v56, %v7906_v25  ;;  %v6366_v9 = vsel %vm261_vm0, %v9042_v8, %v5789_v48  ;;  %6523 = vst.msk [vmem:[%s7944_s19 + $0x60] sm:$0x3] %vm6474_vm6, %v6362_v11 }
 0x255   : > { %v5785_v32 = vrot.slane %v5067_v19, %v7906_v25  ;;  %v6363_v33 = vsel %vm261_vm0, %v9047_v47, %v5777_v45  ;;  %v6364_v10 = vsel %vm261_vm0, %v4137_v50, %v5781_v18  ;;  %6527 = vst.msk [vmem:[%s7944_s19 + $0x68] sm:$0x3] %vm6474_vm6, %v6366_v9  ;;  %v4302_v17 = vrot.slane %v4288_v49, %v7897_v7  ;;  %v3919_v50 = vpop.f32.mrf.mxu1 }
 0x256   : > { %v5801_v24 = vrot.slane %v5068_v20, %v7906_v25  ;;  %v6367_v51 = vsel %vm261_vm0, %v9051_v6, %v5793_v57  ;;  %v6368_v59 = vsel %vm261_vm0, %v4138_v0, %v5797_v44  ;;  %6524 = vst.msk [vmem:[%s7944_s19 + $0x62] sm:$0x3] %vm6474_vm6, %v6363_v33  ;;  %6525 = vst.msk [vmem:[%s7944_s19 + $0x64] sm:$0x3] %vm6474_vm6, %v6364_v10 }
 0x257   : > { %v4238_v36 = vcombine.high %v9223_v5, %v9223_v5  ;;  %v9339_v34 = vrot.slane %v4352_v55, %v7897_v7  ;;  %v9342_v27 = vrot.slane %v4353_v22, %v7897_v7  ;;  %v6365_v8 = vsel %vm261_vm0, %v4139_v61, %v5785_v32  ;;  %6528 = vst.msk [vmem:[%s7944_s19 + $0x6a] sm:$0x3] %vm6474_vm6, %v6367_v51 }
 0x258   : > { %6529 = vst.msk [vmem:[%s7944_s19 + $0x6c] sm:$0x3] %vm6474_vm6, %v6368_v59  ;;  %v4382_v0 = vcombine.high %v9290_v52, %v9290_v52  ;;  %v6369_v55 = vsel %vm261_vm0, %v4140_v21, %v5801_v24  ;;  %6526 = vst.msk [vmem:[%s7944_s19 + $0x66] sm:$0x3] %vm6474_vm6, %v6365_v8  ;;  %v5174_v37 = vrot.slane %v3925_v15, %v7897_v7 }
 0x259   : > { %v5181_v47 = vrot.slane %v5167_v39, %v7897_v7  ;;  %v4383_v61 = vcombine.high %v9294_v31, %v9294_v31  ;;  %6530 = vst.msk [vmem:[%s7944_s19 + $0x6e] sm:$0x3] %vm6474_vm6, %v6369_v55  ;;  %v4303_v3 = vcombine.high %v9322_v29, %v9322_v29  ;;  %v4435_v22 = vcombine.high %v3775_v40, %v3775_v40 }
 0x25a   : > { %v3920_v54 = vadd.f32 %v9198_v14, %v3919_v50  ;;  %v4304_v6 = vcombine.high %v4302_v17, %v4302_v17  ;;  %v5182_v41 = vcombine.high %v5174_v37, %v5174_v37  ;;  %v5190_v30 = vrot.slane %v5174_v37, %v7897_v7  ;;  %v7089_v50 = vpop.f32.mrf.mxu1 }
 0x25b   : > { %v5183_v21 = vcombine.high %v5181_v47, %v5181_v47  ;;  %v9372_v15 = vrot.slane %v9322_v29, %v7897_v7  ;;  %v9375_v16 = vrot.slane %v4302_v17, %v7897_v7  ;;  %v5197_v63 = vrot.slane %v5181_v47, %v7897_v7 }
 0x25c   : > { %v9379_v1 = vrot.slane %v3775_v40, %v7897_v7  ;;  %v5204_v53 = vrot.slane %v5182_v41, %v7897_v7  ;;  %v5212_v35 = vcombine.high %v5190_v30, %v5190_v30  ;;  %v5869_v56 = vrot.slane %v5190_v30, %v7906_v25 }
 0x25d   : > { %v5211_v49 = vrot.slane %v5183_v21, %v7897_v7  ;;  %v5213_v48 = vcombine.high %v5197_v63, %v5197_v63  ;;  %v5885_v39 = vrot.slane %v5197_v63, %v7906_v25  ;;  %v9386_v19 = vrot.slane %v4435_v22, %v7897_v7 }
 0x25e   : > { %v5118_v45 = vcombine.high %v3920_v54, %v3920_v54  ;;  %v5214_v18 = vcombine.high %v5204_v53, %v5204_v53  ;;  %v5873_v40 = vrot.slane %v5204_v53, %v7906_v25  ;;  %v5877_v20 = vrot.slane %v5212_v35, %v7906_v25 }
 0x25f   : > { %v5215_v11 = vcombine.high %v5211_v49, %v5211_v49  ;;  %v5889_v57 = vrot.slane %v5211_v49, %v7906_v25  ;;  %v5893_v44 = vrot.slane %v5213_v48, %v7906_v25  ;;  %v6386_v9 = vsel %vm261_vm0, %v9113_v46, %v5869_v56 }
 0x260   : > { %v6390_v32 = vsel %vm261_vm0, %v9126_v60, %v5885_v39  ;;  %v5881_v33 = vrot.slane %v5214_v18, %v7906_v25  ;;  %v6387_v29 = vsel %vm261_vm0, %v9129_v62, %v5873_v40  ;;  %v6388_v24 = vsel %vm261_vm0, %v4284_v43, %v5877_v20  ;;  %6563 = vst.msk [vmem:[%s7944_s19 + $0xb0] sm:$0x3] %vm6474_vm6, %v6386_v9  ;;  %v3769_v43 = vpop.f32.mrf.mxu0 }
 0x261   : > { %v5897_v10 = vrot.slane %v5215_v11, %v7906_v25  ;;  %6567 = vst.msk [vmem:[%s7944_s19 + $0xb8] sm:$0x3] %vm6474_vm6, %v6390_v32  ;;  %v4384_v51 = vcombine.high %v9339_v34, %v9339_v34  ;;  %v4385_v59 = vcombine.high %v9342_v27, %v9342_v27  ;;  %v6391_v17 = vsel %vm261_vm0, %v9152_v2, %v5889_v57 }
 0x262   : > { %v6392_v46 = vsel %vm261_vm0, %v4285_v28, %v5893_v44  ;;  %6564 = vst.msk [vmem:[%s7944_s19 + $0xb2] sm:$0x3] %vm6474_vm6, %v6387_v29  ;;  %6565 = vst.msk [vmem:[%s7944_s19 + $0xb4] sm:$0x3] %vm6474_vm6, %v6388_v24  ;;  %v9423_v8 = vrot.slane %v4303_v3, %v7897_v7  ;;  %v9426_v55 = vrot.slane %v4304_v6, %v7897_v7 }
 0x263   : > { %v6389_v37 = vsel %vm261_vm0, %v4286_v4, %v5881_v33  ;;  %v6393_v60 = vsel %vm261_vm0, %v4287_v12, %v5897_v10  ;;  %6568 = vst.msk [vmem:[%s7944_s19 + $0xba] sm:$0x3] %vm6474_vm6, %v6391_v17  ;;  %6569 = vst.msk [vmem:[%s7944_s19 + $0xbc] sm:$0x3] %vm6474_vm6, %v6392_v46  ;;  %v4333_v28 = vcombine.high %v9372_v15, %v9372_v15 }
 0x264   : > { %v4334_v47 = vcombine.high %v9375_v16, %v9375_v16  ;;  %6566 = vst.msk [vmem:[%s7944_s19 + $0xb6] sm:$0x3] %vm6474_vm6, %v6389_v37  ;;  %6570 = vst.msk [vmem:[%s7944_s19 + $0xbe] sm:$0x3] %vm6474_vm6, %v6393_v60  ;;  %v5125_v62 = vrot.slane %v3920_v54, %v7897_v7  ;;  %v5132_v2 = vrot.slane %v5118_v45, %v7897_v7 }
 0x265   : > { %v4450_v4 = vcombine.high %v9379_v1, %v9379_v1  ;;  %v4451_v12 = vcombine.high %v9386_v19, %v9386_v19  ;;  %v3770_v3 = vadd.f32 %v9198_v14, %v3769_v43  ;;  %v3935_v22 = vadd.f32 %v9198_v14, %v7089_v50 }
 0x266   : > { %v5133_v6 = vcombine.high %v5125_v62, %v5125_v62  ;;  %v5134_v41 = vcombine.high %v5132_v2, %v5132_v2  ;;  %v5141_v21 = vrot.slane %v5125_v62, %v7897_v7  ;;  %v5148_v30 = vrot.slane %v5132_v2, %v7897_v7 }
 0x267   : > { %v9460_v54 = vrot.slane %v9379_v1, %v7897_v7  ;;  %v4386_v63 = vcombine.high %v3770_v3, %v3770_v3  ;;  %v9463_v53 = vrot.slane %v3770_v3, %v7897_v7  ;;  %v5265_v49 = vcombine.high %v3935_v22, %v3935_v22 }
 0x268   : > { %v5155_v35 = vrot.slane %v5133_v6, %v7897_v7  ;;  %v5162_v56 = vrot.slane %v5134_v41, %v7897_v7  ;;  %v5163_v48 = vcombine.high %v5141_v21, %v5141_v21  ;;  %v5164_v39 = vcombine.high %v5148_v30, %v5148_v30 }
 0x269   : > { %v5837_v45 = vrot.slane %v5141_v21, %v7906_v25  ;;  %v5853_v18 = vrot.slane %v5148_v30, %v7906_v25  ;;  %v9470_v1 = vrot.slane %v4386_v63, %v7897_v7  ;;  %v5272_v11 = vrot.slane %v3935_v22, %v7897_v7 }
 0x26a   : > { %v5165_v40 = vcombine.high %v5155_v35, %v5155_v35  ;;  %v5166_v20 = vcombine.high %v5162_v56, %v5162_v56  ;;  %v5841_v57 = vrot.slane %v5155_v35, %v7906_v25  ;;  %v5845_v44 = vrot.slane %v5163_v48, %v7906_v25  ;;  %v3929_v35 = vpop.f32.mrf.mxu1 }
 0x26b   : > { %v5857_v9 = vrot.slane %v5162_v56, %v7906_v25  ;;  %v5861_v32 = vrot.slane %v5164_v39, %v7906_v25  ;;  %v6378_v33 = vsel %vm261_vm0, %v9185_v13, %v5837_v45  ;;  %v6382_v10 = vsel %vm261_vm0, %v9212_v58, %v5853_v18 }
 0x26c   : > { %v5849_v29 = vrot.slane %v5165_v40, %v7906_v25  ;;  %v5865_v24 = vrot.slane %v5166_v20, %v7906_v25  ;;  %v6379_v17 = vsel %vm261_vm0, %v9215_v26, %v5841_v57  ;;  %v6380_v46 = vsel %vm261_vm0, %v4235_v38, %v5845_v44  ;;  %6555 = vst.msk [vmem:[%s7944_s19 + $0xa0] sm:$0x3] %vm6474_vm6, %v6378_v33  ;;  %v7067_v38 = vpop.f32.mrf.mxu0 }
 0x26d   : > { %6559 = vst.msk [vmem:[%s7944_s19 + $0xa8] sm:$0x3] %vm6474_vm6, %v6382_v10  ;;  %v4335_v43 = vcombine.high %v9423_v8, %v9423_v8  ;;  %v4336_v50 = vcombine.high %v9426_v55, %v9426_v55  ;;  %v6383_v37 = vsel %vm261_vm0, %v9223_v5, %v5857_v9  ;;  %v6384_v13 = vsel %vm261_vm0, %v4236_v23, %v5861_v32 }
 0x26e   : > { %6556 = vst.msk [vmem:[%s7944_s19 + $0xa2] sm:$0x3] %vm6474_vm6, %v6379_v17  ;;  %6557 = vst.msk [vmem:[%s7944_s19 + $0xa4] sm:$0x3] %vm6474_vm6, %v6380_v46  ;;  %v9509_v60 = vrot.slane %v9386_v19, %v7897_v7  ;;  %v9512_v62 = vrot.slane %v4450_v4, %v7897_v7  ;;  %v6381_v2 = vsel %vm261_vm0, %v4237_v42, %v5849_v29  ;;  %v3779_v29 = vpop.f32.mrf.mxu0 }
 0x26f   : > { %v6385_v58 = vsel %vm261_vm0, %v4238_v36, %v5865_v24  ;;  %6560 = vst.msk [vmem:[%s7944_s19 + $0xaa] sm:$0x3] %vm6474_vm6, %v6383_v37  ;;  %6561 = vst.msk [vmem:[%s7944_s19 + $0xac] sm:$0x3] %vm6474_vm6, %v6384_v13  ;;  %v9527_v23 = vrot.slane %v4451_v12, %v7897_v7  ;;  %v4480_v19 = vcombine.high %v9460_v54, %v9460_v54  ;;  %v7092_v24 = vpop.f32.mrf.mxu1 }
 0x270   : > { %6558 = vst.msk [vmem:[%s7944_s19 + $0xa6] sm:$0x3] %vm6474_vm6, %v6381_v2  ;;  %6562 = vst.msk [vmem:[%s7944_s19 + $0xae] sm:$0x3] %vm6474_vm6, %v6385_v58  ;;  %v5279_v26 = vrot.slane %v5265_v49, %v7897_v7  ;;  %v5280_v42 = vcombine.high %v5272_v11, %v5272_v11  ;;  %v4401_v5 = vcombine.high %v9463_v53, %v9463_v53 }
 0x271   : > { %v4402_v36 = vcombine.high %v9470_v1, %v9470_v1  ;;  %v5288_v4 = vrot.slane %v5272_v11, %v7897_v7  ;;  %v3785_v12 = vadd.f32 %v9198_v14, %v7067_v38  ;;  %v9544_v3 = vrot.slane %v9463_v53, %v7897_v7 }
 0x272   : > { %v5281_v22 = vcombine.high %v5279_v26, %v5279_v26  ;;  %v5295_v6 = vrot.slane %v5279_v26, %v7897_v7  ;;  %v5302_v41 = vrot.slane %v5280_v42, %v7897_v7  ;;  %v9550_v21 = vrot.slane %v9470_v1, %v7897_v7 }
 0x273   : > { %v5310_v30 = vcombine.high %v5288_v4, %v5288_v4  ;;  %v5933_v63 = vrot.slane %v5288_v4, %v7906_v25  ;;  %v4533_v49 = vcombine.high %v3785_v12, %v3785_v12  ;;  %v4540_v11 = vrot.slane %v3785_v12, %v7897_v7 }
 0x274   : > { %v5309_v56 = vrot.slane %v5281_v22, %v7897_v7  ;;  %v5311_v48 = vcombine.high %v5295_v6, %v5295_v6  ;;  %v5312_v53 = vcombine.high %v5302_v41, %v5302_v41  ;;  %v5937_v39 = vrot.slane %v5302_v41, %v7906_v25 }
 0x275   : > { %v5941_v45 = vrot.slane %v5310_v30, %v7906_v25  ;;  %v5949_v18 = vrot.slane %v5295_v6, %v7906_v25  ;;  %v6402_v1 = vsel %vm261_vm0, %v9290_v52, %v5933_v63  ;;  %v4547_v10 = vrot.slane %v4533_v49, %v7897_v7 }
 0x276   : > { %v5313_v40 = vcombine.high %v5309_v56, %v5309_v56  ;;  %v5945_v20 = vrot.slane %v5312_v53, %v7906_v25  ;;  %v5953_v57 = vrot.slane %v5309_v56, %v7906_v25  ;;  %v5957_v44 = vrot.slane %v5311_v48, %v7906_v25  ;;  %6595 = vst.msk [vmem:[%s7944_s19 + $0xf0] sm:$0x3] %vm6474_vm6, %v6402_v1 }
 0x277   : > { %v6403_v9 = vsel %vm261_vm0, %v9339_v34, %v5937_v39  ;;  %v6404_v32 = vsel %vm261_vm0, %v4382_v0, %v5941_v45  ;;  %v6406_v33 = vsel %vm261_vm0, %v9294_v31, %v5949_v18  ;;  %v4481_v34 = vcombine.high %v9509_v60, %v9509_v60 }
 0x278   : > { %v5961_v17 = vrot.slane %v5313_v40, %v7906_v25  ;;  %v6405_v46 = vsel %vm261_vm0, %v4384_v51, %v5945_v20  ;;  %v6407_v52 = vsel %vm261_vm0, %v9342_v27, %v5953_v57  ;;  %v6408_v0 = vsel %vm261_vm0, %v4383_v61, %v5957_v44  ;;  %6596 = vst.msk [vmem:[%s7944_s19 + $0xf2] sm:$0x3] %vm6474_vm6, %v6403_v9 }
 0x279   : > { %6597 = vst.msk [vmem:[%s7944_s19 + $0xf4] sm:$0x3] %vm6474_vm6, %v6404_v32  ;;  %6599 = vst.msk [vmem:[%s7944_s19 + $0xf8] sm:$0x3] %vm6474_vm6, %v6406_v33  ;;  %v4482_v51 = vcombine.high %v9512_v62, %v9512_v62  ;;  %v9596_v37 = vrot.slane %v4401_v5, %v7897_v7  ;;  %v9599_v31 = vrot.slane %v4402_v36, %v7897_v7 }
 0x27a   : > { %6598 = vst.msk [vmem:[%s7944_s19 + $0xf6] sm:$0x3] %vm6474_vm6, %v6405_v46  ;;  %6600 = vst.msk [vmem:[%s7944_s19 + $0xfa] sm:$0x3] %vm6474_vm6, %v6407_v52  ;;  %v6409_v61 = vsel %vm261_vm0, %v4385_v59, %v5961_v17  ;;  %v3930_v13 = vadd.f32 %v9198_v14, %v3929_v35  ;;  %v3780_v38 = vadd.f32 %v9198_v14, %v3779_v29  ;;  %v7070_v29 = vpop.f32.mrf.mxu0 }
 0x27b   : > { %6601 = vst.msk [vmem:[%s7944_s19 + $0xfc] sm:$0x3] %vm6474_vm6, %v6408_v0  ;;  %v3945_v2 = vadd.f32 %v9198_v14, %v7092_v24  ;;  %v4483_v58 = vcombine.high %v9527_v23, %v9527_v23  ;;  %6602 = vst.msk [vmem:[%s7944_s19 + $0xfe] sm:$0x3] %vm6474_vm6, %v6409_v61  ;;  %v4548_v26 = vcombine.high %v4540_v11, %v4540_v11 }
 0x27c   : > { %v4549_v42 = vcombine.high %v4547_v10, %v4547_v10  ;;  %v9619_v5 = vrot.slane %v4540_v11, %v7897_v7  ;;  %v4431_v27 = vcombine.high %v9544_v3, %v9544_v3  ;;  %v4432_v59 = vcombine.high %v9550_v21, %v9550_v21 }
 0x27d   : > { %v5216_v36 = vcombine.high %v3930_v13, %v3930_v13  ;;  %v5223_v4 = vrot.slane %v3930_v13, %v7897_v7  ;;  %v4433_v12 = vcombine.high %v9596_v37, %v9596_v37  ;;  %v4434_v22 = vcombine.high %v9599_v31, %v9599_v31 }
 0x27e   : > { %v4484_v6 = vcombine.high %v3780_v38, %v3780_v38  ;;  %v5363_v41 = vcombine.high %v3945_v2, %v3945_v2  ;;  %v9631_v30 = vrot.slane %v4547_v10, %v7897_v7  ;;  %v9636_v56 = vrot.slane %v4548_v26, %v7897_v7 }
 0x27f   : > { %v5230_v63 = vrot.slane %v5216_v36, %v7897_v7  ;;  %v5231_v49 = vcombine.high %v5223_v4, %v5223_v4  ;;  %v5239_v35 = vrot.slane %v5223_v4, %v7897_v7  ;;  %v9639_v48 = vrot.slane %v4549_v42, %v7897_v7 }
 0x280   : > { %v4578_v53 = vcombine.high %v9619_v5, %v9619_v5  ;;  %v5370_v39 = vrot.slane %v3945_v2, %v7897_v7  ;;  %v9648_v20 = vrot.slane %v3780_v38, %v7897_v7  ;;  %v9651_v57 = vrot.slane %v4484_v6, %v7897_v7 }
 0x281   : > { %v5232_v45 = vcombine.high %v5230_v63, %v5230_v63  ;;  %v5246_v18 = vrot.slane %v5230_v63, %v7897_v7  ;;  %v5253_v1 = vrot.slane %v5231_v49, %v7897_v7  ;;  %v5261_v11 = vcombine.high %v5239_v35, %v5239_v35 }
 0x282   : > { %v5901_v40 = vrot.slane %v5239_v35, %v7906_v25  ;;  %v5377_v44 = vrot.slane %v5363_v41, %v7897_v7  ;;  %v5378_v52 = vcombine.high %v5370_v39, %v5370_v39  ;;  %v9674_v36 = vadd.f32 %v9198_v14, %v7070_v29 }
 0x283   : > { %v5260_v9 = vrot.slane %v5232_v45, %v7897_v7  ;;  %v5262_v32 = vcombine.high %v5246_v18, %v5246_v18  ;;  %v5263_v33 = vcombine.high %v5253_v1, %v5253_v1  ;;  %v5905_v10 = vrot.slane %v5253_v1, %v7906_v25 }
 0x284   : > { %v5909_v24 = vrot.slane %v5261_v11, %v7906_v25  ;;  %v5917_v17 = vrot.slane %v5246_v18, %v7906_v25  ;;  %v6394_v46 = vsel %vm261_vm0, %v9372_v15, %v5901_v40  ;;  %v5386_v49 = vrot.slane %v5370_v39, %v7897_v7 }
 0x285   : > { %v5264_v0 = vcombine.high %v5260_v9, %v5260_v9  ;;  %v5913_v61 = vrot.slane %v5263_v33, %v7906_v25  ;;  %v5921_v13 = vrot.slane %v5260_v9, %v7906_v25  ;;  %v5925_v38 = vrot.slane %v5262_v32, %v7906_v25  ;;  %6587 = vst.msk [vmem:[%s7944_s19 + $0xe0] sm:$0x3] %vm6474_vm6, %v6394_v46 }
 0x286   : > { %v6395_v2 = vsel %vm261_vm0, %v9423_v8, %v5905_v10  ;;  %v6396_v26 = vsel %vm261_vm0, %v4333_v28, %v5909_v24  ;;  %v6398_v42 = vsel %vm261_vm0, %v9375_v16, %v5917_v17  ;;  %v3939_v28 = vpop.f32.mrf.mxu1  ;;  %v4499_v8 = vcombine.high %v9648_v20, %v9648_v20 }
 0x287   : > { %v5929_v4 = vrot.slane %v5264_v0, %v7906_v25  ;;  %v6397_v6 = vsel %vm261_vm0, %v4335_v43, %v5913_v61  ;;  %v6399_v41 = vsel %vm261_vm0, %v9426_v55, %v5921_v13  ;;  %v6400_v15 = vsel %vm261_vm0, %v4334_v47, %v5925_v38  ;;  %6588 = vst.msk [vmem:[%s7944_s19 + $0xe2] sm:$0x3] %vm6474_vm6, %v6395_v2  ;;  %v3789_v61 = vpop.f32.mrf.mxu0 }
 0x288   : > { %6589 = vst.msk [vmem:[%s7944_s19 + $0xe4] sm:$0x3] %vm6474_vm6, %v6396_v26  ;;  %6591 = vst.msk [vmem:[%s7944_s19 + $0xe8] sm:$0x3] %vm6474_vm6, %v6398_v42  ;;  %v4500_v16 = vcombine.high %v9651_v57, %v9651_v57  ;;  %v9705_v47 = vrot.slane %v9648_v20, %v7897_v7  ;;  %v5379_v43 = vcombine.high %v5377_v44, %v5377_v44 }
 0x289   : > { %6590 = vst.msk [vmem:[%s7944_s19 + $0xe6] sm:$0x3] %vm6474_vm6, %v6397_v6  ;;  %6592 = vst.msk [vmem:[%s7944_s19 + $0xea] sm:$0x3] %vm6474_vm6, %v6399_v41  ;;  %v6401_v63 = vsel %vm261_vm0, %v4336_v50, %v5929_v4  ;;  %v5393_v35 = vrot.slane %v5377_v44, %v7897_v7  ;;  %v5400_v45 = vrot.slane %v5378_v52, %v7897_v7 }
 0x28a   : > { %6593 = vst.msk [vmem:[%s7944_s19 + $0xec] sm:$0x3] %vm6474_vm6, %v6400_v15  ;;  %6594 = vst.msk [vmem:[%s7944_s19 + $0xee] sm:$0x3] %vm6474_vm6, %v6401_v63  ;;  %v9718_v18 = vrot.slane %v9651_v57, %v7897_v7  ;;  %v5407_v1 = vrot.slane %v5379_v43, %v7897_v7  ;;  %v4631_v11 = vcombine.high %v9674_v36, %v9674_v36 }
 0x28b   : > { %v3940_v55 = vadd.f32 %v9198_v14, %v3939_v28  ;;  %v5408_v50 = vcombine.high %v5386_v49, %v5386_v49  ;;  %v5409_v39 = vcombine.high %v5393_v35, %v5393_v35  ;;  %v5410_v40 = vcombine.high %v5400_v45, %v5400_v45 }
 0x28c   : > { %v5997_v20 = vrot.slane %v5386_v49, %v7906_v25  ;;  %v5411_v44 = vcombine.high %v5407_v1, %v5407_v1  ;;  %v6001_v9 = vrot.slane %v5400_v45, %v7906_v25  ;;  %v6013_v57 = vrot.slane %v5393_v35, %v7906_v25 }
 0x28d   : > { %v6017_v32 = vrot.slane %v5407_v1, %v7906_v25  ;;  %v6005_v33 = vrot.slane %v5408_v50, %v7906_v25  ;;  %v6009_v10 = vrot.slane %v5410_v40, %v7906_v25  ;;  %v6021_v29 = vrot.slane %v5409_v39, %v7906_v25 }
 0x28e   : > { %v6418_v24 = vsel %vm261_vm0, %v9460_v54, %v5997_v20  ;;  %v6025_v17 = vrot.slane %v5411_v44, %v7906_v25  ;;  %v6419_v46 = vsel %vm261_vm0, %v9512_v62, %v6001_v9  ;;  %v6422_v52 = vsel %vm261_vm0, %v9509_v60, %v6013_v57 }
 0x28f   : > { %v6423_v0 = vsel %vm261_vm0, %v9527_v23, %v6017_v32  ;;  %6627 = vst.msk [vmem:[%s7944_s19 + $0x130] sm:$0x3] %vm6474_vm6, %v6418_v24  ;;  %v6420_v13 = vsel %vm261_vm0, %v4480_v19, %v6005_v33  ;;  %v6421_v38 = vsel %vm261_vm0, %v4482_v51, %v6009_v10  ;;  %v6424_v2 = vsel %vm261_vm0, %v4481_v34, %v6021_v29 }
 0x290   : > { %6628 = vst.msk [vmem:[%s7944_s19 + $0x132] sm:$0x3] %vm6474_vm6, %v6419_v46  ;;  %6631 = vst.msk [vmem:[%s7944_s19 + $0x138] sm:$0x3] %vm6474_vm6, %v6422_v52  ;;  %v4638_v54 = vrot.slane %v9674_v36, %v7897_v7  ;;  %v4579_v62 = vcombine.high %v9631_v30, %v9631_v30  ;;  %v4580_v19 = vcombine.high %v9636_v56, %v9636_v56 }
 0x291   : > { %6632 = vst.msk [vmem:[%s7944_s19 + $0x13a] sm:$0x3] %vm6474_vm6, %v6423_v0  ;;  %v6425_v60 = vsel %vm261_vm0, %v4483_v58, %v6025_v17  ;;  %6629 = vst.msk [vmem:[%s7944_s19 + $0x134] sm:$0x3] %vm6474_vm6, %v6420_v13  ;;  %v5314_v34 = vcombine.high %v3940_v55, %v3940_v55  ;;  %v4581_v51 = vcombine.high %v9639_v48, %v9639_v48  ;;  %v7095_v58 = vpop.f32.mrf.mxu1 }
 0x292   : > { %6630 = vst.msk [vmem:[%s7944_s19 + $0x136] sm:$0x3] %vm6474_vm6, %v6421_v38  ;;  %6633 = vst.msk [vmem:[%s7944_s19 + $0x13c] sm:$0x3] %vm6474_vm6, %v6424_v2  ;;  %v9779_v26 = vrot.slane %v4499_v8, %v7897_v7  ;;  %v5321_v42 = vrot.slane %v3940_v55, %v7897_v7  ;;  %v3790_v23 = vadd.f32 %v9198_v14, %v3789_v61 }
 0x293   : > { %6634 = vst.msk [vmem:[%s7944_s19 + $0x13e] sm:$0x3] %vm6474_vm6, %v6425_v60  ;;  %v9786_v36 = vrot.slane %v4500_v16, %v7897_v7  ;;  %v4529_v4 = vcombine.high %v9705_v47, %v9705_v47  ;;  %v4530_v6 = vcombine.high %v9718_v18, %v9718_v18  ;;  %v5328_v41 = vrot.slane %v5314_v34, %v7897_v7 }
 0x294   : > { %v4645_v15 = vrot.slane %v4631_v11, %v7897_v7  ;;  %v4646_v28 = vcombine.high %v4638_v54, %v4638_v54  ;;  %v5329_v8 = vcombine.high %v5321_v42, %v5321_v42  ;;  %v5337_v43 = vrot.slane %v5321_v42, %v7897_v7 }
 0x295   : > { %v9796_v63 = vrot.slane %v4638_v54, %v7897_v7  ;;  %v5330_v49 = vcombine.high %v5328_v41, %v5328_v41  ;;  %v5344_v16 = vrot.slane %v5328_v41, %v7897_v7  ;;  %v3955_v35 = vadd.f32 %v9198_v14, %v7095_v58 }
 0x296   : > { %v5351_v45 = vrot.slane %v5329_v8, %v7897_v7  ;;  %v5359_v1 = vcombine.high %v5337_v43, %v5337_v43  ;;  %v5965_v55 = vrot.slane %v5337_v43, %v7906_v25  ;;  %v4582_v50 = vcombine.high %v3790_v23, %v3790_v23 }
 0x297   : > { %v5358_v11 = vrot.slane %v5330_v49, %v7897_v7  ;;  %v5360_v39 = vcombine.high %v5344_v16, %v5344_v16  ;;  %v5981_v40 = vrot.slane %v5344_v16, %v7906_v25  ;;  %v4589_v20 = vrot.slane %v3790_v23, %v7897_v7 }
 0x298   : > { %v5361_v44 = vcombine.high %v5351_v45, %v5351_v45  ;;  %v5969_v9 = vrot.slane %v5351_v45, %v7906_v25  ;;  %v5973_v57 = vrot.slane %v5359_v1, %v7906_v25  ;;  %v6410_v32 = vsel %vm261_vm0, %v9544_v3, %v5965_v55  ;;  %v7073_v3 = vpop.f32.mrf.mxu0 }
 0x299   : > { %v5362_v33 = vcombine.high %v5358_v11, %v5358_v11  ;;  %v5985_v10 = vrot.slane %v5358_v11, %v7906_v25  ;;  %v5989_v29 = vrot.slane %v5360_v39, %v7906_v25  ;;  %v6414_v24 = vsel %vm261_vm0, %v9550_v21, %v5981_v40  ;;  %6619 = vst.msk [vmem:[%s7944_s19 + $0x120] sm:$0x3] %vm6474_vm6, %v6410_v32 }
 0x29a   : > { %v5977_v17 = vrot.slane %v5361_v44, %v7906_v25  ;;  %v6411_v46 = vsel %vm261_vm0, %v9596_v37, %v5969_v9  ;;  %v6412_v52 = vsel %vm261_vm0, %v4431_v27, %v5973_v57  ;;  %6623 = vst.msk [vmem:[%s7944_s19 + $0x128] sm:$0x3] %vm6474_vm6, %v6414_v24  ;;  %v4596_v0 = vrot.slane %v4582_v50, %v7897_v7  ;;  %v3949_v50 = vpop.f32.mrf.mxu1 }
 0x29b   : > { %v4647_v61 = vcombine.high %v4645_v15, %v4645_v15  ;;  %v5993_v13 = vrot.slane %v5362_v33, %v7906_v25  ;;  %v6415_v38 = vsel %vm261_vm0, %v9599_v31, %v5985_v10  ;;  %v6416_v2 = vsel %vm261_vm0, %v4432_v59, %v5989_v29  ;;  %6620 = vst.msk [vmem:[%s7944_s19 + $0x122] sm:$0x3] %vm6474_vm6, %v6411_v46 }
 0x29c   : > { %6621 = vst.msk [vmem:[%s7944_s19 + $0x124] sm:$0x3] %vm6474_vm6, %v6412_v52  ;;  %v4531_v27 = vcombine.high %v9779_v26, %v9779_v26  ;;  %v9839_v54 = vrot.slane %v4645_v15, %v7897_v7  ;;  %v9842_v60 = vrot.slane %v4646_v28, %v7897_v7  ;;  %v6413_v21 = vsel %vm261_vm0, %v4433_v12, %v5977_v17 }
 0x29d   : > { %6624 = vst.msk [vmem:[%s7944_s19 + $0x12a] sm:$0x3] %vm6474_vm6, %v6415_v38  ;;  %6625 = vst.msk [vmem:[%s7944_s19 + $0x12c] sm:$0x3] %vm6474_vm6, %v6416_v2  ;;  %v4532_v59 = vcombine.high %v9786_v36, %v9786_v36  ;;  %v6417_v34 = vsel %vm261_vm0, %v4434_v22, %v5993_v13  ;;  %v5461_v42 = vcombine.high %v3955_v35, %v3955_v35 }
 0x29e   : > { %6622 = vst.msk [vmem:[%s7944_s19 + $0x126] sm:$0x3] %vm6474_vm6, %v6413_v21  ;;  %v5468_v23 = vrot.slane %v3955_v35, %v7897_v7  ;;  %v4676_v37 = vcombine.high %v9796_v63, %v9796_v63  ;;  %6626 = vst.msk [vmem:[%s7944_s19 + $0x12e] sm:$0x3] %vm6474_vm6, %v6417_v34  ;;  %v4597_v12 = vcombine.high %v4589_v20, %v4589_v20  ;;  %v3799_v21 = vpop.f32.mrf.mxu0 }
 0x29f   : > { %v4598_v58 = vcombine.high %v4596_v0, %v4596_v0  ;;  %v3805_v41 = vadd.f32 %v9198_v14, %v7073_v3  ;;  %v9867_v15 = vrot.slane %v4647_v61, %v7897_v7  ;;  %v5475_v31 = vrot.slane %v5461_v42, %v7897_v7  ;;  %v7098_v61 = vpop.f32.mrf.mxu1 }
 0x2a0   : > { %v5476_v22 = vcombine.high %v5468_v23, %v5468_v23  ;;  %v5484_v28 = vrot.slane %v5468_v23, %v7897_v7  ;;  %v4677_v8 = vcombine.high %v9839_v54, %v9839_v54  ;;  %v4678_v43 = vcombine.high %v9842_v60, %v9842_v60 }
 0x2a1   : > { %v9876_v49 = vrot.slane %v4589_v20, %v7897_v7  ;;  %v9879_v16 = vrot.slane %v4596_v0, %v7897_v7  ;;  %v5477_v35 = vcombine.high %v5475_v31, %v5475_v31  ;;  %v5491_v45 = vrot.slane %v5475_v31, %v7897_v7  ;;  %v3959_v31 = vpop.f32.mrf.mxu1 }
 0x2a2   : > { %v5498_v1 = vrot.slane %v5476_v22, %v7897_v7  ;;  %v5506_v55 = vcombine.high %v5484_v28, %v5484_v28  ;;  %v9884_v11 = vrot.slane %v4597_v12, %v7897_v7  ;;  %v9887_v39 = vrot.slane %v4598_v58, %v7897_v7 }
 0x2a3   : > { %v6061_v40 = vrot.slane %v5484_v28, %v7906_v25  ;;  %v4729_v20 = vcombine.high %v3805_v41, %v3805_v41  ;;  %v5505_v44 = vrot.slane %v5477_v35, %v7897_v7  ;;  %v5507_v9 = vcombine.high %v5491_v45, %v5491_v45 }
 0x2a4   : > { %v5508_v57 = vcombine.high %v5498_v1, %v5498_v1  ;;  %v6065_v32 = vrot.slane %v5498_v1, %v7906_v25  ;;  %v6069_v33 = vrot.slane %v5506_v55, %v7906_v25  ;;  %v6077_v10 = vrot.slane %v5491_v45, %v7906_v25 }
 0x2a5   : > { %v6434_v29 = vsel %vm261_vm0, %v9619_v5, %v6061_v40  ;;  %v3950_v24 = vadd.f32 %v9198_v14, %v3949_v50  ;;  %v5509_v17 = vcombine.high %v5505_v44, %v5505_v44  ;;  %v6081_v52 = vrot.slane %v5505_v44, %v7906_v25 }
 0x2a6   : > { %v6073_v46 = vrot.slane %v5508_v57, %v7906_v25  ;;  %v6085_v0 = vrot.slane %v5507_v9, %v7906_v25  ;;  %6659 = vst.msk [vmem:[%s7944_s19 + $0x170] sm:$0x3] %vm6474_vm6, %v6434_v29  ;;  %v6435_v13 = vsel %vm261_vm0, %v9636_v56, %v6065_v32  ;;  %v6436_v38 = vsel %vm261_vm0, %v4578_v53, %v6069_v33 }
 0x2a7   : > { %v6438_v2 = vsel %vm261_vm0, %v9631_v30, %v6077_v10  ;;  %v9911_v3 = vrot.slane %v3805_v41, %v7897_v7  ;;  %v6089_v34 = vrot.slane %v5509_v17, %v7906_v25  ;;  %v6439_v5 = vsel %vm261_vm0, %v9639_v48, %v6081_v52  ;;  %6660 = vst.msk [vmem:[%s7944_s19 + $0x172] sm:$0x3] %vm6474_vm6, %v6435_v13 }
 0x2a8   : > { %v6437_v42 = vsel %vm261_vm0, %v4580_v19, %v6073_v46  ;;  %v6440_v53 = vsel %vm261_vm0, %v4579_v62, %v6085_v0  ;;  %6661 = vst.msk [vmem:[%s7944_s19 + $0x174] sm:$0x3] %vm6474_vm6, %v6436_v38  ;;  %6663 = vst.msk [vmem:[%s7944_s19 + $0x178] sm:$0x3] %vm6474_vm6, %v6438_v2  ;;  %v4679_v56 = vcombine.high %v9867_v15, %v9867_v15 }
 0x2a9   : > { %v4627_v19 = vcombine.high %v9876_v49, %v9876_v49  ;;  %v4628_v23 = vcombine.high %v9879_v16, %v9879_v16  ;;  %6662 = vst.msk [vmem:[%s7944_s19 + $0x176] sm:$0x3] %vm6474_vm6, %v6437_v42  ;;  %6664 = vst.msk [vmem:[%s7944_s19 + $0x17a] sm:$0x3] %vm6474_vm6, %v6439_v5  ;;  %v4743_v30 = vrot.slane %v4729_v20, %v7897_v7 }
 0x2aa   : > { %6665 = vst.msk [vmem:[%s7944_s19 + $0x17c] sm:$0x3] %vm6474_vm6, %v6440_v53  ;;  %v6441_v62 = vsel %vm261_vm0, %v4581_v51, %v6089_v34  ;;  %v5412_v12 = vcombine.high %v3950_v24, %v3950_v24  ;;  %v5419_v58 = vrot.slane %v3950_v24, %v7897_v7  ;;  %v3800_v41 = vadd.f32 %v9198_v14, %v3799_v21 }
 0x2ab   : > { %v4629_v22 = vcombine.high %v9884_v11, %v9884_v11  ;;  %v4630_v28 = vcombine.high %v9887_v39, %v9887_v39  ;;  %6666 = vst.msk [vmem:[%s7944_s19 + $0x17e] sm:$0x3] %vm6474_vm6, %v6441_v62  ;;  %v4744_v35 = vcombine.high %v9911_v3, %v9911_v3  ;;  %v3965_v48 = vadd.f32 %v9198_v14, %v7098_v61 }
 0x2ac   : > { %v9960_v51 = vrot.slane %v9911_v3, %v7897_v7  ;;  %v5426_v45 = vrot.slane %v5412_v12, %v7897_v7  ;;  %v5427_v1 = vcombine.high %v5419_v58, %v5419_v58  ;;  %v5435_v55 = vrot.slane %v5419_v58, %v7897_v7 }
 0x2ad   : > { %v4745_v50 = vcombine.high %v4743_v30, %v4743_v30  ;;  %v9965_v40 = vrot.slane %v4743_v30, %v7897_v7  ;;  %v4680_v20 = vcombine.high %v3800_v41, %v3800_v41  ;;  %v3960_v44 = vadd.f32 %v9198_v14, %v3959_v31 }
 0x2ae   : > { %v5428_v9 = vcombine.high %v5426_v45, %v5426_v45  ;;  %v5442_v57 = vrot.slane %v5426_v45, %v7897_v7  ;;  %v5449_v32 = vrot.slane %v5427_v1, %v7897_v7  ;;  %v5457_v33 = vcombine.high %v5435_v55, %v5435_v55 }
 0x2af   : > { %v6029_v10 = vrot.slane %v5435_v55, %v7906_v25  ;;  %v9972_v29 = vrot.slane %v3800_v41, %v7897_v7  ;;  %v5559_v24 = vcombine.high %v3965_v48, %v3965_v48  ;;  %v5566_v17 = vrot.slane %v3965_v48, %v7897_v7 }
 0x2b0   : > { %v5456_v46 = vrot.slane %v5428_v9, %v7897_v7  ;;  %v5458_v52 = vcombine.high %v5442_v57, %v5442_v57  ;;  %v5459_v0 = vcombine.high %v5449_v32, %v5449_v32  ;;  %v6033_v14 = vrot.slane %v5449_v32, %v7906_v25 }
 0x2b1   : > { %v6037_v61 = vrot.slane %v5457_v33, %v7906_v25  ;;  %v6045_v13 = vrot.slane %v5442_v57, %v7906_v25  ;;  %v6426_v38 = vsel %vm261_vm0, %v9705_v47, %v6029_v10  ;;  %v5510_v2 = vcombine.high %v3960_v44, %v3960_v44 }
 0x2b2   : > { %v5460_v3 = vcombine.high %v5456_v46, %v5456_v46  ;;  %v6041_v21 = vrot.slane %v5459_v0, %v7906_v25  ;;  %v6049_v34 = vrot.slane %v5456_v46, %v7906_v25  ;;  %v6053_v42 = vrot.slane %v5458_v52, %v7906_v25  ;;  %6651 = vst.msk [vmem:[%s7944_s19 + $0x160] sm:$0x3] %vm6474_vm6, %v6426_v38 }
 0x2b3   : > { %v6427_v5 = vsel %vm261_vm0, %v9779_v26, %v6033_v14  ;;  %v6428_v53 = vsel %vm261_vm0, %v4529_v4, %v6037_v61  ;;  %v6430_v30 = vsel %vm261_vm0, %v9718_v18, %v6045_v13  ;;  %v9995_v62 = vrot.slane %v4680_v20, %v7897_v7 }
 0x2b4   : > { %v6057_v12 = vrot.slane %v5460_v3, %v7906_v25  ;;  %v6429_v58 = vsel %vm261_vm0, %v4531_v27, %v6041_v21  ;;  %v6431_v41 = vsel %vm261_vm0, %v9786_v36, %v6049_v34  ;;  %v6432_v47 = vsel %vm261_vm0, %v4530_v6, %v6053_v42  ;;  %6652 = vst.msk [vmem:[%s7944_s19 + $0x162] sm:$0x3] %vm6474_vm6, %v6427_v5 }
 0x2b5   : > { %6653 = vst.msk [vmem:[%s7944_s19 + $0x164] sm:$0x3] %vm6474_vm6, %v6428_v53  ;;  %6655 = vst.msk [vmem:[%s7944_s19 + $0x168] sm:$0x3] %vm6474_vm6, %v6430_v30  ;;  %v10015_v4 = vrot.slane %v4744_v35, %v7897_v7  ;;  %v10018_v26 = vrot.slane %v4745_v50, %v7897_v7  ;;  %v4695_v18 = vcombine.high %v9972_v29, %v9972_v29  ;;  %v7101_v53 = vpop.f32.mrf.mxu1 }
 0x2b6   : > { %6654 = vst.msk [vmem:[%s7944_s19 + $0x166] sm:$0x3] %vm6474_vm6, %v6429_v58  ;;  %6656 = vst.msk [vmem:[%s7944_s19 + $0x16a] sm:$0x3] %vm6474_vm6, %v6431_v41  ;;  %v10030_v6 = vrot.slane %v9972_v29, %v7897_v7  ;;  %v6433_v27 = vsel %vm261_vm0, %v4532_v59, %v6057_v12  ;;  %v5573_v31 = vrot.slane %v5559_v24, %v7897_v7 }
 0x2b7   : > { %6657 = vst.msk [vmem:[%s7944_s19 + $0x16c] sm:$0x3] %vm6474_vm6, %v6432_v47  ;;  %v5574_v35 = vcombine.high %v5566_v17, %v5566_v17  ;;  %v5582_v48 = vrot.slane %v5566_v17, %v7897_v7  ;;  %6658 = vst.msk [vmem:[%s7944_s19 + $0x16e] sm:$0x3] %vm6474_vm6, %v6433_v27  ;;  %v4696_v45 = vcombine.high %v9995_v62, %v9995_v62 }
 0x2b8   : > { %v10044_v1 = vrot.slane %v9995_v62, %v7897_v7  ;;  %v5517_v55 = vrot.slane %v3960_v44, %v7897_v7  ;;  %v5524_v36 = vrot.slane %v5510_v2, %v7897_v7  ;;  %v5575_v50 = vcombine.high %v5573_v31, %v5573_v31 }
 0x2b9   : > { %v5589_v59 = vrot.slane %v5573_v31, %v7897_v7  ;;  %v5596_v20 = vrot.slane %v5574_v35, %v7897_v7  ;;  %v5604_v9 = vcombine.high %v5582_v48, %v5582_v48  ;;  %v6125_v57 = vrot.slane %v5582_v48, %v7906_v25 }
 0x2ba   : > { %v5525_v32 = vcombine.high %v5517_v55, %v5517_v55  ;;  %v5526_v33 = vcombine.high %v5524_v36, %v5524_v36  ;;  %v5533_v10 = vrot.slane %v5517_v55, %v7897_v7  ;;  %v5603_v24 = vrot.slane %v5575_v50, %v7897_v7 }
 0x2bb   : > { %v5605_v17 = vcombine.high %v5589_v59, %v5589_v59  ;;  %v5606_v46 = vcombine.high %v5596_v20, %v5596_v20  ;;  %v6129_v44 = vrot.slane %v5596_v20, %v7906_v25  ;;  %v6133_v52 = vrot.slane %v5604_v9, %v7906_v25 }
 0x2bc   : > { %v6141_v0 = vrot.slane %v5589_v59, %v7906_v25  ;;  %v6450_v14 = vsel %vm261_vm0, %v9796_v63, %v6125_v57  ;;  %v5540_v61 = vrot.slane %v5524_v36, %v7897_v7  ;;  %v5607_v13 = vcombine.high %v5603_v24, %v5603_v24 }
 0x2bd   : > { %v6137_v38 = vrot.slane %v5606_v46, %v7906_v25  ;;  %v6145_v2 = vrot.slane %v5603_v24, %v7906_v25  ;;  %v6149_v3 = vrot.slane %v5605_v17, %v7906_v25  ;;  %6691 = vst.msk [vmem:[%s7944_s19 + $0x1b0] sm:$0x3] %vm6474_vm6, %v6450_v14  ;;  %v6451_v21 = vsel %vm261_vm0, %v9842_v60, %v6129_v44 }
 0x2be   : > { %v6452_v34 = vsel %vm261_vm0, %v4676_v37, %v6133_v52  ;;  %v6454_v42 = vsel %vm261_vm0, %v9839_v54, %v6141_v0  ;;  %v5547_v5 = vrot.slane %v5525_v32, %v7897_v7  ;;  %v6153_v30 = vrot.slane %v5607_v13, %v7906_v25  ;;  %6692 = vst.msk [vmem:[%s7944_s19 + $0x1b2] sm:$0x3] %vm6474_vm6, %v6451_v21 }
 0x2bf   : > { %v6453_v12 = vsel %vm261_vm0, %v4678_v43, %v6137_v38  ;;  %v6455_v58 = vsel %vm261_vm0, %v9867_v15, %v6145_v2  ;;  %v6456_v63 = vsel %vm261_vm0, %v4677_v8, %v6149_v3  ;;  %6693 = vst.msk [vmem:[%s7944_s19 + $0x1b4] sm:$0x3] %vm6474_vm6, %v6452_v34  ;;  %6695 = vst.msk [vmem:[%s7944_s19 + $0x1b8] sm:$0x3] %vm6474_vm6, %v6454_v42 }
 0x2c0   : > { %6694 = vst.msk [vmem:[%s7944_s19 + $0x1b6] sm:$0x3] %vm6474_vm6, %v6453_v12  ;;  %6696 = vst.msk [vmem:[%s7944_s19 + $0x1ba] sm:$0x3] %vm6474_vm6, %v6455_v58  ;;  %v5554_v60 = vrot.slane %v5526_v33, %v7897_v7  ;;  %v5555_v37 = vcombine.high %v5533_v10, %v5533_v10  ;;  %v5556_v43 = vcombine.high %v5540_v61, %v5540_v61 }
 0x2c1   : > { %6697 = vst.msk [vmem:[%s7944_s19 + $0x1bc] sm:$0x3] %vm6474_vm6, %v6456_v63  ;;  %v5557_v54 = vcombine.high %v5547_v5, %v5547_v5  ;;  %v6457_v8 = vsel %vm261_vm0, %v4679_v56, %v6153_v30  ;;  %v6093_v41 = vrot.slane %v5533_v10, %v7906_v25  ;;  %v6097_v47 = vrot.slane %v5547_v5, %v7906_v25  ;;  %v3969_v56 = vpop.f32.mrf.mxu1 }
 0x2c2   : > { %v6109_v27 = vrot.slane %v5540_v61, %v7906_v25  ;;  %6698 = vst.msk [vmem:[%s7944_s19 + $0x1be] sm:$0x3] %vm6474_vm6, %v6457_v8  ;;  %v5558_v31 = vcombine.high %v5554_v60, %v5554_v60  ;;  %v6101_v35 = vrot.slane %v5555_v37, %v7906_v25  ;;  %v6113_v15 = vrot.slane %v5554_v60, %v7906_v25 }
 0x2c3   : > { %v6105_v48 = vrot.slane %v5557_v54, %v7906_v25  ;;  %v6117_v55 = vrot.slane %v5556_v43, %v7906_v25  ;;  %v6442_v36 = vsel %vm261_vm0, %v9876_v49, %v6093_v41  ;;  %v6443_v50 = vsel %vm261_vm0, %v9884_v11, %v6097_v47 }
 0x2c4   : > { %v6446_v59 = vsel %vm261_vm0, %v9879_v16, %v6109_v27  ;;  %v6121_v20 = vrot.slane %v5558_v31, %v7906_v25  ;;  %v6444_v9 = vsel %vm261_vm0, %v4627_v19, %v6101_v35  ;;  %v6447_v32 = vsel %vm261_vm0, %v9887_v39, %v6113_v15  ;;  %6683 = vst.msk [vmem:[%s7944_s19 + $0x1a0] sm:$0x3] %vm6474_vm6, %v6442_v36  ;;  %v7160_v19 = vld [vmem:[%s10286_s2] ss:$0 sm:$0xff] }
 0x2c5   : > { %v6445_v57 = vsel %vm261_vm0, %v4629_v22, %v6105_v48  ;;  %6684 = vst.msk [vmem:[%s7944_s19 + $0x1a2] sm:$0x3] %vm6474_vm6, %v6443_v50  ;;  %6687 = vst.msk [vmem:[%s7944_s19 + $0x1a8] sm:$0x3] %vm6474_vm6, %v6446_v59  ;;  %v4774_v49 = vcombine.high %v9960_v51, %v9960_v51  ;;  %v6448_v11 = vsel %vm261_vm0, %v4628_v23, %v6117_v55 }
 0x2c6   : > { %6685 = vst.msk [vmem:[%s7944_s19 + $0x1a4] sm:$0x3] %vm6474_vm6, %v6444_v9  ;;  %6686 = vst.msk [vmem:[%s7944_s19 + $0x1a6] sm:$0x3] %vm6474_vm6, %v6445_v57  ;;  %v3975_v22 = vadd.f32 %v7160_v19, %v7101_v53  ;;  %v3970_v33 = vadd.f32 %v7160_v19, %v3969_v56  ;;  %v4775_v10 = vcombine.high %v9965_v40, %v9965_v40 }
 0x2c7   : > { %6688 = vst.msk [vmem:[%s7944_s19 + $0x1aa] sm:$0x3] %vm6474_vm6, %v6447_v32  ;;  %v10154_v16 = vrot.slane %v4695_v18, %v7897_v7  ;;  %v10160_v23 = vrot.slane %v4696_v45, %v7897_v7  ;;  %v6449_v24 = vsel %vm261_vm0, %v4630_v28, %v6121_v20  ;;  %6689 = vst.msk [vmem:[%s7944_s19 + $0x1ac] sm:$0x3] %vm6474_vm6, %v6448_v11 }
 0x2c8   : > { %6690 = vst.msk [vmem:[%s7944_s19 + $0x1ae] sm:$0x3] %vm6474_vm6, %v6449_v24  ;;  %v5657_v17 = vcombine.high %v3975_v22, %v3975_v22  ;;  %v5664_v29 = vrot.slane %v3975_v22, %v7897_v7  ;;  %v5608_v18 = vcombine.high %v3970_v33, %v3970_v33  ;;  %v5615_v46 = vrot.slane %v3970_v33, %v7897_v7 }
 0x2c9   : > { %v4776_v62 = vcombine.high %v10015_v4, %v10015_v4  ;;  %v4777_v45 = vcombine.high %v10018_v26, %v10018_v26  ;;  %v4725_v39 = vcombine.high %v10030_v6, %v10030_v6  ;;  %v4726_v28 = vcombine.high %v10044_v1, %v10044_v1 }
 0x2ca   : > { %v5671_v44 = vrot.slane %v5657_v17, %v7897_v7  ;;  %v5672_v52 = vcombine.high %v5664_v29, %v5664_v29  ;;  %v5680_v0 = vrot.slane %v5664_v29, %v7897_v7  ;;  %v5622_v14 = vrot.slane %v5608_v18, %v7897_v7 }
 0x2cb   : > { %v4727_v61 = vcombine.high %v10154_v16, %v10154_v16  ;;  %v4728_v13 = vcombine.high %v10160_v23, %v10160_v23  ;;  %v5623_v38 = vcombine.high %v5615_v46, %v5615_v46  ;;  %v5631_v2 = vrot.slane %v5615_v46, %v7897_v7 }
 0x2cc   : > { %v5673_v3 = vcombine.high %v5671_v44, %v5671_v44  ;;  %v5687_v21 = vrot.slane %v5671_v44, %v7897_v7  ;;  %v5694_v34 = vrot.slane %v5672_v52, %v7897_v7  ;;  %v5702_v42 = vcombine.high %v5680_v0, %v5680_v0 }
 0x2cd   : > { %v6189_v5 = vrot.slane %v5680_v0, %v7906_v25  ;;  %v5624_v53 = vcombine.high %v5622_v14, %v5622_v14  ;;  %v5638_v30 = vrot.slane %v5622_v14, %v7897_v7  ;;  %v5645_v12 = vrot.slane %v5623_v38, %v7897_v7 }
 0x2ce   : > { %v5701_v58 = vrot.slane %v5673_v3, %v7897_v7  ;;  %v5703_v63 = vcombine.high %v5687_v21, %v5687_v21  ;;  %v5704_v60 = vcombine.high %v5694_v34, %v5694_v34  ;;  %v6193_v37 = vrot.slane %v5694_v34, %v7906_v25 }
 0x2cf   : > { %v6197_v43 = vrot.slane %v5702_v42, %v7906_v25  ;;  %v6205_v54 = vrot.slane %v5687_v21, %v7906_v25  ;;  %v6466_v8 = vsel %vm261_vm0, %v9960_v51, %v6189_v5  ;;  %v5652_v41 = vrot.slane %v5624_v53, %v7897_v7 }
 0x2d0   : > { %v5705_v47 = vcombine.high %v5701_v58, %v5701_v58  ;;  %v6201_v27 = vrot.slane %v5704_v60, %v7906_v25  ;;  %v6209_v31 = vrot.slane %v5701_v58, %v7906_v25  ;;  %v6213_v35 = vrot.slane %v5703_v63, %v7906_v25  ;;  %6723 = vst.msk [vmem:[%s7944_s19 + $0x1f0] sm:$0x3] %vm6474_vm6, %v6466_v8 }
 0x2d1   : > { %v6467_v48 = vsel %vm261_vm0, %v10015_v4, %v6193_v37  ;;  %v6468_v51 = vsel %vm261_vm0, %v4774_v49, %v6197_v43  ;;  %v6470_v7 = vsel %vm261_vm0, %v9965_v40, %v6205_v54  ;;  %v5653_v15 = vcombine.high %v5631_v2, %v5631_v2 }
 0x2d2   : > { %v6217_v56 = vrot.slane %v5705_v47, %v7906_v25  ;;  %v6469_v55 = vsel %vm261_vm0, %v4776_v62, %v6201_v27  ;;  %v6471_v36 = vsel %vm261_vm0, %v10018_v26, %v6209_v31  ;;  %v6472_v50 = vsel %vm261_vm0, %v4775_v10, %v6213_v35  ;;  %6724 = vst.msk [vmem:[%s7944_s19 + $0x1f2] sm:$0x3] %vm6474_vm6, %v6467_v48 }
 0x2d3   : > { %6725 = vst.msk [vmem:[%s7944_s19 + $0x1f4] sm:$0x3] %vm6474_vm6, %v6468_v51  ;;  %6727 = vst.msk [vmem:[%s7944_s19 + $0x1f8] sm:$0x3] %vm6474_vm6, %v6470_v7  ;;  %v5654_v40 = vcombine.high %v5638_v30, %v5638_v30  ;;  %v5655_v4 = vcombine.high %v5645_v12, %v5645_v12  ;;  %v5656_v59 = vcombine.high %v5652_v41, %v5652_v41 }
 0x2d4   : > { %6726 = vst.msk [vmem:[%s7944_s19 + $0x1f6] sm:$0x3] %vm6474_vm6, %v6469_v55  ;;  %6728 = vst.msk [vmem:[%s7944_s19 + $0x1fa] sm:$0x3] %vm6474_vm6, %v6471_v36  ;;  %v6157_v26 = vrot.slane %v5631_v2, %v7906_v25  ;;  %v6473_v20 = vsel %vm261_vm0, %v4777_v45, %v6217_v56  ;;  %v6161_v9 = vrot.slane %v5645_v12, %v7906_v25 }
 0x2d5   : > { %6729 = vst.msk [vmem:[%s7944_s19 + $0x1fc] sm:$0x3] %vm6474_vm6, %v6472_v50  ;;  %v6165_v57 = vrot.slane %v5653_v15, %v7906_v25  ;;  %v6173_v32 = vrot.slane %v5638_v30, %v7906_v25  ;;  %6730 = vst.msk [vmem:[%s7944_s19 + $0x1fe] sm:$0x3] %vm6474_vm6, %v6473_v20  ;;  %v6169_v49 = vrot.slane %v5655_v4, %v7906_v25 }
 0x2d6   : > { %v6177_v11 = vrot.slane %v5652_v41, %v7906_v25  ;;  %v6181_v19 = vrot.slane %v5654_v40, %v7906_v25  ;;  %v6185_v22 = vrot.slane %v5656_v59, %v7906_v25  ;;  %v6458_v33 = vsel %vm261_vm0, %v10030_v6, %v6157_v26 }
 0x2d7   : > { %v6459_v10 = vsel %vm261_vm0, %v10154_v16, %v6161_v9  ;;  %v6460_v24 = vsel %vm261_vm0, %v4725_v39, %v6165_v57  ;;  %v6462_v17 = vsel %vm261_vm0, %v10044_v1, %v6173_v32  ;;  %v6461_v29 = vsel %vm261_vm0, %v4727_v61, %v6169_v49  ;;  %6715 = vst.msk [vmem:[%s7944_s19 + $0x1e0] sm:$0x3] %vm6474_vm6, %v6458_v33 }
 0x2d8   : > { %v6463_v18 = vsel %vm261_vm0, %v10160_v23, %v6177_v11  ;;  %v6464_v25 = vsel %vm261_vm0, %v4726_v28, %v6181_v19  ;;  %v6465_v6 = vsel %vm261_vm0, %v4728_v13, %v6185_v22  ;;  %6716 = vst.msk [vmem:[%s7944_s19 + $0x1e2] sm:$0x3] %vm6474_vm6, %v6459_v10  ;;  %6717 = vst.msk [vmem:[%s7944_s19 + $0x1e4] sm:$0x3] %vm6474_vm6, %v6460_v24 }
 0x2d9   : > { %6719 = vst.msk [vmem:[%s7944_s19 + $0x1e8] sm:$0x3] %vm6474_vm6, %v6462_v17  ;;  %6718 = vst.msk [vmem:[%s7944_s19 + $0x1e6] sm:$0x3] %vm6474_vm6, %v6461_v29 }
 0x2da   : > { %6720 = vst.msk [vmem:[%s7944_s19 + $0x1ea] sm:$0x3] %vm6474_vm6, %v6463_v18  ;;  %6721 = vst.msk [vmem:[%s7944_s19 + $0x1ec] sm:$0x3] %vm6474_vm6, %v6464_v25 }
 0x2db   : > { %6722 = vst.msk [vmem:[%s7944_s19 + $0x1ee] sm:$0x3] %vm6474_vm6, %v6465_v6 }
 0x2dc PF: > { %s13_s16 = sadd.s32 1, %s7199_s16   ;;  %s10288_s12 = smov %s7191_s14 }
 0x2dd   : > { %p10_p11 = scmp.ge.s32.totalorder %s13_s16, 6   ;;  %s10289_s13 = smov %s7195_s15 }
 0x2de   : > { %s10290_s14 = smov %s10293_s17  ;;  %s10291_s15 = smov %s10297_s18 }
 0x2df   :  { %12 = sbr.rel (!%p10_p11) target bundleno = 3 (0x3), region = 68 }

</bundles_post_ra>
